<compile_context>
chip_gen: v5e
topology: v5e:2x2
jax: 0.10.0
libtpu: 0.0.40
codegen_flags: <defaults>
</compile_context>

<pallas_src>
import functools

import jax
import jax.numpy as jnp
from jax import lax
from jax.experimental import pallas as pl
from jax.experimental.pallas import tpu as pltpu


NEG_INF = -1.0e30  # plain Python float: must NOT be a jnp array (captured-constant error)


# ----------------------------------------------------------------------------
# Pallas kernel: grouped-query causal flash attention + fused KV-cache write
# ----------------------------------------------------------------------------
def _flash_attn_kernel(qi_tbl, ki_tbl,                    # scalar-prefetch (SMEM)
                       q_ref, k_ref, v_ref,               # inputs (VMEM tiles)
                       o_ref, cache_ref,                  # outputs (VMEM tiles)
                       m_ref, l_ref, acc_ref, qs_ref, *,  # scratch
                       scale, group, head_dim, block, matmul_dtype, approx_recip):
    """Grid = (num_kv_heads, n_steps) with n_steps = nq*(nq+1)/2 (lower triangle only).

      q_ref     : (block, group*head_dim)   this kv-head's group of query columns
      k_ref     : (block, head_dim)         one K tile of this kv head
      v_ref     : (block, head_dim)         one V tile of this kv head
      o_ref     : (block, group*head_dim)   lane-dense slice of the [T, H*D] output
      cache_ref : (2, block, head_dim)      this (kv, qi) slab of the KV cache
    Scratch (persists across the step axis; re-initialized when ki == 0):
      m_ref, l_ref : (group*block, 1)  online-softmax running max / sum (f32)
      acc_ref      : (group*block, head_dim) f32 accumulator
      qs_ref       : (group*block, head_dim) scaled Q in matmul dtype (hoisted cast)
    """
    s_idx = pl.program_id(1)
    qi = qi_tbl[s_idx]
    ki = ki_tbl[s_idx]
    gb = group * block

    @pl.when(ki == 0)
    def _init():
        m_ref[...] = jnp.full_like(m_ref, -jnp.inf)
        l_ref[...] = jnp.zeros_like(l_ref)
        acc_ref[...] = jnp.zeros_like(acc_ref)
        # Hoist the per-step scale + cast: Q is resident for the whole q block.
        for g in range(group):
            qg = q_ref[:, g * head_dim:(g + 1) * head_dim].astype(jnp.float32) * scale
            qs_ref[g * block:(g + 1) * block, :] = qg.astype(matmul_dtype)

    def _accumulate(masked):
        k = k_ref[...].astype(matmul_dtype)               # (block, D), loaded once per step
        v = v_ref[...].astype(matmul_dtype)               # (block, D)
        q = qs_ref[...]                                   # (group*block, D), pre-scaled
        # One big QK^T for the whole GQA group, contracting over D (no K transpose).
        s = lax.dot_general(q, k, (((1,), (1,)), ((), ())),
                            preferred_element_type=jnp.float32)   # (gb, block)
        if masked:
            # Diagonal block only: local col <= (row within the q block).
            row = lax.broadcasted_iota(jnp.int32, (gb, block), 0)
            col = lax.broadcasted_iota(jnp.int32, (gb, block), 1)
            causal = col <= (row % block)
            s = jnp.where(causal, s, NEG_INF)
        m_prev = m_ref[...]                               # (gb, 1)
        m_new = jnp.maximum(m_prev, jnp.max(s, axis=-1, keepdims=True))
        alpha = jnp.exp(m_prev - m_new)
        p = jnp.exp(s - m_new)                            # f32 softmax numerator
        l_ref[...] = alpha * l_ref[...] + jnp.sum(p, axis=-1, keepdims=True)
        pv = lax.dot_general(p.astype(matmul_dtype), v, (((1,), (0,)), ((), ())),
                             preferred_element_type=jnp.float32)  # (gb, D)
        acc_ref[...] = alpha * acc_ref[...] + pv
        m_ref[...] = m_new

    @pl.when(ki < qi)       # fully-visible KV block: no mask math at all
    def _full():
        _accumulate(masked=False)

    @pl.when(ki == qi)      # diagonal block: mask, then finalize (last step of this qi)
    def _diag():
        _accumulate(masked=True)
        if approx_recip:
            inv_l = pl.reciprocal(l_ref[...], approx=True)   # EUP slot, effectively free
        else:
            inv_l = 1.0 / l_ref[...]
        o = acc_ref[...] * inv_l                             # (gb, D) f32
        for g in range(group):
            o_ref[:, g * head_dim:(g + 1) * head_dim] = (
                o[g * block:(g + 1) * block, :].astype(o_ref.dtype))
        # Fused KV-cache write: this K/V tile is exactly this (kv, qi) cache slab.
        cache_ref[0] = k_ref[...].astype(cache_ref.dtype)
        cache_ref[1] = v_ref[...].astype(cache_ref.dtype)


# ----------------------------------------------------------------------------
# Wrapper
# ----------------------------------------------------------------------------
def attention_forward(query, key, value, kv_cache, *, num_heads, num_kv_heads,
                      head_dim, scale, block_seq=512, matmul_dtype=jnp.bfloat16,
                      approx_recip=True):
    """vLLM-style Attention.forward (decoder, prefill) as one fused Pallas TPU kernel.

    query: (T, num_heads * head_dim)
    key/value: (T, num_kv_heads * head_dim)
    kv_cache: (2, num_kv_heads, T, head_dim)  (shape/dtype template; fully rewritten)
    Returns (output, updated_kv_cache) with output shaped like query.

    block_seq: sequence tile. Recommended: <=512 on v7x (64 MiB VMEM), 512-1024 on
               v5e/v6e (128 MiB VMEM). matmul_dtype=jnp.bfloat16 (default) uses bf16
               MXU operands with f32 accumulation on every TPU generation.
    """
    T = query.shape[0]
    dtype = query.dtype
    assert num_heads % num_kv_heads == 0
    group = num_heads // num_kv_heads
    assert head_dim % 128 == 0, "head_dim must be a multiple of 128 (lane-dense tiles)"
    assert kv_cache.shape == (2, num_kv_heads, T, head_dim)

    block = min(block_seq, T)
    assert T % block == 0 and block % 8 == 0
    nq = T // block

    # Flattened lower-triangular step schedule: for each qi, ki = 0..qi (diag last).
    qi_list, ki_list = [], []
    for qi in range(nq):
        for ki in range(qi + 1):
            qi_list.append(qi)
            ki_list.append(ki)
    n_steps = len(qi_list)                         # nq*(nq+1)/2 -> no dead grid steps
    qi_tbl = jnp.asarray(qi_list, dtype=jnp.int32)
    ki_tbl = jnp.asarray(ki_list, dtype=jnp.int32)

    # Generation-aware VMEM budget derived from the actual tile footprint
    # (double-buffered pipelined operands + persistent scratch), capped at 96 MiB;
    # with block_seq<=512 this stays within v7x's 64 MiB physical VMEM.
    in_b = jnp.dtype(dtype).itemsize
    cache_b = jnp.dtype(kv_cache.dtype).itemsize
    mm_b = jnp.dtype(matmul_dtype).itemsize
    gb = group * block
    tiles = (block * group * head_dim * in_b        # Q
             + 2 * block * head_dim * in_b          # K, V
             + block * group * head_dim * in_b      # O
             + 2 * block * head_dim * cache_b)      # cache slab
    scratch = gb * head_dim * 4 + gb * head_dim * mm_b + 2 * gb * 128 * 4
    need = 2 * tiles + scratch
    vmem_limit = int(min(max(2 * need, 32 * 1024 * 1024), 96 * 1024 * 1024))

    kernel = functools.partial(
        _flash_attn_kernel, scale=float(scale), group=group, head_dim=head_dim,
        block=block, matmul_dtype=matmul_dtype, approx_recip=approx_recip)

    out, new_cache = pl.pallas_call(
        kernel,
        out_shape=(
            jax.ShapeDtypeStruct((T, num_heads * head_dim), dtype),
            jax.ShapeDtypeStruct(kv_cache.shape, kv_cache.dtype),
        ),
        grid_spec=pltpu.PrefetchScalarGridSpec(
            num_scalar_prefetch=2,                     # qi_tbl, ki_tbl in SMEM
            grid=(num_kv_heads, n_steps),
            in_specs=[
                # Q: native [T, H*D]; one kv-head's group of columns is contiguous.
                pl.BlockSpec((block, group * head_dim),
                             lambda kv, s, qt, kt: (qt[s], kv)),
                # K / V: native [T, KVH*D]; only lower-triangular (contributing) tiles
                # are ever scheduled, so every DMA'd tile is used.
                pl.BlockSpec((block, head_dim),
                             lambda kv, s, qt, kt: (kt[s], kv)),
                pl.BlockSpec((block, head_dim),
                             lambda kv, s, qt, kt: (kt[s], kv)),
            ],
            out_specs=[
                pl.BlockSpec((block, group * head_dim),
                             lambda kv, s, qt, kt: (qt[s], kv)),
                # KV-cache slab for this (kv, qi); written once, at the diagonal step.
                pl.BlockSpec((2, None, block, head_dim),
                             lambda kv, s, qt, kt: (0, kv, qt[s], 0)),
            ],
            scratch_shapes=[
                pltpu.VMEM((gb, 1), jnp.float32),            # running max m
                pltpu.VMEM((gb, 1), jnp.float32),            # running sum l
                pltpu.VMEM((gb, head_dim), jnp.float32),     # f32 accumulator
                pltpu.VMEM((gb, head_dim), matmul_dtype),    # pre-scaled Q (hoisted)
            ]),
        compiler_params=pltpu.CompilerParams(
            # kv-head axis parallel -> v7x's 2 TensorCores split the kv heads;
            # step axis carries the online-softmax accumulator -> arbitrary.
            dimension_semantics=("parallel", "arbitrary"),
            vmem_limit_bytes=vmem_limit),
    )(qi_tbl, ki_tbl, query, key, value)

    return out, new_cache


# ----------------------------------------------------------------------------
# Pure-JAX reference (for correctness checks)
# ----------------------------------------------------------------------------
def _reference(query, key, value, *, num_heads, num_kv_heads, head_dim, scale):
    T = query.shape[0]
    group = num_heads // num_kv_heads
    q = query.reshape(T, num_heads, head_dim)
    k = jnp.repeat(key.reshape(T, num_kv_heads, head_dim), group, axis=1)
    v = jnp.repeat(value.reshape(T, num_kv_heads, head_dim), group, axis=1)
    s = jnp.einsum("thd,shd->hts", q, k,
                   precision=lax.Precision.HIGHEST).astype(jnp.float32) * scale
    mask = jnp.tril(jnp.ones((T, T), dtype=bool))
    s = jnp.where(mask[None], s, -1e30)
    p = jax.nn.softmax(s, axis=-1)
    o = jnp.einsum("hts,shd->thd", p, v.astype(jnp.float32),
                   precision=lax.Precision.HIGHEST)
    return o.reshape(T, num_heads * head_dim).astype(query.dtype)


if __name__ == "__main__":
    # Module hyper-params (Attention.__init__): num_heads, head_dim, scale, num_kv_heads
    num_heads = 4
    num_kv_heads = 2
    head_dim = 128
    seq_len = 256
    scale = 1.0 / (head_dim ** 0.5)

    rng = jax.random.PRNGKey(0)
    kq, kk, kv = jax.random.split(rng, 3)
    query = jax.random.normal(kq, (seq_len, num_heads * head_dim), dtype=jnp.float32)
    key_ = jax.random.normal(kk, (seq_len, num_kv_heads * head_dim), dtype=jnp.float32)
    value = jax.random.normal(kv, (seq_len, num_kv_heads * head_dim), dtype=jnp.float32)
    kv_cache = jnp.zeros((2, num_kv_heads, seq_len, head_dim), dtype=jnp.float32)

    ref = _reference(query, key_, value, num_heads=num_heads,
                     num_kv_heads=num_kv_heads, head_dim=head_dim, scale=scale)

    # f32 MXU-operand path (tight check); block_seq=128 exercises the triangular schedule.
    out, new_cache = attention_forward(
        query, key_, value, kv_cache,
        num_heads=num_heads, num_kv_heads=num_kv_heads, head_dim=head_dim,
        scale=scale, block_seq=128, matmul_dtype=jnp.float32, approx_recip=False)
    out = jax.block_until_ready(out)
    new_cache = jax.block_until_ready(new_cache)
    assert jnp.allclose(out, ref, atol=1e-3, rtol=1e-3), "attention output mismatch (f32)"

    ref_k = key_.reshape(seq_len, num_kv_heads, head_dim).transpose(1, 0, 2)
    ref_v = value.reshape(seq_len, num_kv_heads, head_dim).transpose(1, 0, 2)
    assert jnp.allclose(new_cache[0], ref_k) and jnp.allclose(new_cache[1], ref_v), \
        "kv-cache write mismatch"

    # Default fast path: bf16 MXU operands, approx reciprocal (looser tolerance).
    out_bf16, cache_bf16 = attention_forward(
        query, key_, value, kv_cache,
        num_heads=num_heads, num_kv_heads=num_kv_heads, head_dim=head_dim,
        scale=scale, block_seq=128)
    out_bf16 = jax.block_until_ready(out_bf16)
    cache_bf16 = jax.block_until_ready(cache_bf16)
    assert jnp.allclose(out_bf16, ref, atol=5e-2, rtol=5e-2), \
        "attention output mismatch (bf16 operands)"
    assert jnp.allclose(cache_bf16[0], ref_k) and jnp.allclose(cache_bf16[1], ref_v), \
        "kv-cache write mismatch (bf16 path)"

    print("KERNEL_OK")
</pallas_src>

<mosaic_0001>
module attributes {stable_mosaic.version = 11 : i64} {
  func.func @_flash_attn_kernel(%arg0: i32, %arg1: i32, %arg2: memref<3xi32, #tpu.memory_space<smem>>, %arg3: memref<3xi32, #tpu.memory_space<smem>>, %arg4: memref<128x256xf32, #tpu.memory_space<vmem>>, %arg5: memref<128x128xf32, #tpu.memory_space<vmem>>, %arg6: memref<128x128xf32, #tpu.memory_space<vmem>>, %arg7: memref<128x256xf32, #tpu.memory_space<vmem>>, %arg8: memref<2x1x128x128xf32, #tpu.memory_space<vmem>>, %arg9: memref<256x1xf32, #tpu.memory_space<vmem>>, %arg10: memref<256x1xf32, #tpu.memory_space<vmem>>, %arg11: memref<256x128xf32, #tpu.memory_space<vmem>>, %arg12: memref<256x128xf32, #tpu.memory_space<vmem>>) attributes {dimension_semantics = [#tpu.dimension_semantics<parallel>, #tpu.dimension_semantics<arbitrary>], iteration_bounds = array<i64: 2, 3>, scalar_prefetch = 2 : i64, scratch_operands = 4 : i64, tpu.core_type = #tpu.core_type<tc>, window_params = [{transform_indices = @transform_0, window_bounds = array<i64: 128, 256>}, {transform_indices = @transform_1, window_bounds = array<i64: 128, 128>}, {transform_indices = @transform_2, window_bounds = array<i64: 128, 128>}, {transform_indices = @transform_3, window_bounds = array<i64: 128, 256>}, {transform_indices = @transform_4, window_bounds = array<i64: 2, 1, 128, 128>}]} {
    %0 = arith.index_cast %arg1 : i32 to index
    %1 = memref.load %arg2[%0] : memref<3xi32, #tpu.memory_space<smem>>
    %2 = arith.index_cast %arg1 : i32 to index
    %3 = memref.load %arg3[%2] : memref<3xi32, #tpu.memory_space<smem>>
    %c0_i32 = arith.constant 0 : i32
    %4 = arith.cmpi eq, %3, %c0_i32 : i32
    %5 = arith.extui %4 : i1 to i32
    %c0_i32_0 = arith.constant 0 : i32
    %6 = arith.cmpi ne, %5, %c0_i32_0 : i32
    scf.if %6 {
      %cst = arith.constant 0xFF800000 : f32
      %13 = vector.broadcast %cst : f32 to vector<256x1xf32>
      %c0 = arith.constant 0 : index
      %c0_3 = arith.constant 0 : index
      %14 = vector.load %arg9[%c0, %c0_3] : memref<256x1xf32, #tpu.memory_space<vmem>>, vector<256x1xf32>
      tpu.vector_store %arg9[%c0, %c0_3], %13 {strides = array<i32>} : memref<256x1xf32, #tpu.memory_space<vmem>>, vector<256x1xf32>,
      %cst_4 = arith.constant 0.000000e+00 : f32
      %15 = vector.broadcast %cst_4 : f32 to vector<256x1xf32>
      %c0_5 = arith.constant 0 : index
      %c0_6 = arith.constant 0 : index
      %16 = vector.load %arg10[%c0_5, %c0_6] : memref<256x1xf32, #tpu.memory_space<vmem>>, vector<256x1xf32>
      tpu.vector_store %arg10[%c0_5, %c0_6], %15 {strides = array<i32>} : memref<256x1xf32, #tpu.memory_space<vmem>>, vector<256x1xf32>,
      %cst_7 = arith.constant 0.000000e+00 : f32
      %17 = vector.broadcast %cst_7 : f32 to vector<256x128xf32>
      %c0_8 = arith.constant 0 : index
      %c0_9 = arith.constant 0 : index
      %18 = vector.load %arg11[%c0_8, %c0_9] : memref<256x128xf32, #tpu.memory_space<vmem>>, vector<256x128xf32>
      tpu.vector_store %arg11[%c0_8, %c0_9], %17 {strides = array<i32>} : memref<256x128xf32, #tpu.memory_space<vmem>>, vector<256x128xf32>,
      %c0_10 = arith.constant 0 : index
      %c0_11 = arith.constant 0 : index
      %19 = vector.load %arg4[%c0_10, %c0_11] : memref<128x256xf32, #tpu.memory_space<vmem>>, vector<128x128xf32>
      %cst_12 = arith.constant 0.0883883461 : f32
      %20 = vector.broadcast %cst_12 : f32 to vector<128x128xf32>
      %21 = arith.mulf %19, %20 : vector<128x128xf32>
      %c0_13 = arith.constant 0 : index
      %c0_14 = arith.constant 0 : index
      %22 = vector.load %arg12[%c0_13, %c0_14] : memref<256x128xf32, #tpu.memory_space<vmem>>, vector<128x128xf32>
      tpu.vector_store %arg12[%c0_13, %c0_14], %21 {strides = array<i32>} : memref<256x128xf32, #tpu.memory_space<vmem>>, vector<128x128xf32>,
      %c0_15 = arith.constant 0 : index
      %c128 = arith.constant 128 : index
      %23 = vector.load %arg4[%c0_15, %c128] : memref<128x256xf32, #tpu.memory_space<vmem>>, vector<128x128xf32>
      %cst_16 = arith.constant 0.0883883461 : f32
      %24 = vector.broadcast %cst_16 : f32 to vector<128x128xf32>
      %25 = arith.mulf %23, %24 : vector<128x128xf32>
      %c128_17 = arith.constant 128 : index
      %c0_18 = arith.constant 0 : index
      %26 = vector.load %arg12[%c128_17, %c0_18] : memref<256x128xf32, #tpu.memory_space<vmem>>, vector<128x128xf32>
      tpu.vector_store %arg12[%c128_17, %c0_18], %25 {strides = array<i32>} : memref<256x128xf32, #tpu.memory_space<vmem>>, vector<128x128xf32>,
    } else {
    }
    %7 = arith.cmpi slt, %3, %1 : i32
    %8 = arith.extui %7 : i1 to i32
    %c0_i32_1 = arith.constant 0 : i32
    %9 = arith.cmpi ne, %8, %c0_i32_1 : i32
    scf.if %9 {
      %c0 = arith.constant 0 : index
      %c0_3 = arith.constant 0 : index
      %13 = vector.load %arg5[%c0, %c0_3] : memref<128x128xf32, #tpu.memory_space<vmem>>, vector<128x128xf32>
      %c0_4 = arith.constant 0 : index
      %c0_5 = arith.constant 0 : index
      %14 = vector.load %arg6[%c0_4, %c0_5] : memref<128x128xf32, #tpu.memory_space<vmem>>, vector<128x128xf32>
      %c0_6 = arith.constant 0 : index
      %c0_7 = arith.constant 0 : index
      %15 = vector.load %arg12[%c0_6, %c0_7] : memref<256x128xf32, #tpu.memory_space<vmem>>, vector<256x128xf32>
      %cst = arith.constant dense<0.000000e+00> : vector<256x128xf32>
      %16 = tpu.matmul %15, %13, %cst {dimension_numbers = #tpu.dot_dimension_numbers<[1], [1], [0], [0], [0, 0, 1, 0], [], []>} : vector<256x128xf32>, vector<128x128xf32>, vector<256x128xf32> -> vector<256x128xf32>
      %c0_8 = arith.constant 0 : index
      %c0_9 = arith.constant 0 : index
      %17 = vector.load %arg9[%c0_8, %c0_9] : memref<256x1xf32, #tpu.memory_space<vmem>>, vector<256x1xf32>
      %cst_10 = arith.constant dense<0xFF800000> : vector<256xf32>
      %18 = vector.multi_reduction <maximumf>, %16, %cst_10 [1] : vector<256x128xf32> to vector<256xf32>
      %19 = vector.shape_cast %18 : vector<256xf32> to vector<256x1xf32>
      %20 = arith.maximumf %17, %19 : vector<256x1xf32>
      %21 = arith.subf %17, %20 : vector<256x1xf32>
      %22 = math.exp %21 : vector<256x1xf32>
      %23 = vector.broadcast %20 : vector<256x1xf32> to vector<256x128xf32>
      %24 = arith.subf %16, %23 : vector<256x128xf32>
      %25 = math.exp %24 : vector<256x128xf32>
      %c0_11 = arith.constant 0 : index
      %c0_12 = arith.constant 0 : index
      %26 = vector.load %arg10[%c0_11, %c0_12] : memref<256x1xf32, #tpu.memory_space<vmem>>, vector<256x1xf32>
      %27 = arith.mulf %22, %26 : vector<256x1xf32>
      %cst_13 = arith.constant dense<0.000000e+00> : vector<256xf32>
      %28 = vector.multi_reduction <add>, %25, %cst_13 [1] : vector<256x128xf32> to vector<256xf32>
      %29 = vector.shape_cast %28 : vector<256xf32> to vector<256x1xf32>
      %30 = arith.addf %27, %29 : vector<256x1xf32>
      %c0_14 = arith.constant 0 : index
      %c0_15 = arith.constant 0 : index
      %31 = vector.load %arg10[%c0_14, %c0_15] : memref<256x1xf32, #tpu.memory_space<vmem>>, vector<256x1xf32>
      tpu.vector_store %arg10[%c0_14, %c0_15], %30 {strides = array<i32>} : memref<256x1xf32, #tpu.memory_space<vmem>>, vector<256x1xf32>,
      %cst_16 = arith.constant dense<0.000000e+00> : vector<256x128xf32>
      %32 = tpu.matmul %25, %14, %cst_16 {dimension_numbers = #tpu.dot_dimension_numbers<[1], [0], [0], [1], [0, 0, 1, 1], [], []>} : vector<256x128xf32>, vector<128x128xf32>, vector<256x128xf32> -> vector<256x128xf32>
      %c0_17 = arith.constant 0 : index
      %c0_18 = arith.constant 0 : index
      %33 = vector.load %arg11[%c0_17, %c0_18] : memref<256x128xf32, #tpu.memory_space<vmem>>, vector<256x128xf32>
      %34 = vector.broadcast %22 : vector<256x1xf32> to vector<256x128xf32>
      %35 = arith.mulf %34, %33 : vector<256x128xf32>
      %36 = arith.addf %35, %32 : vector<256x128xf32>
      %c0_19 = arith.constant 0 : index
      %c0_20 = arith.constant 0 : index
      %37 = vector.load %arg11[%c0_19, %c0_20] : memref<256x128xf32, #tpu.memory_space<vmem>>, vector<256x128xf32>
      tpu.vector_store %arg11[%c0_19, %c0_20], %36 {strides = array<i32>} : memref<256x128xf32, #tpu.memory_space<vmem>>, vector<256x128xf32>,
      %c0_21 = arith.constant 0 : index
      %c0_22 = arith.constant 0 : index
      %38 = vector.load %arg9[%c0_21, %c0_22] : memref<256x1xf32, #tpu.memory_space<vmem>>, vector<256x1xf32>
      tpu.vector_store %arg9[%c0_21, %c0_22], %20 {strides = array<i32>} : memref<256x1xf32, #tpu.memory_space<vmem>>, vector<256x1xf32>,
    } else {
    }
    %10 = arith.cmpi eq, %3, %1 : i32
    %11 = arith.extui %10 : i1 to i32
    %c0_i32_2 = arith.constant 0 : i32
    %12 = arith.cmpi ne, %11, %c0_i32_2 : i32
    scf.if %12 {
      %c0 = arith.constant 0 : index
      %c0_3 = arith.constant 0 : index
      %13 = vector.load %arg5[%c0, %c0_3] : memref<128x128xf32, #tpu.memory_space<vmem>>, vector<128x128xf32>
      %c0_4 = arith.constant 0 : index
      %c0_5 = arith.constant 0 : index
      %14 = vector.load %arg6[%c0_4, %c0_5] : memref<128x128xf32, #tpu.memory_space<vmem>>, vector<128x128xf32>
      %c0_6 = arith.constant 0 : index
      %c0_7 = arith.constant 0 : index
      %15 = vector.load %arg12[%c0_6, %c0_7] : memref<256x128xf32, #tpu.memory_space<vmem>>, vector<256x128xf32>
      %cst = arith.constant dense<0.000000e+00> : vector<256x128xf32>
      %16 = tpu.matmul %15, %13, %cst {dimension_numbers = #tpu.dot_dimension_numbers<[1], [1], [0], [0], [0, 0, 1, 0], [], []>} : vector<256x128xf32>, vector<128x128xf32>, vector<256x128xf32> -> vector<256x128xf32>
      %17 = tpu.iota {dimensions = array<i32: 0>} : vector<256x128xi32>
      %18 = tpu.iota {dimensions = array<i32: 1>} : vector<256x128xi32>
      %c128_i32 = arith.constant 128 : i32
      %c0_i32_8 = arith.constant 0 : i32
      %19 = arith.cmpi eq, %c128_i32, %c0_i32_8 : i32
      %c1_i32 = arith.constant 1 : i32
      %20 = arith.select %19, %c1_i32, %c128_i32 : i32
      %21 = vector.broadcast %20 : i32 to vector<256x128xi32>
      %22 = arith.remsi %17, %21 : vector<256x128xi32>
      %c0_i32_9 = arith.constant 0 : i32
      %23 = vector.broadcast %c0_i32_9 : i32 to vector<256x128xi32>
      %24 = arith.cmpi ne, %22, %23 : vector<256x128xi32>
      %c0_i32_10 = arith.constant 0 : i32
      %25 = vector.broadcast %c0_i32_10 : i32 to vector<256x128xi32>
      %26 = arith.cmpi slt, %22, %25 : vector<256x128xi32>
      %c0_i32_11 = arith.constant 0 : i32
      %27 = arith.cmpi slt, %20, %c0_i32_11 : i32
      %28 = vector.broadcast %27 : i1 to vector<256x128xi1>
      %29 = vector.broadcast %28 : vector<256x128xi1> to vector<256x128xi1>
      %30 = arith.xori %26, %29 : vector<256x128xi1>
      %31 = arith.andi %30, %24 : vector<256x128xi1>
      %32 = vector.broadcast %20 : i32 to vector<256x128xi32>
      %33 = arith.addi %22, %32 : vector<256x128xi32>
      %34 = arith.select %31, %33, %22 : vector<256x128xi1>, vector<256x128xi32>
      %35 = arith.cmpi sle, %18, %34 : vector<256x128xi32>
      %cst_12 = arith.constant -1.000000e+30 : f32
      %36 = vector.broadcast %cst_12 : f32 to vector<256x128xf32>
      %37 = arith.select %35, %16, %36 : vector<256x128xi1>, vector<256x128xf32>
      %c0_13 = arith.constant 0 : index
      %c0_14 = arith.constant 0 : index
      %38 = vector.load %arg9[%c0_13, %c0_14] : memref<256x1xf32, #tpu.memory_space<vmem>>, vector<256x1xf32>
      %cst_15 = arith.constant dense<0xFF800000> : vector<256xf32>
      %39 = vector.multi_reduction <maximumf>, %37, %cst_15 [1] : vector<256x128xf32> to vector<256xf32>
      %40 = vector.shape_cast %39 : vector<256xf32> to vector<256x1xf32>
      %41 = arith.maximumf %38, %40 : vector<256x1xf32>
      %42 = arith.subf %38, %41 : vector<256x1xf32>
      %43 = math.exp %42 : vector<256x1xf32>
      %44 = vector.broadcast %41 : vector<256x1xf32> to vector<256x128xf32>
      %45 = arith.subf %37, %44 : vector<256x128xf32>
      %46 = math.exp %45 : vector<256x128xf32>
      %c0_16 = arith.constant 0 : index
      %c0_17 = arith.constant 0 : index
      %47 = vector.load %arg10[%c0_16, %c0_17] : memref<256x1xf32, #tpu.memory_space<vmem>>, vector<256x1xf32>
      %48 = arith.mulf %43, %47 : vector<256x1xf32>
      %cst_18 = arith.constant dense<0.000000e+00> : vector<256xf32>
      %49 = vector.multi_reduction <add>, %46, %cst_18 [1] : vector<256x128xf32> to vector<256xf32>
      %50 = vector.shape_cast %49 : vector<256xf32> to vector<256x1xf32>
      %51 = arith.addf %48, %50 : vector<256x1xf32>
      %c0_19 = arith.constant 0 : index
      %c0_20 = arith.constant 0 : index
      %52 = vector.load %arg10[%c0_19, %c0_20] : memref<256x1xf32, #tpu.memory_space<vmem>>, vector<256x1xf32>
      tpu.vector_store %arg10[%c0_19, %c0_20], %51 {strides = array<i32>} : memref<256x1xf32, #tpu.memory_space<vmem>>, vector<256x1xf32>,
      %cst_21 = arith.constant dense<0.000000e+00> : vector<256x128xf32>
      %53 = tpu.matmul %46, %14, %cst_21 {dimension_numbers = #tpu.dot_dimension_numbers<[1], [0], [0], [1], [0, 0, 1, 1], [], []>} : vector<256x128xf32>, vector<128x128xf32>, vector<256x128xf32> -> vector<256x128xf32>
      %c0_22 = arith.constant 0 : index
      %c0_23 = arith.constant 0 : index
      %54 = vector.load %arg11[%c0_22, %c0_23] : memref<256x128xf32, #tpu.memory_space<vmem>>, vector<256x128xf32>
      %55 = vector.broadcast %43 : vector<256x1xf32> to vector<256x128xf32>
      %56 = arith.mulf %55, %54 : vector<256x128xf32>
      %57 = arith.addf %56, %53 : vector<256x128xf32>
      %c0_24 = arith.constant 0 : index
      %c0_25 = arith.constant 0 : index
      %58 = vector.load %arg11[%c0_24, %c0_25] : memref<256x128xf32, #tpu.memory_space<vmem>>, vector<256x128xf32>
      tpu.vector_store %arg11[%c0_24, %c0_25], %57 {strides = array<i32>} : memref<256x128xf32, #tpu.memory_space<vmem>>, vector<256x128xf32>,
      %c0_26 = arith.constant 0 : index
      %c0_27 = arith.constant 0 : index
      %59 = vector.load %arg9[%c0_26, %c0_27] : memref<256x1xf32, #tpu.memory_space<vmem>>, vector<256x1xf32>
      tpu.vector_store %arg9[%c0_26, %c0_27], %41 {strides = array<i32>} : memref<256x1xf32, #tpu.memory_space<vmem>>, vector<256x1xf32>,
      %c0_28 = arith.constant 0 : index
      %c0_29 = arith.constant 0 : index
      %60 = vector.load %arg10[%c0_28, %c0_29] : memref<256x1xf32, #tpu.memory_space<vmem>>, vector<256x1xf32>
      %cst_30 = arith.constant 1.000000e+00 : f32
      %61 = vector.broadcast %cst_30 : f32 to vector<256x1xf32>
      %62 = arith.divf %61, %60 : vector<256x1xf32>
      %c0_31 = arith.constant 0 : index
      %c0_32 = arith.constant 0 : index
      %63 = vector.load %arg11[%c0_31, %c0_32] : memref<256x128xf32, #tpu.memory_space<vmem>>, vector<256x128xf32>
      %64 = vector.broadcast %62 : vector<256x1xf32> to vector<256x128xf32>
      %65 = arith.mulf %63, %64 : vector<256x128xf32>
      %66 = vector.extract_strided_slice %65 {offsets = [0, 0], sizes = [128, 128], strides = [1, 1]} : vector<256x128xf32> to vector<128x128xf32>
      %c0_33 = arith.constant 0 : index
      %c0_34 = arith.constant 0 : index
      %67 = vector.load %arg7[%c0_33, %c0_34] : memref<128x256xf32, #tpu.memory_space<vmem>>, vector<128x128xf32>
      tpu.vector_store %arg7[%c0_33, %c0_34], %66 {strides = array<i32>} : memref<128x256xf32, #tpu.memory_space<vmem>>, vector<128x128xf32>,
      %68 = vector.extract_strided_slice %65 {offsets = [128, 0], sizes = [128, 128], strides = [1, 1]} : vector<256x128xf32> to vector<128x128xf32>
      %c0_35 = arith.constant 0 : index
      %c128 = arith.constant 128 : index
      %69 = vector.load %arg7[%c0_35, %c128] : memref<128x256xf32, #tpu.memory_space<vmem>>, vector<128x128xf32>
      tpu.vector_store %arg7[%c0_35, %c128], %68 {strides = array<i32>} : memref<128x256xf32, #tpu.memory_space<vmem>>, vector<128x128xf32>,
      %c0_36 = arith.constant 0 : index
      %c0_37 = arith.constant 0 : index
      %70 = vector.load %arg5[%c0_36, %c0_37] : memref<128x128xf32, #tpu.memory_space<vmem>>, vector<128x128xf32>
      %c0_38 = arith.constant 0 : index
      %c0_39 = arith.constant 0 : index
      %c0_40 = arith.constant 0 : index
      %c0_41 = arith.constant 0 : index
      %71 = vector.load %arg8[%c0_38, %c0_39, %c0_40, %c0_41] : memref<2x1x128x128xf32, #tpu.memory_space<vmem>>, vector<1x1x128x128xf32>
      %72 = vector.shape_cast %71 : vector<1x1x128x128xf32> to vector<128x128xf32>
      %73 = vector.shape_cast %70 : vector<128x128xf32> to vector<1x1x128x128xf32>
      tpu.vector_store %arg8[%c0_38, %c0_39, %c0_40, %c0_41], %73 {strides = array<i32>} : memref<2x1x128x128xf32, #tpu.memory_space<vmem>>, vector<1x1x128x128xf32>,
      %c0_42 = arith.constant 0 : index
      %c0_43 = arith.constant 0 : index
      %74 = vector.load %arg6[%c0_42, %c0_43] : memref<128x128xf32, #tpu.memory_space<vmem>>, vector<128x128xf32>
      %c1 = arith.constant 1 : index
      %c0_44 = arith.constant 0 : index
      %c0_45 = arith.constant 0 : index
      %c0_46 = arith.constant 0 : index
      %75 = vector.load %arg8[%c1, %c0_44, %c0_45, %c0_46] : memref<2x1x128x128xf32, #tpu.memory_space<vmem>>, vector<1x1x128x128xf32>
      %76 = vector.shape_cast %75 : vector<1x1x128x128xf32> to vector<128x128xf32>
      %77 = vector.shape_cast %74 : vector<128x128xf32> to vector<1x1x128x128xf32>
      tpu.vector_store %arg8[%c1, %c0_44, %c0_45, %c0_46], %77 {strides = array<i32>} : memref<2x1x128x128xf32, #tpu.memory_space<vmem>>, vector<1x1x128x128xf32>,
    } else {
    }
    return
  }
  func.func @transform_0(%arg0: i32, %arg1: i32, %arg2: memref<3xi32, #tpu.memory_space<smem>>, %arg3: memref<3xi32, #tpu.memory_space<smem>>) -> (i32, i32) {
    %0 = arith.index_cast %arg1 : i32 to index
    %1 = memref.load %arg2[%0] : memref<3xi32, #tpu.memory_space<smem>>
    %c0_i32 = arith.constant 0 : i32
    return %1, %arg0 : i32, i32
  }
  func.func @transform_1(%arg0: i32, %arg1: i32, %arg2: memref<3xi32, #tpu.memory_space<smem>>, %arg3: memref<3xi32, #tpu.memory_space<smem>>) -> (i32, i32) {
    %0 = arith.index_cast %arg1 : i32 to index
    %1 = memref.load %arg3[%0] : memref<3xi32, #tpu.memory_space<smem>>
    %c0_i32 = arith.constant 0 : i32
    return %1, %arg0 : i32, i32
  }
  func.func @transform_2(%arg0: i32, %arg1: i32, %arg2: memref<3xi32, #tpu.memory_space<smem>>, %arg3: memref<3xi32, #tpu.memory_space<smem>>) -> (i32, i32) {
    %0 = arith.index_cast %arg1 : i32 to index
    %1 = memref.load %arg3[%0] : memref<3xi32, #tpu.memory_space<smem>>
    %c0_i32 = arith.constant 0 : i32
    return %1, %arg0 : i32, i32
  }
  func.func @transform_3(%arg0: i32, %arg1: i32, %arg2: memref<3xi32, #tpu.memory_space<smem>>, %arg3: memref<3xi32, #tpu.memory_space<smem>>) -> (i32, i32) {
    %0 = arith.index_cast %arg1 : i32 to index
    %1 = memref.load %arg2[%0] : memref<3xi32, #tpu.memory_space<smem>>
    %c0_i32 = arith.constant 0 : i32
    return %1, %arg0 : i32, i32
  }
  func.func @transform_4(%arg0: i32, %arg1: i32, %arg2: memref<3xi32, #tpu.memory_space<smem>>, %arg3: memref<3xi32, #tpu.memory_space<smem>>) -> (i32, i32, i32, i32) {
    %0 = arith.index_cast %arg1 : i32 to index
    %1 = memref.load %arg2[%0] : memref<3xi32, #tpu.memory_space<smem>>
    %c0_i32 = arith.constant 0 : i32
    %c0_i32_0 = arith.constant 0 : i32
    %c0_i32_1 = arith.constant 0 : i32
    return %c0_i32, %arg0, %1, %c0_i32_0 : i32, i32, i32, i32
  }
}

</mosaic_0001>

<bundles_post_ra>
// kernel: tpu_custom_call.1
= control target key start
LH: loop header
LB: loop body
LE: loop exit
PB: predicated region body
PF: predicated region fallthrough
CT: control target
= control target key end

     0   :  { %s5776_s27 = smov [#allocation7]   ;;  %s5777_s28 = smov [#allocation8]   ;;  %s9210_s0 = inlined_call_operand.hbm [shape: s32[3], index: 0, kind: input, shape index: {}]   ;;  %s9211_s2 = inlined_call_operand.hbm [shape: f32[256,512], index: 2, kind: input, shape index: {}]   ;;  %s9212_s3 = inlined_call_operand.hbm [shape: f32[256,256], index: 3, kind: input, shape index: {}]   ;;  %s9213_s4 = inlined_call_operand.hbm [shape: f32[256,256], index: 4, kind: input, shape index: {}]   ;;  %s9214_s5 = inlined_call_operand.hbm [shape: f32[256,512], index: 5, kind: output, shape index: {0}]   ;;  %s9215_s6 = inlined_call_operand.hbm [shape: f32[2,2,256,128], index: 6, kind: output, shape index: {1}]   ;;  %s9216_s1 = inlined_call_operand.hbm [shape: s32[3], index: 1, kind: input, shape index: {}]  }
   0x1   :  { %9322 = sst [smem:[#allocation134_spill]] %s9211_s2  ;;  %s13_s23 = sshll.u32 %s9210_s0, 4  ;;  %s14_s23 = int_to_ptr.hbm [resolvable:$true] %s13_s23 }
   0x2   :  { %9323 = sst [smem:[#allocation135_spill]] %s9212_s3  ;;  %s18_s26 = sshll.u32 %s9216_s1, 4  ;;  %s19_s26 = int_to_ptr.hbm [resolvable:$true] %s18_s26 }
   0x3   :  { %9324 = sst [smem:[#allocation136_spill]] %s9213_s4 }
   0x4   :  { %9325 = sst [smem:[#allocation137_spill]] %s9214_s5 }
   0x5   :  { %9326 = sst [smem:[#allocation138_spill]] %s9215_s6 }
   0x6   :  { %16 = dma.hbm_to_smem %s14_s23, 16, %s5776_s27, [#allocation6] }
   0x7   :  { %21 = dma.hbm_to_smem %s19_s26, 16, %s5777_s28, [#allocation6] }
   0x8   :  { %5674 = dma.done.wait [#allocation6], 32 }
   0x9   :  { %5675 = vsyncadd [#allocation6], 4294967264 }
   0xa   :  { %24 = sfence }
   0xb   :  { %25 = vsyncpa [#allocation10], 0 }
   0xc   :  { %27 = vsyncpa [#allocation10 + $0x1], 0 }
   0xd   :  { %28 = vsyncpa [#allocation13], 0 }
   0xe   :  { %30 = vsyncpa [#allocation13 + $0x1], 0 }
   0xf   :  { %31 = vsyncpa [#allocation11], 0 }
  0x10   :  { %33 = vsyncpa [#allocation11 + $0x1], 0 }
  0x11   :  { %34 = vsyncpa [#allocation17], 0 }
  0x12   :  { %36 = vsyncpa [#allocation17 + $0x1], 0  ;;  %s5838_s0 = smov 0   ;;  %s5840_s1 = smov 0  }
  0x13   :  { %s5842_s29 = smov 0   ;;  %s5844_s30 = smov 0  }
  0x14   :  { %s5846_s7 = smov 0   ;;  %s5848_s8 = smov 0  }
  0x15   :  { %s5850_s9 = smov 0   ;;  %s5852_s10 = smov 0  }
  0x16   :  { %s5854_s11 = smov 0   ;;  %s5856_s12 = smov 0  }
  0x17   :  { %s5858_s13 = smov 0   ;;  %s5860_s14 = smov 0  }
  0x18   :  { %s5862_s15 = smov 0   ;;  %s5864_s16 = smov 0  }
  0x19   :  { %s5866_s17 = smov 0   ;;  %s5868_s18 = smov 0  }
  0x1a   :  { %s5870_s19 = smov 0   ;;  %s5872_s20 = smov 0  }
  0x1b   :  { %s5874_s21 = smov 0   ;;  %s5876_s22 = smov 0  }
  0x1c LB: > { %9327 = sst [smem:[#allocation34_spill]] %s5698_s0  ;;  %s5937_s23 = sadd.s32 4294967295, %s5774_s22   ;;  %s5774_s22 = sphi %s5876_s22, %s42_s22   ;;  %s5770_s21 = sphi %s5874_s21, %s9667_s21   ;;  %s5766_s20 = sphi %s5872_s20, %s9658_s20   ;;  %s5762_s19 = sphi %s5870_s19, %s9666_s19   ;;  %s5758_s18 = sphi %s5868_s18, %s9657_s18   ;;  %s5754_s17 = sphi %s5866_s17, %s9665_s17   ;;  %s5750_s16 = sphi %s5864_s16, %s9664_s16   ;;  %s5746_s15 = sphi %s5862_s15, %s9663_s15   ;;  %s5742_s14 = sphi %s5860_s14, %s9655_s14   ;;  %s5738_s13 = sphi %s5858_s13, %s9654_s13   ;;  %s5734_s12 = sphi %s5856_s12, %s9653_s12   ;;  %s5730_s11 = sphi %s5854_s11, %s9662_s11   ;;  %s5726_s10 = sphi %s5852_s10, %s9661_s10   ;;  %s5722_s9 = sphi %s5850_s9, %s9660_s9   ;;  %s5718_s8 = sphi %s5848_s8, %s9652_s8   ;;  %s5714_s7 = sphi %s5846_s7, %s9651_s7   ;;  %s5710_s30 = sphi %s5844_s30, %s9650_s30   ;;  %s5706_s29 = sphi %s5842_s29, %s9649_s29   ;;  %s5702_s1 = sphi %s5840_s1, %s9648_s1   ;;  %s5698_s0 = sphi %s5838_s0, %s9647_s0  }
  0x1d   : > { %9328 = sst [smem:[#allocation35_spill]] %s5702_s1  ;;  %s4710_s24 = sadd.s32 4294967294, %s5774_s22  }
  0x1e   : > { %9329 = sst [smem:[#allocation36_spill]] %s5706_s29  ;;  %s51_s25 = sadd.s32 1, %s5766_s20 }
  0x1f   : > { %9330 = sst [smem:[#allocation37_spill]] %s5710_s30  ;;  %s54_s26 = sadd.s32 1, %s5770_s21 }
  0x20   : > { %9331 = sst [smem:[#allocation38_spill]] %s5714_s7  ;;  %p52_p0 = scmp.ge.s32.totalorder %s51_s25, 3 }
  0x21   : > { %9332 = sst [smem:[#allocation39_spill]] %s5718_s8  ;;  %p9237_p1 = scmp.eq.s32.totalorder %s5774_s22, 0 }
  0x22   : > { %9333 = sst [smem:[#allocation40_spill]] %s5722_s9  ;;  %p9236_p2 = scmp.eq.s32.totalorder %s5937_s23, 0 }
  0x23   : > { %9334 = sst [smem:[#allocation41_spill]] %s5738_s13  ;;  %s9669_s25 = smov (%p52_p0, %s51_s25), 0 }
  0x24   : > { %9335 = sst [smem:[#allocation42_spill]] %s5742_s14  ;;  %s9671_s26 = smov (!%p52_p0, %s54_s26), %s5770_s21 }
  0x25   : > { %9336 = sst [smem:[#allocation43_spill]] %s5758_s18  ;;  %s95_s6 = sadd.s32 1, %s5742_s14 }
  0x26   : > { %9337 = sst [smem:[#allocation44_spill]] %s5762_s19  ;;  %p56_p3 = scmp.ge.s32.totalorder %s9671_s26, 2 }
  0x27   : > { %9338 = sst [smem:[#allocation45_spill]] %s5766_s20  ;;  %p102_p4 = scmp.ne.s32.totalorder %s5742_s14, %s5738_s13 }
  0x28   : > { %s88_s27 = sld [smem:[#allocation8 + %s5766_s20]]  ;;  %p108_p5 = scmp.ne.s32.totalorder %s5738_s13, %s5734_s12 }
  0x29   : > { %9339 = sst [smem:[#allocation46_spill]] %s9669_s25  ;;  %s9673_s26 = smov (%p56_p3, %s9671_s26), 0 }
  0x2a   : > { %s89_s28 = sld [smem:[#allocation8 + %s9669_s25]]  ;;  %p5958_p6 = por %p102_p4, %p9237_p1 }
  0x2b   : > { %s148_s5 = sld [smem:[#allocation7 + %s5766_s20]]  ;;  %p5964_p7 = por %p108_p5, %p9236_p2 }
  0x2c   : > { %9340 = sst [smem:[#allocation47_spill]] %s9673_s26  ;;  %s5970_s4 = ssub.s32 %s5770_s21, %s9673_s26 }
  0x2d   : > { %s149_s12 = sld [smem:[#allocation7 + %s9669_s25]]  ;;  %s155_s2 = sadd.s32 1, %s5718_s8 }
  0x2e   : > { %p165_p8 = scmp.ne.s32.totalorder %s5718_s8, %s5714_s7  ;;  %p166_p10 = scmp.eq.s32.totalorder %s5937_s23, 5 }
  0x2f   : > { %p171_p11 = scmp.ne.s32.totalorder %s5714_s7, %s5710_s30  ;;  %p5980_p12 = scmp.eq.s32.totalorder %s4710_s24, 5 }
  0x30   : > { %s90_s13 = ssub.s32 %s88_s27, %s89_s28  ;;  %p5989_p13 = por %p166_p10, %p165_p8 }
  0x31   : > { %s92_s9 = sor.u32 %s90_s13, %s5970_s4  ;;  %p5996_p0 = por %p5980_p12, %p171_p11 }
  0x32   : > { %p93_p9 = scmp.eq.s32.totalorder %s92_s9, 0  ;;  %s178_s30 = sld [smem:[#allocation7 + %s5766_s20]] }
  0x33   : > { %s150_s13 = ssub.s32 %s148_s5, %s149_s12  ;;  %s185_s5 = sadd.s32 1, %s5706_s29 }
  0x34   : > { %s5985_s27 = scalar_select %p93_p9, %s5742_s14, %s95_s6  }
  0x35   : > { %s9345_s28 = scalar_select %p5989_p13, 1, 0 }
  0x36   : > { %9344 = sst [smem:[#allocation48_spill]] %s5985_s27  ;;  %s152_s9 = sor.u32 %s150_s13, %s5970_s4 }
  0x37   : > { %9346 = sst [smem:[#allocation49_spill]] %s9345_s28  ;;  %p153_p3 = scmp.eq.s32.totalorder %s152_s9, 0 }
  0x38   : > { %s9347_s24 = scalar_select %p5996_p0, 1, 0 }
  0x39   : > { %s179_s6 = sld [smem:[#allocation7 + %s9669_s25]]  ;;  %p195_p4 = scmp.ne.s32.totalorder %s5706_s29, %s5702_s1 }
  0x3a   : > { %9348 = sst [smem:[#allocation50_spill]] %s9347_s24  ;;  %p201_p5 = scmp.ne.s32.totalorder %s5702_s1, %s5698_s0 }
  0x3b   : > { %s6004_s12 = scalar_select %p153_p3, %s5718_s8, %s155_s2  }
  0x3c   : > { %p9235_p8 = scmp.lt.s32.totalorder %s5774_s22, 6  ;;  %p6013_p9 = por %p195_p4, %p166_p10 }
  0x3d   : > { %9349 = sst [smem:[#allocation51_spill]] %s6004_s12  ;;  %p6019_p11 = por %p201_p5, %p5980_p12 }
  0x3e   : > { %s9350_s13 = scalar_select %p6013_p9, 1, 0 }
  0x3f   : > { %s9352_s9 = scalar_select %p6019_p11, 1, 0 }
  0x40   : > { %9351 = sst [smem:[#allocation52_spill]] %s9350_s13  ;;  %s248_s27 = sand.u32 1, %s5774_s22  }
  0x41   : > { %9353 = sst [smem:[#allocation53_spill]] %s9352_s9  ;;  %s181_s24 = ssub.s32 %s178_s30, %s179_s6 }
  0x42   : > { %s182_s2 = sor.u32 %s181_s24, %s5970_s4  ;;  %s250_s12 = sand.u32 1, %s5742_s14  }
  0x43   : > { %p183_p3 = scmp.eq.s32.totalorder %s182_s2, 0  ;;  %s4718_s8 = sshll.u32 %s250_s12, 7 }
  0x44   : > { %p6030_p10 = pnand %p9235_p8, %p5958_p6  ;;  %s252_s30 = scalar_lea.vmem [#allocation12], %s4718_s8 }
  0x45   : > { %s6035_s26 = scalar_select %p183_p3, %s5706_s29, %s185_s5  }
  0x46   : > { %s4897_s13 = scalar_select %p5958_p6, [#allocation8], [#allocation21] }
  0x47   : > { %9355 = sst [smem:[#allocation54_spill]] %s6035_s26  ;;  %s6046_s24 = sshll.u32 %s252_s30, 4 }
  0x48   : > { %s4898_s9 = scalar_select %p5958_p6, %s5766_s20, 0 }
  0x49   : > { %s9675_s13 = smov (!%p9235_p8, %s4897_s13), [#allocation26]  ;;  %9356 = sst [smem:[#allocation55_spill]] %s6046_s24 }
  0x4a   : > { %s9677_s9 = smov (!%p9235_p8, %s4898_s9), 0  ;;  %p4726_p12 = scmp.ge.s32.totalorder %s5774_s22, 1 }
  0x4b   : > { %s253_s6 = sld [smem:[%s9675_s13 + %s9677_s9]]  ;;  %p296_p4 = scmp.lt.s32.totalorder %s5774_s22, 7 }
  0x4c   : > { %s9359_s3 = sld [smem:[#allocation135_spill]]  ;;  %s6062_s13 = scalar_lea.sflag [#allocation13], %s248_s27 }
  0x4d   : > { %p6051_p5 = pnand %p4726_p12, %p296_p4  ;;  %s6060_s30 = sld [smem:[#allocation7 + %s5766_s20]] }
  0x4e   : > { %p5480_p3 = pneg %p6030_p10 }
  0x4f   : > { %s9357_s5 = scalar_select %p6051_p5, 1, 0 }
  0x51   : > { %9358 = sst [smem:[#allocation56_spill]] %s9357_s5  ;;  %s4763_s19 = sshll.u32 %s253_s6, 5 }
  0x52   : > { %s258_s12 = sadd.s32 %s5770_s21, %s4763_s19 }
  0x53   : > { %s4721_s2 = sshll.u32 %s258_s12, 3  ;;  %s5483_s12 = scalar_lea.hbm %s9359_s3, 512 }
  0x54   : > { %s260_s29 = scalar_lea.hbm %s9359_s3, %s4721_s2 }
  0x55   : > { %s261_s8 = sshll.u32 %s260_s29, 4  ;;  %s262_s8 = int_to_ptr.hbm [resolvable:$true] %s261_s8 }
  0x56   : > { %s5476_s9 = sshra.s32 %s262_s8, 4  ;;  %s5477_s9 = int_to_ptr.hbm [resolvable:$true] %s5476_s9 }
  0x57   : > { %s5478_s24 = scalar_lea.hbm %s5477_s9, 128  ;;  %p5484_p8 = scmp.lt.s32.totalorder %s5477_s9, %s9359_s3 }
  0x58   : > { %p5479_p6 = scmp.ne.s32.totalorder %s5477_s9, %s5478_s24  ;;  %p5485_p2 = scmp.lt.s32.totalorder %s5483_s12, %s5478_s24 }
  0x5a   : > { %p5481_p12 = pnand %p5480_p3, %p5479_p6  ;;  %p5486_p1 = por %p5485_p2, %p5484_p8 }
  0x5c   : > { %p5482_p4 = pneg %p5481_p12 }
  0x5e   : > { %p5487_p11 = pnand %p5486_p1, %p5482_p4 }
  0x60   : > { %5490 = shalt.err (!%p5487_p11)
}
  0x61   : > { %s9240_s29 = smov 256   ;;  %s9360_s27 = sld [smem:[#allocation55_spill]] }
  0x62   : > { %s9238_s24 = smov 128   ;;  %s9239_s2 = smov 8  }
  0x63   : > { %s59_s6 = sld [smem:[#allocation7 + %s9669_s25]]  ;;  %p72_p1 = scmp.ne.s32.totalorder %s5754_s17, %s5750_s16 }
  0x64   : > { %p78_p2 = scmp.ne.s32.totalorder %s5750_s16, %s5746_s15  ;;  %s9242_s19 = sand.u32 1, %s5754_s17  }
  0x65   : > { %p9362_p8 = scmp.eq.s32.totalorder %s5774_s22, 0  ;;  %p9364_p6 = scmp.eq.s32.totalorder %s5937_s23, 0 }
  0x66   : > { %s4713_s15 = sshll.u32 %s9242_s19, 8 }
  0x67   : > { %s9361_s9 = int_to_ptr.vmem [resolvable:$true] %s9360_s27  ;;  %p6088_p11 = por %p9362_p8, %p72_p1 }
  0x68   : > { %4930 = dma.hbm_to_vmem [thread:$0]  (!%p6030_p10), %s262_s8, 2048, %s9361_s9, %s6062_s13, %s9240_s29, %s9238_s24, %s9239_s2  }
  0x69   : > { %p6094_p3 = por %p9364_p6, %p78_p2  ;;  %s65_s8 = sadd.s32 1, %s5754_s17 }
  0x6a   : > { %p9366_p10 = scmp.lt.s32.totalorder %s5774_s22, 6  ;;  %s60_s26 = ssub.s32 %s6060_s30, %s59_s6 }
  0x6b   : > { %s9368_s27 = sld [smem:[#allocation40_spill]]  ;;  %s4715_s9 = sshll.u32 %s5770_s21, 1 }
  0x6c   : > { %p6105_p12 = pnand %p9366_p10, %p6088_p11  ;;  %s62_s24 = sor.u32 %s5970_s4, %s60_s26 }
  0x6d   : > { %s226_s2 = scalar_lea.vmem [#allocation9], %s4713_s15  ;;  %p63_p4 = scmp.eq.s32.totalorder %s62_s24, 0 }
  0x6e   : > { %s6112_s29 = sshll.u32 %s226_s2, 4  ;;  %p9371_p1 = pmov %p9366_p10 }
  0x6f   : > { %9369 = sst [smem:[#allocation55_spill]] %s6112_s29  ;;  %p132_p8 = scmp.ne.s32.totalorder %s5730_s11, %s5726_s10 }
  0x70   : > { %s4894_s19 = scalar_select %p6088_p11, [#allocation7], [#allocation20] }
  0x71   : > { %s6117_s3 = scalar_select %p63_p4, %s5754_s17, %s65_s8  }
  0x72   : > { %s4895_s28 = scalar_select %p6088_p11, %s5766_s20, 0 }
  0x73   : > { %9370 = sst [smem:[#allocation57_spill]] %s6117_s3  ;;  %s9679_s19 = smov (!%p9371_p1, %s4894_s19), [#allocation25] }
  0x74   : > { %p9372_p2 = pmov %p9371_p1  ;;  %s118_s2 = sld [smem:[#allocation8 + %s5766_s20]] }
  0x75   : > { %s119_s6 = sld [smem:[#allocation8 + %s9669_s25]]  ;;  %p138_p6 = scmp.ne.s32.totalorder %s5726_s10, %s9368_s27 }
  0x76   : > { %s9681_s28 = smov (!%p9372_p2, %s4895_s28), 0  ;;  %p9373_p10 = scmp.eq.s32.totalorder %s5937_s23, 0 }
  0x77   : > { %s227_s30 = sld [smem:[%s9679_s19 + %s9681_s28]]  ;;  %p9377_p11 = scmp.eq.s32.totalorder %s5774_s22, 0 }
  0x78   : > { %p6136_p4 = por %p138_p6, %p9373_p10  ;;  %s9375_s29 = sld [smem:[#allocation134_spill]] }
  0x79   : > { %p6145_p1 = por %p132_p8, %p9377_p11  ;;  %p5510_p6 = pneg %p6105_p12 }
  0x7b   : > { %s120_s27 = ssub.s32 %s118_s2, %s119_s6 }
  0x7d   : > { %s4762_s24 = sshll.u32 %s227_s30, 6  ;;  %s9379_s30 = sand.u32 1, %s5754_s17  }
  0x7e   : > { %s233_s15 = sadd.s32 %s4762_s24, %s4715_s9  ;;  %s9376_s5 = smov %s9375_s29 }
  0x7f   : > { %s4717_s26 = sshll.u32 %s233_s15, 3  ;;  %s122_s9 = sor.u32 %s120_s27, %s5970_s4 }
  0x80   : > { %s235_s7 = scalar_lea.hbm %s9375_s29, %s4717_s26  ;;  %s223_s24 = scalar_lea.sflag [#allocation10], %s9379_s30 }
  0x81   : > { %s236_s19 = sshll.u32 %s235_s7, 4  ;;  %s5513_s29 = scalar_lea.hbm %s9376_s5, 1024  ;;  %s237_s19 = int_to_ptr.hbm [resolvable:$true] %s236_s19 }
  0x82   : > { %s5506_s15 = sshra.s32 %s237_s19, 4  ;;  %s5507_s15 = int_to_ptr.hbm [resolvable:$true] %s5506_s15 }
  0x83   : > { %s5508_s8 = scalar_lea.hbm %s5507_s15, 256  ;;  %p5514_p8 = scmp.lt.s32.totalorder %s5507_s15, %s9376_s5 }
  0x84   : > { %p5509_p2 = scmp.ne.s32.totalorder %s5507_s15, %s5508_s8  ;;  %p5515_p11 = scmp.lt.s32.totalorder %s5513_s29, %s5508_s8 }
  0x86   : > { %p5511_p10 = pnand %p5510_p6, %p5509_p2  ;;  %p5516_p9 = por %p5515_p11, %p5514_p8 }
  0x88   : > { %p5512_p0 = pneg %p5511_p10 }
  0x8a   : > { %p5517_p13 = pnand %p5516_p9, %p5512_p0 }
  0x8c   : > { %5520 = shalt.err (!%p5517_p13)
}
  0x8d   : > { %s5781_s4 = smov 512   ;;  %s9380_s7 = sld [smem:[#allocation55_spill]] }
  0x8e   : > { %s5782_s25 = smov 16   ;;  %s9381_s2 = smov 256  }
  0x8f   : > { %p123_p13 = scmp.eq.s32.totalorder %s122_s9, 0  ;;  %s275_s8 = sand.u32 1, %s5730_s11  }
  0x90   : > { %s4900_s27 = scalar_select %p6145_p1, [#allocation8], [#allocation22] }
  0x91   : > { %s9383_s30 = sadd.s32 1, %s5730_s11  ;;  %p9384_p0 = scmp.lt.s32.totalorder %s5774_s22, 6 }
  0x92   : > { %s6171_s15 = scalar_select %p123_p13, %s5730_s11, %s9383_s30  }
  0x93   : > { %s9382_s6 = int_to_ptr.vmem [resolvable:$true] %s9380_s7  ;;  %s9683_s27 = smov (!%p9384_p0, %s4900_s27), [#allocation27] }
  0x94   : > { %4925 = dma.hbm_to_vmem [thread:$0]  (!%p6105_p12), %s237_s19, 4096, %s9382_s6, %s223_s24, %s5781_s4, %s9381_s2, %s5782_s25  }
  0x95   : > { %s4901_s3 = scalar_select %p6145_p1, %s5766_s20, 0 }
  0x96   : > { %p9385_p9 = pmov %p9384_p0  ;;  %p9386_p2 = pmov %p9384_p0 }
  0x97   : > { %s4722_s19 = sshll.u32 %s275_s8, 7  ;;  %s9388_s6 = sld [smem:[#allocation136_spill]] }
  0x98   : > { %s9685_s3 = smov (!%p9385_p9, %s4901_s3), 0  ;;  %p6184_p6 = pnand %p9386_p2, %p6145_p1 }
  0x99   : > { %s278_s9 = sld [smem:[%s9683_s27 + %s9685_s3]]  ;;  %s277_s1 = scalar_lea.vmem [#allocation14], %s4722_s19 }
  0x9a   : > { %s288_s29 = sshll.u32 %s277_s1, 4  ;;  %p5540_p1 = pneg %p6184_p6  ;;  %s289_s29 = int_to_ptr.vmem [resolvable:$true] %s288_s29 }
  0x9d   : > { %s5543_s3 = scalar_lea.hbm %s9388_s6, 512 }
  0x9f   : > { %s4764_s24 = sshll.u32 %s278_s9, 5 }
  0xa0   : > { %s283_s26 = sadd.s32 %s5770_s21, %s4764_s24 }
  0xa1   : > { %s4725_s4 = sshll.u32 %s283_s26, 3 }
  0xa2   : > { %s285_s30 = scalar_lea.hbm %s9388_s6, %s4725_s4 }
  0xa3   : > { %s286_s5 = sshll.u32 %s285_s30, 4  ;;  %s287_s5 = int_to_ptr.hbm [resolvable:$true] %s286_s5 }
  0xa4   : > { %s5536_s28 = sshra.s32 %s287_s5, 4  ;;  %s5537_s28 = int_to_ptr.hbm [resolvable:$true] %s5536_s28 }
  0xa5   : > { %s5538_s20 = scalar_lea.hbm %s5537_s28, 128  ;;  %p5544_p11 = scmp.lt.s32.totalorder %s5537_s28, %s9388_s6 }
  0xa6   : > { %p5539_p12 = scmp.ne.s32.totalorder %s5537_s28, %s5538_s20  ;;  %p5545_p13 = scmp.lt.s32.totalorder %s5543_s3, %s5538_s20 }
  0xa8   : > { %p5541_p10 = pnand %p5540_p1, %p5539_p12  ;;  %p5546_p0 = por %p5545_p13, %p5544_p11 }
  0xaa   : > { %p5542_p8 = pneg %p5541_p10 }
  0xac   : > { %p5547_p9 = pnand %p5546_p0, %p5542_p8 }
  0xae   : > { %5550 = shalt.err (!%p5547_p9)
}
  0xaf   : > { %s9389_s24 = smov 8   ;;  %s9390_s1 = smov 128  }
  0xb0   : > { %4935 = dma.hbm_to_vmem [thread:$0]  (!%p6184_p6), %s287_s5, 2048, %s289_s29, %s6062_s13, %s9381_s2, %s9390_s1, %s9389_s24  }
  0xb1   : > { %300 = sbr.rel (%p6051_p5) target bundleno = 2060 (0x80c), region = 32  ;;  %s302_s4 = sand.u32 (!%p6051_p5), 1, %s5750_s16  }
  0xb2   : > { %s4727_s7 = sshll.u32 (!%p6051_p5), %s302_s4, 8  ;;  %s303_s25 = scalar_lea.sflag (!%p6051_p5), [#allocation10], %s302_s4 }
  0xb3   : > { %s6209_s30 = scalar_lea.vmem (!%p6051_p5), [#allocation9], %s4727_s7 }
  0xb6   : > { %5677 = dma.done.wait (%p6094_p3), %s303_s25, 4096  }
  0xb7   : > { %5679 = vsyncadd (%p6094_p3), %s303_s25, 4294963200  ;;  %s9392_s20 = sld [smem:[#allocation41_spill]]  ;;  %s312_s14 = sand.u32 1, %s5937_s23  }
  0xb8   : > { %s313_s2 = scalar_lea.sflag [#allocation13], %s312_s14 }
  0xbd   : > { %s314_s5 = sand.u32 1, %s9392_s20  }
  0xbe   : > { %s4728_s13 = sshll.u32 %s314_s5, 7 }
  0xbf   : > { %s6217_s29 = scalar_lea.vmem [#allocation12], %s4728_s13 }
  0xc0   : > { %5681 = dma.done.wait (%p5964_p7), %s313_s2, 2048  }
  0xc1   : > { %5683 = vsyncadd (%p5964_p7), %s313_s2, 4294965248  ;;  %s324_s28 = sand.u32 1, %s5726_s10  }
  0xc2   : > { %s4729_s8 = sshll.u32 %s324_s28, 7 }
  0xc3   : > { %s6224_s0 = scalar_lea.vmem [#allocation14], %s4729_s8 }
  0xc4   : > { %5685 = dma.done.wait (%p6136_p4), %s313_s2, 2048  }
  0xc5   : > { %5687 = vsyncadd (%p6136_p4), %s313_s2, 4294965248  ;;  %s9393_s23 = sld [smem:[#allocation38_spill]] }
  0xc6   : > { %s9394_s27 = sld [smem:[#allocation35_spill]] }
  0xc7   : > { %s9395_s3 = sld [smem:[#allocation43_spill]] }
  0xcb   : > { %s357_s19 = sand.u32 1, %s9393_s23  }
  0xcc   : > { %s9321_s18 = sand.u32 1, %s9394_s27   ;;  %s4730_s24 = sshll.u32 %s357_s19, 8 }
  0xcd   : > { %s6233_s9 = sld [smem:[#allocation7 + %s9395_s3]]  ;;  %s4731_s26 = sshll.u32 %s9321_s18, 8 }
  0xce   : > { %s6238_s1 = sld [smem:[#allocation8 + %s9395_s3]]  ;;  %s6242_s4 = scalar_lea.vmem [#allocation15], %s4730_s24 }
  0xcf   : > { %s6244_s12 = scalar_lea.vmem [#allocation16], %s4731_s26 }
  0xd4   : > { %p4732_p7 = scmp.ne.s32.totalorder %s6238_s1, 0 }
  0xd6   : > { %384 = sbr.rel (%p4732_p7) target bundleno = 348 (0x15c), region = 48 }
  0xdb   : > { %vm385_vm0 = vcmask 7168   ;;  %v5783_v0 = vmov -inf   ;;  %v5784_v1 = vmov 0.0   ;;  %v482_v2 = vld [vmem:[%s6209_s30] sm:$0xff]  ;;  %v483_v3 = vld [vmem:[%s6209_s30 + $0x10] sm:$0xff]  ;;  %v530_v32 = vld [vmem:[%s6209_s30 + $0x8] sm:$0xff] }
  0xdc   : > { %386 = vst.msk [vmem:[#allocation2] sm:$0xff] %vm385_vm0, %v5783_v0  ;;  %v484_v4 = vld [vmem:[%s6209_s30 + $0x20] sm:$0xff]  ;;  %v498_v5 = vmul.f32 0.088388346, %v482_v2  ;;  %v485_v6 = vld [vmem:[%s6209_s30 + $0x30] sm:$0xff]  ;;  %v531_v34 = vld [vmem:[%s6209_s30 + $0x18] sm:$0xff] }
  0xdd   : > { %387 = vst.msk [vmem:[#allocation2 + $0x8] sm:$0xff] %vm385_vm0, %v5783_v0  ;;  %v499_v7 = vmul.f32 0.088388346, %v483_v3  ;;  %v486_v8 = vld [vmem:[%s6209_s30 + $0x40] sm:$0xff]  ;;  %v500_v9 = vmul.f32 0.088388346, %v484_v4 }
  0xde   : > { %388 = vst.msk [vmem:[#allocation2 + $0x10] sm:$0xff] %vm385_vm0, %v5783_v0  ;;  %v487_v10 = vld [vmem:[%s6209_s30 + $0x50] sm:$0xff]  ;;  %v501_v11 = vmul.f32 0.088388346, %v485_v6  ;;  %v488_v12 = vld [vmem:[%s6209_s30 + $0x60] sm:$0xff]  ;;  %v532_v36 = vld [vmem:[%s6209_s30 + $0x28] sm:$0xff] }
  0xdf   : > { %389 = vst.msk [vmem:[#allocation2 + $0x18] sm:$0xff] %vm385_vm0, %v5783_v0  ;;  %v502_v13 = vmul.f32 0.088388346, %v486_v8  ;;  %v489_v14 = vld [vmem:[%s6209_s30 + $0x70] sm:$0xff]  ;;  %v503_v15 = vmul.f32 0.088388346, %v487_v10 }
  0xe0   : > { %390 = vst.msk [vmem:[#allocation2 + $0x20] sm:$0xff] %vm385_vm0, %v5783_v0  ;;  %v490_v16 = vld [vmem:[%s6209_s30 + $0x80] sm:$0xff]  ;;  %v504_v17 = vmul.f32 0.088388346, %v488_v12  ;;  %v491_v18 = vld [vmem:[%s6209_s30 + $0x90] sm:$0xff]  ;;  %v533_v38 = vld [vmem:[%s6209_s30 + $0x38] sm:$0xff] }
  0xe1   : > { %391 = vst.msk [vmem:[#allocation2 + $0x28] sm:$0xff] %vm385_vm0, %v5783_v0  ;;  %v505_v19 = vmul.f32 0.088388346, %v489_v14  ;;  %v492_v20 = vld [vmem:[%s6209_s30 + $0xa0] sm:$0xff]  ;;  %v506_v21 = vmul.f32 0.088388346, %v490_v16 }
  0xe2   : > { %392 = vst.msk [vmem:[#allocation2 + $0x30] sm:$0xff] %vm385_vm0, %v5783_v0  ;;  %v493_v22 = vld [vmem:[%s6209_s30 + $0xb0] sm:$0xff]  ;;  %v507_v23 = vmul.f32 0.088388346, %v491_v18  ;;  %v494_v24 = vld [vmem:[%s6209_s30 + $0xc0] sm:$0xff]  ;;  %v534_v40 = vld [vmem:[%s6209_s30 + $0x48] sm:$0xff] }
  0xe3   : > { %393 = vst.msk [vmem:[#allocation2 + $0x38] sm:$0xff] %vm385_vm0, %v5783_v0  ;;  %v508_v25 = vmul.f32 0.088388346, %v492_v20  ;;  %v495_v26 = vld [vmem:[%s6209_s30 + $0xd0] sm:$0xff]  ;;  %v509_v27 = vmul.f32 0.088388346, %v493_v22 }
  0xe4   : > { %394 = vst.msk [vmem:[#allocation2 + $0x40] sm:$0xff] %vm385_vm0, %v5783_v0  ;;  %v496_v28 = vld [vmem:[%s6209_s30 + $0xe0] sm:$0xff]  ;;  %v510_v29 = vmul.f32 0.088388346, %v494_v24  ;;  %v497_v30 = vld [vmem:[%s6209_s30 + $0xf0] sm:$0xff]  ;;  %v535_v42 = vld [vmem:[%s6209_s30 + $0x58] sm:$0xff] }
  0xe5   : > { %395 = vst.msk [vmem:[#allocation2 + $0x48] sm:$0xff] %vm385_vm0, %v5783_v0  ;;  %v511_v31 = vmul.f32 0.088388346, %v495_v26  ;;  %v512_v33 = vmul.f32 0.088388346, %v496_v28  ;;  %v536_v44 = vld [vmem:[%s6209_s30 + $0x68] sm:$0xff] }
  0xe6   : > { %396 = vst.msk [vmem:[#allocation2 + $0x50] sm:$0xff] %vm385_vm0, %v5783_v0  ;;  %v513_v35 = vmul.f32 0.088388346, %v497_v30  ;;  %v546_v37 = vmul.f32 0.088388346, %v530_v32  ;;  %v537_v46 = vld [vmem:[%s6209_s30 + $0x78] sm:$0xff] }
  0xe7   : > { %397 = vst.msk [vmem:[#allocation2 + $0x58] sm:$0xff] %vm385_vm0, %v5783_v0  ;;  %v547_v39 = vmul.f32 0.088388346, %v531_v34  ;;  %v548_v41 = vmul.f32 0.088388346, %v532_v36  ;;  %v538_v48 = vld [vmem:[%s6209_s30 + $0x88] sm:$0xff] }
  0xe8   : > { %398 = vst.msk [vmem:[#allocation2 + $0x60] sm:$0xff] %vm385_vm0, %v5783_v0  ;;  %v549_v43 = vmul.f32 0.088388346, %v533_v38  ;;  %v550_v45 = vmul.f32 0.088388346, %v534_v40  ;;  %v539_v50 = vld [vmem:[%s6209_s30 + $0x98] sm:$0xff] }
  0xe9   : > { %399 = vst.msk [vmem:[#allocation2 + $0x68] sm:$0xff] %vm385_vm0, %v5783_v0  ;;  %v551_v47 = vmul.f32 0.088388346, %v535_v42  ;;  %v552_v49 = vmul.f32 0.088388346, %v536_v44  ;;  %v540_v52 = vld [vmem:[%s6209_s30 + $0xa8] sm:$0xff] }
  0xea   : > { %400 = vst.msk [vmem:[#allocation2 + $0x70] sm:$0xff] %vm385_vm0, %v5783_v0  ;;  %v553_v51 = vmul.f32 0.088388346, %v537_v46  ;;  %v554_v53 = vmul.f32 0.088388346, %v538_v48  ;;  %v541_v54 = vld [vmem:[%s6209_s30 + $0xb8] sm:$0xff] }
  0xeb   : > { %401 = vst.msk [vmem:[#allocation2 + $0x78] sm:$0xff] %vm385_vm0, %v5783_v0  ;;  %v555_v55 = vmul.f32 0.088388346, %v539_v50  ;;  %v542_v56 = vld [vmem:[%s6209_s30 + $0xc8] sm:$0xff]  ;;  %v556_v57 = vmul.f32 0.088388346, %v540_v52 }
  0xec   : > { %402 = vst.msk [vmem:[#allocation2 + $0x80] sm:$0xff] %vm385_vm0, %v5783_v0  ;;  %v543_v58 = vld [vmem:[%s6209_s30 + $0xd8] sm:$0xff]  ;;  %v557_v59 = vmul.f32 0.088388346, %v541_v54  ;;  %v544_v60 = vld [vmem:[%s6209_s30 + $0xe8] sm:$0xff] }
  0xed   : > { %403 = vst.msk [vmem:[#allocation2 + $0x88] sm:$0xff] %vm385_vm0, %v5783_v0  ;;  %v558_v61 = vmul.f32 0.088388346, %v542_v56  ;;  %v545_v62 = vld [vmem:[%s6209_s30 + $0xf8] sm:$0xff]  ;;  %v559_v63 = vmul.f32 0.088388346, %v543_v58 }
  0xee   : > { %404 = vst.msk [vmem:[#allocation2 + $0x90] sm:$0xff] %vm385_vm0, %v5783_v0 }
  0xef   : > { %405 = vst.msk [vmem:[#allocation2 + $0x98] sm:$0xff] %vm385_vm0, %v5783_v0 }
  0xf0   : > { %406 = vst.msk [vmem:[#allocation2 + $0xa0] sm:$0xff] %vm385_vm0, %v5783_v0 }
  0xf1   : > { %407 = vst.msk [vmem:[#allocation2 + $0xa8] sm:$0xff] %vm385_vm0, %v5783_v0 }
  0xf2   : > { %408 = vst.msk [vmem:[#allocation2 + $0xb0] sm:$0xff] %vm385_vm0, %v5783_v0 }
  0xf3   : > { %409 = vst.msk [vmem:[#allocation2 + $0xb8] sm:$0xff] %vm385_vm0, %v5783_v0 }
  0xf4   : > { %410 = vst.msk [vmem:[#allocation2 + $0xc0] sm:$0xff] %vm385_vm0, %v5783_v0 }
  0xf5   : > { %411 = vst.msk [vmem:[#allocation2 + $0xc8] sm:$0xff] %vm385_vm0, %v5783_v0 }
  0xf6   : > { %412 = vst.msk [vmem:[#allocation2 + $0xd0] sm:$0xff] %vm385_vm0, %v5783_v0 }
  0xf7   : > { %413 = vst.msk [vmem:[#allocation2 + $0xd8] sm:$0xff] %vm385_vm0, %v5783_v0 }
  0xf8   : > { %414 = vst.msk [vmem:[#allocation2 + $0xe0] sm:$0xff] %vm385_vm0, %v5783_v0 }
  0xf9   : > { %415 = vst.msk [vmem:[#allocation2 + $0xe8] sm:$0xff] %vm385_vm0, %v5783_v0 }
  0xfa   : > { %416 = vst.msk [vmem:[#allocation2 + $0xf0] sm:$0xff] %vm385_vm0, %v5783_v0 }
  0xfb   : > { %417 = vst.msk [vmem:[#allocation2 + $0xf8] sm:$0xff] %vm385_vm0, %v5783_v0  ;;  %v560_v0 = vmul.f32 0.088388346, %v544_v60 }
  0xfc   : > { %418 = vst.msk [vmem:[#allocation3] sm:$0xff] %vm385_vm0, %v5784_v1 }
  0xfd   : > { %419 = vst.msk [vmem:[#allocation3 + $0x8] sm:$0xff] %vm385_vm0, %v5784_v1 }
  0xfe   : > { %420 = vst.msk [vmem:[#allocation3 + $0x10] sm:$0xff] %vm385_vm0, %v5784_v1 }
  0xff   : > { %421 = vst.msk [vmem:[#allocation3 + $0x18] sm:$0xff] %vm385_vm0, %v5784_v1 }
 0x100   : > { %422 = vst.msk [vmem:[#allocation3 + $0x20] sm:$0xff] %vm385_vm0, %v5784_v1 }
 0x101   : > { %423 = vst.msk [vmem:[#allocation3 + $0x28] sm:$0xff] %vm385_vm0, %v5784_v1 }
 0x102   : > { %424 = vst.msk [vmem:[#allocation3 + $0x30] sm:$0xff] %vm385_vm0, %v5784_v1 }
 0x103   : > { %425 = vst.msk [vmem:[#allocation3 + $0x38] sm:$0xff] %vm385_vm0, %v5784_v1 }
 0x104   : > { %426 = vst.msk [vmem:[#allocation3 + $0x40] sm:$0xff] %vm385_vm0, %v5784_v1 }
 0x105   : > { %427 = vst.msk [vmem:[#allocation3 + $0x48] sm:$0xff] %vm385_vm0, %v5784_v1 }
 0x106   : > { %428 = vst.msk [vmem:[#allocation3 + $0x50] sm:$0xff] %vm385_vm0, %v5784_v1 }
 0x107   : > { %429 = vst.msk [vmem:[#allocation3 + $0x58] sm:$0xff] %vm385_vm0, %v5784_v1 }
 0x108   : > { %430 = vst.msk [vmem:[#allocation3 + $0x60] sm:$0xff] %vm385_vm0, %v5784_v1 }
 0x109   : > { %431 = vst.msk [vmem:[#allocation3 + $0x68] sm:$0xff] %vm385_vm0, %v5784_v1 }
 0x10a   : > { %432 = vst.msk [vmem:[#allocation3 + $0x70] sm:$0xff] %vm385_vm0, %v5784_v1 }
 0x10b   : > { %433 = vst.msk [vmem:[#allocation3 + $0x78] sm:$0xff] %vm385_vm0, %v5784_v1 }
 0x10c   : > { %434 = vst.msk [vmem:[#allocation3 + $0x80] sm:$0xff] %vm385_vm0, %v5784_v1 }
 0x10d   : > { %435 = vst.msk [vmem:[#allocation3 + $0x88] sm:$0xff] %vm385_vm0, %v5784_v1 }
 0x10e   : > { %436 = vst.msk [vmem:[#allocation3 + $0x90] sm:$0xff] %vm385_vm0, %v5784_v1 }
 0x10f   : > { %437 = vst.msk [vmem:[#allocation3 + $0x98] sm:$0xff] %vm385_vm0, %v5784_v1 }
 0x110   : > { %438 = vst.msk [vmem:[#allocation3 + $0xa0] sm:$0xff] %vm385_vm0, %v5784_v1 }
 0x111   : > { %439 = vst.msk [vmem:[#allocation3 + $0xa8] sm:$0xff] %vm385_vm0, %v5784_v1 }
 0x112   : > { %440 = vst.msk [vmem:[#allocation3 + $0xb0] sm:$0xff] %vm385_vm0, %v5784_v1 }
 0x113   : > { %441 = vst.msk [vmem:[#allocation3 + $0xb8] sm:$0xff] %vm385_vm0, %v5784_v1 }
 0x114   : > { %442 = vst.msk [vmem:[#allocation3 + $0xc0] sm:$0xff] %vm385_vm0, %v5784_v1 }
 0x115   : > { %443 = vst.msk [vmem:[#allocation3 + $0xc8] sm:$0xff] %vm385_vm0, %v5784_v1 }
 0x116   : > { %444 = vst.msk [vmem:[#allocation3 + $0xd0] sm:$0xff] %vm385_vm0, %v5784_v1 }
 0x117   : > { %445 = vst.msk [vmem:[#allocation3 + $0xd8] sm:$0xff] %vm385_vm0, %v5784_v1 }
 0x118   : > { %446 = vst.msk [vmem:[#allocation3 + $0xe0] sm:$0xff] %vm385_vm0, %v5784_v1 }
 0x119   : > { %447 = vst.msk [vmem:[#allocation3 + $0xe8] sm:$0xff] %vm385_vm0, %v5784_v1 }
 0x11a   : > { %448 = vst.msk [vmem:[#allocation3 + $0xf0] sm:$0xff] %vm385_vm0, %v5784_v1 }
 0x11b   : > { %449 = vst.msk [vmem:[#allocation3 + $0xf8] sm:$0xff] %vm385_vm0, %v5784_v1 }
 0x11c   : > { %450 = vst [vmem:[#allocation4 + $0xb0] sm:$0xff] %v5784_v1 }
 0x11d   : > { %451 = vst [vmem:[#allocation4] sm:$0xff] %v5784_v1 }
 0x11e   : > { %452 = vst [vmem:[#allocation4 + $0xd8] sm:$0xff] %v5784_v1 }
 0x11f   : > { %453 = vst [vmem:[#allocation4 + $0x18] sm:$0xff] %v5784_v1 }
 0x120   : > { %454 = vst [vmem:[#allocation4 + $0x50] sm:$0xff] %v5784_v1 }
 0x121   : > { %455 = vst [vmem:[#allocation4 + $0x68] sm:$0xff] %v5784_v1 }
 0x122   : > { %456 = vst [vmem:[#allocation4 + $0x30] sm:$0xff] %v5784_v1 }
 0x123   : > { %457 = vst [vmem:[#allocation4 + $0x48] sm:$0xff] %v5784_v1 }
 0x124   : > { %458 = vst [vmem:[#allocation4 + $0x80] sm:$0xff] %v5784_v1 }
 0x125   : > { %459 = vst [vmem:[#allocation4 + $0x88] sm:$0xff] %v5784_v1 }
 0x126   : > { %460 = vst [vmem:[#allocation4 + $0xe8] sm:$0xff] %v5784_v1 }
 0x127   : > { %461 = vst [vmem:[#allocation4 + $0xb8] sm:$0xff] %v5784_v1 }
 0x128   : > { %462 = vst [vmem:[#allocation4 + $0x60] sm:$0xff] %v5784_v1 }
 0x129   : > { %463 = vst [vmem:[#allocation4 + $0xf0] sm:$0xff] %v5784_v1 }
 0x12a   : > { %464 = vst [vmem:[#allocation4 + $0x8] sm:$0xff] %v5784_v1 }
 0x12b   : > { %465 = vst [vmem:[#allocation4 + $0x78] sm:$0xff] %v5784_v1 }
 0x12c   : > { %466 = vst [vmem:[#allocation4 + $0x38] sm:$0xff] %v5784_v1 }
 0x12d   : > { %467 = vst [vmem:[#allocation4 + $0x58] sm:$0xff] %v5784_v1 }
 0x12e   : > { %468 = vst [vmem:[#allocation4 + $0x40] sm:$0xff] %v5784_v1 }
 0x12f   : > { %469 = vst [vmem:[#allocation4 + $0xc8] sm:$0xff] %v5784_v1 }
 0x130   : > { %470 = vst [vmem:[#allocation4 + $0xe0] sm:$0xff] %v5784_v1 }
 0x131   : > { %471 = vst [vmem:[#allocation4 + $0x90] sm:$0xff] %v5784_v1 }
 0x132   : > { %472 = vst [vmem:[#allocation4 + $0x70] sm:$0xff] %v5784_v1 }
 0x133   : > { %473 = vst [vmem:[#allocation4 + $0xc0] sm:$0xff] %v5784_v1 }
 0x134   : > { %474 = vst [vmem:[#allocation4 + $0xa8] sm:$0xff] %v5784_v1 }
 0x135   : > { %475 = vst [vmem:[#allocation4 + $0xd0] sm:$0xff] %v5784_v1 }
 0x136   : > { %476 = vst [vmem:[#allocation4 + $0x10] sm:$0xff] %v5784_v1 }
 0x137   : > { %477 = vst [vmem:[#allocation4 + $0x28] sm:$0xff] %v5784_v1 }
 0x138   : > { %478 = vst [vmem:[#allocation4 + $0xa0] sm:$0xff] %v5784_v1 }
 0x139   : > { %479 = vst [vmem:[#allocation4 + $0xf8] sm:$0xff] %v5784_v1 }
 0x13a   : > { %480 = vst [vmem:[#allocation4 + $0x20] sm:$0xff] %v5784_v1 }
 0x13b   : > { %481 = vst [vmem:[#allocation4 + $0x98] sm:$0xff] %v5784_v1  ;;  %v561_v1 = vmul.f32 0.088388346, %v545_v62 }
 0x13c   : > { %514 = vst [vmem:[#allocation5 + $0x80] sm:$0xff] %v498_v5 }
 0x13d   : > { %515 = vst [vmem:[#allocation5 + $0xc8] sm:$0xff] %v499_v7 }
 0x13e   : > { %516 = vst [vmem:[#allocation5 + $0xe8] sm:$0xff] %v500_v9 }
 0x13f   : > { %517 = vst [vmem:[#allocation5 + $0x78] sm:$0xff] %v501_v11 }
 0x140   : > { %518 = vst [vmem:[#allocation5 + $0x8] sm:$0xff] %v502_v13 }
 0x141   : > { %519 = vst [vmem:[#allocation5 + $0x90] sm:$0xff] %v503_v15 }
 0x142   : > { %520 = vst [vmem:[#allocation5 + $0x58] sm:$0xff] %v504_v17 }
 0x143   : > { %521 = vst [vmem:[#allocation5 + $0xa8] sm:$0xff] %v505_v19 }
 0x144   : > { %522 = vst [vmem:[#allocation5 + $0xd0] sm:$0xff] %v506_v21 }
 0x145   : > { %523 = vst [vmem:[#allocation5 + $0xb0] sm:$0xff] %v507_v23 }
 0x146   : > { %524 = vst [vmem:[#allocation5 + $0x38] sm:$0xff] %v508_v25 }
 0x147   : > { %525 = vst [vmem:[#allocation5 + $0x40] sm:$0xff] %v509_v27 }
 0x148   : > { %526 = vst [vmem:[#allocation5 + $0xe0] sm:$0xff] %v510_v29 }
 0x149   : > { %527 = vst [vmem:[#allocation5 + $0x60] sm:$0xff] %v511_v31 }
 0x14a   : > { %528 = vst [vmem:[#allocation5 + $0x18] sm:$0xff] %v512_v33 }
 0x14b   : > { %529 = vst [vmem:[#allocation5 + $0x68] sm:$0xff] %v513_v35 }
 0x14c   : > { %562 = vst [vmem:[#allocation5 + $0x10] sm:$0xff] %v546_v37 }
 0x14d   : > { %563 = vst [vmem:[#allocation5 + $0x70] sm:$0xff] %v547_v39 }
 0x14e   : > { %564 = vst [vmem:[#allocation5 + $0x50] sm:$0xff] %v548_v41 }
 0x14f   : > { %565 = vst [vmem:[#allocation5 + $0xa0] sm:$0xff] %v549_v43 }
 0x150   : > { %566 = vst [vmem:[#allocation5 + $0xd8] sm:$0xff] %v550_v45 }
 0x151   : > { %567 = vst [vmem:[#allocation5 + $0x30] sm:$0xff] %v551_v47 }
 0x152   : > { %568 = vst [vmem:[#allocation5 + $0x20] sm:$0xff] %v552_v49 }
 0x153   : > { %569 = vst [vmem:[#allocation5 + $0xf0] sm:$0xff] %v553_v51 }
 0x154   : > { %570 = vst [vmem:[#allocation5 + $0x88] sm:$0xff] %v554_v53 }
 0x155   : > { %571 = vst [vmem:[#allocation5 + $0x48] sm:$0xff] %v555_v55 }
 0x156   : > { %572 = vst [vmem:[#allocation5 + $0xf8] sm:$0xff] %v556_v57 }
 0x157   : > { %573 = vst [vmem:[#allocation5 + $0xc0] sm:$0xff] %v557_v59 }
 0x158   : > { %574 = vst [vmem:[#allocation5 + $0xb8] sm:$0xff] %v558_v61 }
 0x159   : > { %575 = vst [vmem:[#allocation5] sm:$0xff] %v559_v63 }
 0x15a   : > { %576 = vst [vmem:[#allocation5 + $0x28] sm:$0xff] %v560_v0 }
 0x15b   : > { %577 = vst [vmem:[#allocation5 + $0x98] sm:$0xff] %v561_v1 }
 0x15c PF: > { %p4733_p5 = scmp.ge.s32.totalorder %s6238_s1, %s6233_s9 }
 0x15e   : > { %581 = sbr.rel (%p4733_p5) target bundleno = 1096 (0x448), region = 52 }
 0x163   : > { %v597_v2 = vld [vmem:[%s6217_s29 + $0x78] sm:$0xff]  ;;  %v596_v3 = vld [vmem:[%s6217_s29 + $0x70] sm:$0xff]  ;;  %v595_v4 = vld [vmem:[%s6217_s29 + $0x68] sm:$0xff]  ;;  %vm1399_vm1 = vcmask 7168  }
 0x164   : > { %4766 = vmatpush.xpose.msra.mxu2 %v597_v2  ;;  %646 = vmatpush.xpose.msra.mxu0 %v597_v2  ;;  %v594_v5 = vld [vmem:[%s6217_s29 + $0x60] sm:$0xff]  ;;  %v593_v6 = vld [vmem:[%s6217_s29 + $0x58] sm:$0xff]  ;;  %v592_v7 = vld [vmem:[%s6217_s29 + $0x50] sm:$0xff] }
 0x165   : > { %4767 = vmatpush.xpose.msra.mxu3 %v597_v2  ;;  %v591_v8 = vld [vmem:[%s6217_s29 + $0x48] sm:$0xff]  ;;  %v590_v9 = vld [vmem:[%s6217_s29 + $0x40] sm:$0xff]  ;;  %v589_v10 = vld [vmem:[%s6217_s29 + $0x38] sm:$0xff] }
 0x166   : > { %v588_v11 = vld [vmem:[%s6217_s29 + $0x30] sm:$0xff]  ;;  %v587_v12 = vld [vmem:[%s6217_s29 + $0x28] sm:$0xff]  ;;  %v586_v13 = vld [vmem:[%s6217_s29 + $0x20] sm:$0xff] }
 0x167   : > { %v585_v14 = vld [vmem:[%s6217_s29 + $0x18] sm:$0xff]  ;;  %v584_v15 = vld [vmem:[%s6217_s29 + $0x10] sm:$0xff]  ;;  %v583_v16 = vld [vmem:[%s6217_s29 + $0x8] sm:$0xff] }
 0x168   : > { %4768 = vmatpush.xpose.msra.mxu2 %v596_v3  ;;  %647 = vmatpush.xpose.msra.mxu0 %v596_v3  ;;  %v582_v17 = vld [vmem:[%s6217_s29] sm:$0xff]  ;;  %v642_v20 = vld [vmem:[#allocation5 + $0xb8] sm:$0xff]  ;;  %v615_v22 = vld [vmem:[#allocation5 + $0xc8] sm:$0xff] }
 0x169   : > { %4769 = vmatpush.xpose.msra.mxu3 %v596_v3  ;;  %v627_v18 = vld [vmem:[#allocation5 + $0x60] sm:$0xff]  ;;  %v628_v21 = vld [vmem:[#allocation5 + $0x18] sm:$0xff]  ;;  %v629_v24 = vld [vmem:[#allocation5 + $0x68] sm:$0xff] }
 0x16a   : > { %v614_v19 = vld [vmem:[#allocation5 + $0x80] sm:$0xff]  ;;  %v616_v25 = vld [vmem:[#allocation5 + $0xe8] sm:$0xff]  ;;  %v630_v27 = vld [vmem:[#allocation5 + $0x10] sm:$0xff] }
 0x16b   : > { %v643_v23 = vld [vmem:[#allocation5] sm:$0xff]  ;;  %v644_v26 = vld [vmem:[#allocation5 + $0x28] sm:$0xff]  ;;  %v617_v28 = vld [vmem:[#allocation5 + $0x78] sm:$0xff] }
 0x16c   : > { %4770 = vmatpush.xpose.msra.mxu2 %v595_v4  ;;  %648 = vmatpush.xpose.msra.mxu0 %v595_v4  ;;  %v645_v29 = vld [vmem:[#allocation5 + $0x98] sm:$0xff]  ;;  %v631_v30 = vld [vmem:[#allocation5 + $0x70] sm:$0xff]  ;;  %v618_v31 = vld [vmem:[#allocation5 + $0x8] sm:$0xff] }
 0x16d   : > { %4771 = vmatpush.xpose.msra.mxu3 %v595_v4  ;;  %v632_v32 = vld [vmem:[#allocation5 + $0x50] sm:$0xff]  ;;  %v633_v34 = vld [vmem:[#allocation5 + $0xa0] sm:$0xff]  ;;  %v620_v35 = vld [vmem:[#allocation5 + $0x58] sm:$0xff] }
 0x16e   : > { %v619_v33 = vld [vmem:[#allocation5 + $0x90] sm:$0xff]  ;;  %v634_v36 = vld [vmem:[#allocation5 + $0xd8] sm:$0xff]  ;;  %v621_v37 = vld [vmem:[#allocation5 + $0xa8] sm:$0xff] }
 0x16f   : > { %v635_v38 = vld [vmem:[#allocation5 + $0x30] sm:$0xff]  ;;  %v636_v40 = vld [vmem:[#allocation5 + $0x20] sm:$0xff]  ;;  %v624_v43 = vld [vmem:[#allocation5 + $0x38] sm:$0xff] }
 0x170   : > { %4772 = vmatpush.xpose.msra.mxu2 %v594_v5  ;;  %649 = vmatpush.xpose.msra.mxu0 %v594_v5  ;;  %v622_v39 = vld [vmem:[#allocation5 + $0xd0] sm:$0xff]  ;;  %v638_v44 = vld [vmem:[#allocation5 + $0x88] sm:$0xff]  ;;  %v625_v45 = vld [vmem:[#allocation5 + $0x40] sm:$0xff] }
 0x171   : > { %4773 = vmatpush.xpose.msra.mxu3 %v594_v5  ;;  %v623_v41 = vld [vmem:[#allocation5 + $0xb0] sm:$0xff]  ;;  %v639_v46 = vld [vmem:[#allocation5 + $0x48] sm:$0xff]  ;;  %v626_v47 = vld [vmem:[#allocation5 + $0xe0] sm:$0xff] }
 0x172   : > { %v637_v42 = vld [vmem:[#allocation5 + $0xf0] sm:$0xff]  ;;  %v640_v48 = vld [vmem:[#allocation5 + $0xf8] sm:$0xff]  ;;  %v641_v49 = vld [vmem:[#allocation5 + $0xc0] sm:$0xff] }
 0x174   : > { %4774 = vmatpush.xpose.msra.mxu2 %v593_v6  ;;  %650 = vmatpush.xpose.msra.mxu0 %v593_v6 }
 0x175   : > { %4775 = vmatpush.xpose.msra.mxu3 %v593_v6 }
 0x178   : > { %4776 = vmatpush.xpose.msra.mxu2 %v592_v7  ;;  %651 = vmatpush.xpose.msra.mxu0 %v592_v7 }
 0x179   : > { %4777 = vmatpush.xpose.msra.mxu3 %v592_v7 }
 0x17c   : > { %4778 = vmatpush.xpose.msra.mxu2 %v591_v8  ;;  %652 = vmatpush.xpose.msra.mxu0 %v591_v8 }
 0x17d   : > { %4779 = vmatpush.xpose.msra.mxu3 %v591_v8 }
 0x180   : > { %4780 = vmatpush.xpose.msra.mxu2 %v590_v9  ;;  %653 = vmatpush.xpose.msra.mxu0 %v590_v9 }
 0x181   : > { %4781 = vmatpush.xpose.msra.mxu3 %v590_v9 }
 0x184   : > { %4782 = vmatpush.xpose.msra.mxu2 %v589_v10  ;;  %654 = vmatpush.xpose.msra.mxu0 %v589_v10 }
 0x185   : > { %4783 = vmatpush.xpose.msra.mxu3 %v589_v10 }
 0x188   : > { %4784 = vmatpush.xpose.msra.mxu2 %v588_v11  ;;  %655 = vmatpush.xpose.msra.mxu0 %v588_v11 }
 0x189   : > { %4785 = vmatpush.xpose.msra.mxu3 %v588_v11 }
 0x18c   : > { %4786 = vmatpush.xpose.msra.mxu2 %v587_v12  ;;  %656 = vmatpush.xpose.msra.mxu0 %v587_v12 }
 0x18d   : > { %4787 = vmatpush.xpose.msra.mxu3 %v587_v12 }
 0x190   : > { %4788 = vmatpush.xpose.msra.mxu2 %v586_v13  ;;  %657 = vmatpush.xpose.msra.mxu0 %v586_v13 }
 0x191   : > { %4789 = vmatpush.xpose.msra.mxu3 %v586_v13 }
 0x194   : > { %4790 = vmatpush.xpose.msra.mxu2 %v585_v14  ;;  %658 = vmatpush.xpose.msra.mxu0 %v585_v14 }
 0x195   : > { %4791 = vmatpush.xpose.msra.mxu3 %v585_v14  ;;  %v5785_v14 = vmov 0  }
 0x196   : > { %5127 = vset.pattern.permute.xlu1 %v5785_v14  ;;  %5126 = vset.pattern.permute.xlu2 %v5785_v14 }
 0x197   : > { %5128 = vset.pattern.permute.xlu0 %v5785_v14  ;;  %v6590_v14 = vld [vmem:[#allocation2 + $0xf0] sm:$0xff] }
 0x198   : > { %4792 = vmatpush.xpose.msra.mxu2 %v584_v15  ;;  %659 = vmatpush.xpose.msra.mxu0 %v584_v15  ;;  %9413 = vst [vmem:[#allocation75_spill] sm:$0xff] %v6590_v14 }
 0x199   : > { %4793 = vmatpush.xpose.msra.mxu3 %v584_v15 }
 0x19c   : > { %4794 = vmatpush.xpose.msra.mxu2 %v583_v16  ;;  %660 = vmatpush.xpose.msra.mxu0 %v583_v16 }
 0x19d   : > { %4795 = vmatpush.xpose.msra.mxu3 %v583_v16 }
 0x1a0   : > { %4796 = vmatpush.xpose.msra.mxu2 %v582_v17  ;;  %661 = vmatpush.xpose.msra.mxu0 %v582_v17 }
 0x1a1   : > { %4797 = vmatpush.xpose.msra.mxu3 %v582_v17 }
 0x1a3   : > { %701 = vmatmul.f32.vlgmr.msra.gmra.mxu2 %v627_v18  ;;  %662 = vmatmul.f32.vlgmr.msra.gmra.mxu0 %v614_v19  ;;  %v6518_v18 = vld [vmem:[#allocation2] sm:$0xff] }
 0x1a4   : > { %746 = vmatmul.f32.vlgmr.msra.gmra.mxu3 %v642_v20 }
 0x1ab   : > { %704 = vmatmul.f32.gmra.mxu2 %v628_v21  ;;  %665 = vmatmul.f32.gmra.mxu0 %v615_v22 }
 0x1ac   : > { %749 = vmatmul.f32.gmra.mxu3 %v643_v23  ;;  %v6530_v23 = vld [vmem:[#allocation2 + $0x68] sm:$0xff] }
 0x1b3   : > { %707 = vmatmul.f32.gmra.mxu2 %v629_v24  ;;  %668 = vmatmul.f32.gmra.mxu0 %v616_v25  ;;  %v6532_v25 = vld [vmem:[#allocation2 + $0x8] sm:$0xff] }
 0x1b4   : > { %752 = vmatmul.f32.gmra.mxu3 %v644_v26 }
 0x1bb   : > { %710 = vmatmul.f32.gmra.mxu2 %v630_v27  ;;  %671 = vmatmul.f32.gmra.mxu0 %v617_v28 }
 0x1bc   : > { %755 = vmatmul.f32.gmra.mxu3 %v645_v29 }
 0x1c3   : > { %713 = vmatmul.f32.gmra.mxu2 %v631_v30  ;;  %674 = vmatmul.f32.gmra.mxu0 %v618_v31  ;;  %v6547_v30 = vld [vmem:[#allocation2 + $0xe0] sm:$0xff]  ;;  %v6549_v31 = vld [vmem:[#allocation2 + $0x70] sm:$0xff] }
 0x1cb   : > { %716 = vmatmul.f32.gmra.mxu2 %v632_v32  ;;  %677 = vmatmul.f32.gmra.mxu0 %v619_v33 }
 0x1d3   : > { %719 = vmatmul.f32.gmra.mxu2 %v633_v34  ;;  %680 = vmatmul.f32.gmra.mxu0 %v620_v35 }
 0x1db   : > { %722 = vmatmul.f32.gmra.mxu2 %v634_v36  ;;  %683 = vmatmul.f32.gmra.mxu0 %v621_v37 }
 0x1e3   : > { %725 = vmatmul.f32.gmra.mxu2 %v635_v38  ;;  %686 = vmatmul.f32.gmra.mxu0 %v622_v39  ;;  %v761_v38 = vld [vmem:[#allocation2 + $0x10] sm:$0xff]  ;;  %v6567_v39 = vld [vmem:[#allocation2 + $0x78] sm:$0xff] }
 0x1eb   : > { %728 = vmatmul.f32.gmra.mxu2 %v636_v40  ;;  %689 = vmatmul.f32.gmra.mxu0 %v623_v41  ;;  %v6569_v40 = vld [vmem:[#allocation2 + $0xe8] sm:$0xff] }
 0x1ec   : > { %9411 = vst [vmem:[#allocation73_spill] sm:$0xff] %v6569_v40 }
 0x1f3   : > { %731 = vmatmul.f32.gmra.mxu2 %v637_v42  ;;  %692 = vmatmul.f32.gmra.mxu0 %v624_v43 }
 0x1fb   : > { %734 = vmatmul.f32.gmra.mxu2 %v638_v44  ;;  %695 = vmatmul.f32.gmra.mxu0 %v625_v45 }
 0x203   : > { %737 = vmatmul.f32.gmra.mxu2 %v639_v46  ;;  %698 = vmatmul.f32.gmra.mxu0 %v626_v47 }
 0x20b   : > { %740 = vmatmul.f32.gmra.mxu2 %v640_v48  ;;  %v6615_v48 = vld [vmem:[#allocation2 + $0x88] sm:$0xff] }
 0x213   : > { %743 = vmatmul.f32.gmra.mxu2 %v641_v49  ;;  %v6588_v49 = vld [vmem:[#allocation2 + $0x18] sm:$0xff] }
 0x220   : > { %v6425_v50 = vpop.f32.mrf.mxu0 }
 0x221   : > { %791 = vmax.xlane.f32.xlu0 %v6425_v50 }
 0x226   : > { %v6428_v51 = vpop.f32.mrf.mxu2 }
 0x227   : > { %817 = vmax.xlane.f32.xlu1 %v6428_v51  ;;  %v6434_v53 = vpop.f32.mrf.mxu3 }
 0x228   : > { %v6431_v52 = vpop.f32.mrf.mxu0 }
 0x229   : > { %793 = vmax.xlane.f32.xlu0 %v6431_v52 }
 0x22e   : > { %v6436_v54 = vpop.f32.mrf.mxu2 }
 0x22f   : > { %847 = vmax.xlane.f32.xlu1 %v6434_v53  ;;  %819 = vmax.xlane.f32.xlu2 %v6436_v54  ;;  %v6442_v56 = vpop.f32.mrf.mxu3 }
 0x230   : > { %v6440_v55 = vpop.f32.mrf.mxu0 }
 0x236   : > { %v6444_v57 = vpop.f32.mrf.mxu2 }
 0x237   : > { %9396 = vst [vmem:[#allocation58_spill] sm:$0xff] %v6444_v57  ;;  %795 = vmax.xlane.f32.xlu1 %v6440_v55  ;;  %821 = vmax.xlane.f32.xlu0 %v6444_v57  ;;  %v6451_v59 = vpop.f32.mrf.mxu3 }
 0x238   : > { %v6448_v58 = vpop.f32.mrf.mxu0  ;;  %849 = vmax.xlane.f32.xlu2 %v6442_v56  ;;  %9397 = vst [vmem:[#allocation59_spill] sm:$0xff] %v6451_v59 }
 0x23e   : > { %v6453_v60 = vpop.f32.mrf.mxu2 }
 0x23f   : > { %9398 = vst [vmem:[#allocation60_spill] sm:$0xff] %v6453_v60  ;;  %797 = vmax.xlane.f32.xlu1 %v6448_v58  ;;  %851 = vmax.xlane.f32.xlu0 %v6451_v59  ;;  %v6466_v0 = vpop.f32.mrf.mxu3 }
 0x240   : > { %v6457_v61 = vpop.f32.mrf.mxu0  ;;  %9400 = vst [vmem:[#allocation62_spill] sm:$0xff] %v6466_v0 }
 0x241   : > { %799 = vmax.xlane.f32.xlu2 %v6457_v61 }
 0x246   : > { %v6460_v62 = vpop.f32.mrf.mxu2 }
 0x247   : > { %9399 = vst [vmem:[#allocation61_spill] sm:$0xff] %v6460_v62  ;;  %823 = vmax.xlane.f32.xlu1 %v6453_v60 }
 0x248   : > { %v6463_v63 = vpop.f32.mrf.mxu0 }
 0x249   : > { %825 = vmax.xlane.f32.xlu2 %v6460_v62  ;;  %v611_v62 = vld [vmem:[%s6224_s0 + $0x68] sm:$0xff] }
 0x24e   : > { %v6468_v1 = vpop.f32.mrf.mxu2 }
 0x24f   : > { %9401 = vst [vmem:[#allocation63_spill] sm:$0xff] %v6468_v1  ;;  %853 = vmax.xlane.f32.xlu1 %v6466_v0  ;;  %827 = vmax.xlane.f32.xlu0 %v6468_v1 }
 0x250   : > { %v6472_v2 = vpop.f32.mrf.mxu0 }
 0x251   : > { %801 = vmax.xlane.f32.xlu2 %v6463_v63 }
 0x256   : > { %v6475_v3 = vpop.f32.mrf.mxu2 }
 0x257   : > { %9402 = vst [vmem:[#allocation64_spill] sm:$0xff] %v6475_v3  ;;  %829 = vmax.xlane.f32.xlu1 %v6475_v3  ;;  %803 = vmax.xlane.f32.xlu0 %v6472_v2 }
 0x258   : > { %v6479_v4 = vpop.f32.mrf.mxu0 }
 0x25e   : > { %v6481_v5 = vpop.f32.mrf.mxu2 }
 0x25f   : > { %9403 = vst [vmem:[#allocation65_spill] sm:$0xff] %v6481_v5  ;;  %831 = vmax.xlane.f32.xlu2 %v6481_v5  ;;  %805 = vmax.xlane.f32.xlu1 %v6479_v4 }
 0x260   : > { %v6485_v6 = vpop.f32.mrf.mxu0 }
 0x266   : > { %v6487_v7 = vpop.f32.mrf.mxu2 }
 0x267   : > { %807 = vmax.xlane.f32.xlu2 %v6485_v6  ;;  %833 = vmax.xlane.f32.xlu0 %v6487_v7 }
 0x268   : > { %v6491_v8 = vpop.f32.mrf.mxu0 }
 0x26e   : > { %v6493_v9 = vpop.f32.mrf.mxu2 }
 0x26f   : > { %835 = vmax.xlane.f32.xlu1 %v6493_v9  ;;  %809 = vmax.xlane.f32.xlu0 %v6491_v8 }
 0x270   : > { %v6497_v10 = vpop.f32.mrf.mxu0 }
 0x271   : > { %9404 = vst [vmem:[#allocation66_spill] sm:$0xff] %v6497_v10 }
 0x276   : > { %v6499_v11 = vpop.f32.mrf.mxu2 }
 0x277   : > { %837 = vmax.xlane.f32.xlu2 %v6499_v11  ;;  %811 = vmax.xlane.f32.xlu1 %v6497_v10 }
 0x278   : > { %v6503_v12 = vpop.f32.mrf.mxu0 }
 0x279   : > { %9405 = vst [vmem:[#allocation67_spill] sm:$0xff] %v6503_v12 }
 0x27e   : > { %v6505_v13 = vpop.f32.mrf.mxu2 }
 0x27f   : > { %9406 = vst [vmem:[#allocation68_spill] sm:$0xff] %v6505_v13  ;;  %813 = vmax.xlane.f32.xlu2 %v6503_v12  ;;  %839 = vmax.xlane.f32.xlu0 %v6505_v13  ;;  %v603_v13 = vld [vmem:[%s6224_s0 + $0x28] sm:$0xff]  ;;  %v602_v12 = vld [vmem:[%s6224_s0 + $0x20] sm:$0xff] }
 0x280   : > { %v6509_v15 = vpop.f32.mrf.mxu0 }
 0x281   : > { %9407 = vst [vmem:[#allocation69_spill] sm:$0xff] %v6509_v15 }
 0x286   : > { %v6511_v16 = vpop.f32.mrf.mxu2 }
 0x287   : > { %9408 = vst [vmem:[#allocation70_spill] sm:$0xff] %v6511_v16  ;;  %841 = vmax.xlane.f32.xlu1 %v6511_v16  ;;  %815 = vmax.xlane.f32.xlu0 %v6509_v15 }
 0x28e   : > { %v6515_v17 = vpop.f32.mrf.mxu2 }
 0x28f   : > { %9409 = vst [vmem:[#allocation71_spill] sm:$0xff] %v6515_v17  ;;  %843 = vmax.xlane.f32.xlu2 %v6515_v17 }
 0x294   : > { %v792_v19 = vpop.xlane.xlu0 %791 }
 0x295   : > { %v6521_v20 = vmax.f32 %v6518_v18, %v792_v19 }
 0x296   : > { %v6523_v21 = vpop.f32.mrf.mxu2 }
 0x297   : > { %9410 = vst [vmem:[#allocation72_spill] sm:$0xff] %v6523_v21  ;;  %845 = vmax.xlane.f32.xlu0 %v6523_v21 }
 0x298   : > { %1833 = vst.msk [vmem:[#allocation2] sm:$0xff] %vm1399_vm1, %v6521_v20 }
 0x29a   : > { %v818_v24 = vpop.xlane.xlu1 %817 }
 0x29b   : > { %v6535_v26 = vmax.f32 %v6530_v23, %v818_v24 }
 0x29c   : > { %v794_v27 = vpop.xlane.xlu0 %793 }
 0x29d   : > { %1846 = vst.msk [vmem:[#allocation2 + $0x68] sm:$0xff] %vm1399_vm1, %v6535_v26  ;;  %v6542_v29 = vmax.f32 %v6532_v25, %v794_v27  ;;  %v6592_v27 = vld [vmem:[#allocation2 + $0x20] sm:$0xff] }
 0x29f   : > { %1834 = vst.msk [vmem:[#allocation2 + $0x8] sm:$0xff] %vm1399_vm1, %v6542_v29 }
 0x2a0   : > { %1050 = vperm.xlu1 %5127, %v6535_v26  }
 0x2a2   : > { %v848_v32 = vpop.xlane.xlu1 %847  ;;  %v820_v33 = vpop.xlane.xlu2 %819 }
 0x2a3   : > { %v6552_v34 = vmax.f32 %v6547_v30, %v848_v32  ;;  %v6555_v35 = vmax.f32 %v6549_v31, %v820_v33 }
 0x2a5   : > { %1861 = vst.msk [vmem:[#allocation2 + $0xe0] sm:$0xff] %vm1399_vm1, %v6552_v34 }
 0x2a6   : > { %1847 = vst.msk [vmem:[#allocation2 + $0x70] sm:$0xff] %vm1399_vm1, %v6555_v35 }
 0x2a7   : > { %985 = vperm.xlu2 %5126, %v6521_v20  }
 0x2a8   : > { %1125 = vperm.xlu1 %5127, %v6552_v34  }
 0x2aa   : > { %v796_v41 = vpop.xlane.xlu1 %795  ;;  %v822_v42 = vpop.xlane.xlu0 %821 }
 0x2ab   : > { %v857_v43 = vmax.f32 %v761_v38, %v796_v41  ;;  %990 = vperm.xlu0 %5128, %v6542_v29   ;;  %v6573_v44 = vmax.f32 %v6567_v39, %v822_v42  ;;  %v850_v45 = vpop.xlane.xlu2 %849 }
 0x2ac   : > { %v6576_v46 = vmax.f32 %v6569_v40, %v850_v45 }
 0x2ad   : > { %1835 = vst.msk [vmem:[#allocation2 + $0x10] sm:$0xff] %vm1399_vm1, %v857_v43 }
 0x2ae   : > { %9412 = vst [vmem:[#allocation74_spill] sm:$0xff] %v6576_v46 }
 0x2af   : > { %1848 = vst.msk [vmem:[#allocation2 + $0x78] sm:$0xff] %vm1399_vm1, %v6573_v44  ;;  %1060 = vperm.xlu2 %5126, %v6573_v44  }
 0x2b0   : > { %1862 = vst.msk [vmem:[#allocation2 + $0xe8] sm:$0xff] %vm1399_vm1, %v6576_v46  ;;  %995 = vperm.xlu1 %5127, %v857_v43  }
 0x2b2   : > { %v798_v19 = vpop.xlane.xlu1 %797  ;;  %v852_v24 = vpop.xlane.xlu0 %851 }
 0x2b3   : > { %v6595_v32 = vmax.f32 %v6588_v49, %v798_v19  ;;  %1055 = vperm.xlu0 %5128, %v6555_v35   ;;  %v6599_v33 = vmax.f32 %v6590_v14, %v852_v24  ;;  %v6613_v19 = vld [vmem:[#allocation2 + $0x80] sm:$0xff] }
 0x2b4   : > { %v800_v41 = vpop.xlane.xlu2 %799 }
 0x2b5   : > { %9414 = vst [vmem:[#allocation76_spill] sm:$0xff] %v6599_v33  ;;  %v6606_v45 = vmax.f32 %v6592_v27, %v800_v41  ;;  %v889_v41 = vsub.f32 %v761_v38, %v857_v43  ;;  %v6634_v43 = vld [vmem:[#allocation2 + $0xf8] sm:$0xff] }
 0x2b6   : > { %1836 = vst.msk [vmem:[#allocation2 + $0x18] sm:$0xff] %vm1399_vm1, %v6595_v32 }
 0x2b7   : > { %1863 = vst.msk [vmem:[#allocation2 + $0xf0] sm:$0xff] %vm1399_vm1, %v6599_v33  ;;  %1135 = vperm.xlu2 %5126, %v6599_v33   ;;  %v923_v38 = vmul.f32 1.442695, %v889_v41 }
 0x2b8   : > { %1837 = vst.msk [vmem:[#allocation2 + $0x20] sm:$0xff] %vm1399_vm1, %v6606_v45 }
 0x2b9   : > { %9415 = vst [vmem:[#allocation77_spill] sm:$0xff] %v6634_v43  ;;  %5129 = vpow2.f32 %v923_v38  ;;  %v6664_v38 = vld [vmem:[#allocation2 + $0x30] sm:$0xff] }
 0x2ba   : > { %v824_v24 = vpop.xlane.xlu1 %823 }
 0x2bb   : > { %v6618_v36 = vmax.f32 %v6613_v19, %v824_v24  ;;  %1130 = vperm.xlu0 %5128, %v6576_v46   ;;  %v6636_v24 = vld [vmem:[#allocation2 + $0x90] sm:$0xff]  ;;  %v6638_v46 = vld [vmem:[#allocation2 + $0x28] sm:$0xff] }
 0x2bc   : > { %v826_v42 = vpop.xlane.xlu2 %825 }
 0x2bd   : > { %1849 = vst.msk [vmem:[#allocation2 + $0x80] sm:$0xff] %vm1399_vm1, %v6618_v36  ;;  %1065 = vperm.xlu1 %5127, %v6618_v36   ;;  %v6627_v47 = vmax.f32 %v6615_v48, %v826_v42 }
 0x2bf   : > { %1850 = vst.msk [vmem:[#allocation2 + $0x88] sm:$0xff] %vm1399_vm1, %v6627_v47  ;;  %1000 = vperm.xlu2 %5126, %v6595_v32   ;;  %v6666_v41 = vpop.eup %5129 }
 0x2c0   : > { %9417 = vst [vmem:[#allocation79_spill] sm:$0xff] %v6666_v41 }
 0x2c2   : > { %v854_v37 = vpop.xlane.xlu1 %853  ;;  %v828_v22 = vpop.xlane.xlu0 %827 }
 0x2c3   : > { %v6641_v42 = vmax.f32 %v6634_v43, %v854_v37  ;;  %1070 = vperm.xlu0 %5128, %v6627_v47   ;;  %v6645_v28 = vmax.f32 %v6636_v24, %v828_v22  ;;  %v6662_v22 = vld [vmem:[#allocation2 + $0x98] sm:$0xff] }
 0x2c4   : > { %v802_v40 = vpop.xlane.xlu2 %801 }
 0x2c5   : > { %9416 = vst [vmem:[#allocation78_spill] sm:$0xff] %v6641_v42  ;;  %1140 = vperm.xlu1 %5127, %v6641_v42   ;;  %v6655_v37 = vmax.f32 %v6638_v46, %v802_v40 }
 0x2c6   : > { %1864 = vst.msk [vmem:[#allocation2 + $0xf8] sm:$0xff] %vm1399_vm1, %v6641_v42 }
 0x2c7   : > { %1851 = vst.msk [vmem:[#allocation2 + $0x90] sm:$0xff] %vm1399_vm1, %v6645_v28  ;;  %1005 = vperm.xlu2 %5126, %v6606_v45  }
 0x2c8   : > { %1838 = vst.msk [vmem:[#allocation2 + $0x28] sm:$0xff] %vm1399_vm1, %v6655_v37 }
 0x2ca   : > { %v830_v14 = vpop.xlane.xlu1 %829  ;;  %v804_v42 = vpop.xlane.xlu0 %803 }
 0x2cb   : > { %1589 = vperm.xlu0 %5128, %v6666_v41   ;;  %v6670_v40 = vmax.f32 %v6662_v22, %v830_v14  ;;  %v6673_v33 = vmax.f32 %v6664_v38, %v804_v42  ;;  %v888_v14 = vsub.f32 %v6532_v25, %v6542_v29  ;;  %v6685_v41 = vld [vmem:[#allocation2 + $0xa0] sm:$0xff]  ;;  %v6687_v42 = vld [vmem:[#allocation2 + $0x38] sm:$0xff]  ;;  %v891_v25 = vsub.f32 %v6592_v27, %v6606_v45  ;;  %v6709_v29 = vld [vmem:[#allocation2 + $0xa8] sm:$0xff] }
 0x2cc   : > { %v9418_v27 = vsub.f32 %v6518_v18, %v6521_v20  ;;  %v609_v18 = vld [vmem:[%s6224_s0 + $0x58] sm:$0xff] }
 0x2cd   : > { %1010 = vperm.xlu1 %5127, %v6655_v37   ;;  %1852 = vst.msk [vmem:[#allocation2 + $0x98] sm:$0xff] %vm1399_vm1, %v6670_v40  ;;  %v921_v3 = vmul.f32 1.442695, %v888_v14  ;;  %v612_v14 = vld [vmem:[%s6224_s0 + $0x70] sm:$0xff]  ;;  %v927_v1 = vmul.f32 1.442695, %v891_v25 }
 0x2ce   : > { %1839 = vst.msk [vmem:[#allocation2 + $0x30] sm:$0xff] %vm1399_vm1, %v6673_v33  ;;  %v919_v45 = vmul.f32 1.442695, %v9418_v27  ;;  %v608_v25 = vld [vmem:[%s6224_s0 + $0x50] sm:$0xff] }
 0x2cf   : > { %1075 = vperm.xlu2 %5126, %v6645_v28   ;;  %5131 = vpow2.f32 %v921_v3 }
 0x2d0   : > { %5133 = vpow2.f32 %v919_v45 }
 0x2d1   : > { %5135 = vpow2.f32 %v927_v1  ;;  %v607_v1 = vld [vmem:[%s6224_s0 + $0x48] sm:$0xff] }
 0x2d2   : > { %v832_v21 = vpop.xlane.xlu2 %831  ;;  %v806_v17 = vpop.xlane.xlu1 %805 }
 0x2d3   : > { %v6690_v43 = vmax.f32 %v6685_v41, %v832_v21  ;;  %v6693_v5 = vmax.f32 %v6687_v42, %v806_v17  ;;  %v613_v17 = vld [vmem:[%s6224_s0 + $0x78] sm:$0xff]  ;;  %v6707_v21 = vld [vmem:[#allocation2 + $0x40] sm:$0xff] }
 0x2d4   : > { %1432 = vmatpush.msrb.mxu0 %v613_v17  ;;  %4798 = vmatpush.msra.mxu1 %v613_v17 }
 0x2d5   : > { %1853 = vst.msk [vmem:[#allocation2 + $0xa0] sm:$0xff] %vm1399_vm1, %v6690_v43  ;;  %1080 = vperm.xlu1 %5127, %v6670_v40   ;;  %1085 = vperm.xlu0 %5128, %v6690_v43   ;;  %v6730_v20 = vpop.eup %5131 }
 0x2d6   : > { %1840 = vst.msk [vmem:[#allocation2 + $0x38] sm:$0xff] %vm1399_vm1, %v6693_v5  ;;  %4799 = vmatpush.msrb.mxu3 %v613_v17  ;;  %1433 = vmatpush.msrb.mxu0 %v612_v14  ;;  %v610_v17 = vld [vmem:[%s6224_s0 + $0x60] sm:$0xff]  ;;  %v6741_v45 = vpop.eup %5133 }
 0x2d7   : > { %1015 = vperm.xlu2 %5126, %v6673_v33   ;;  %4800 = vmatpush.msra.mxu1 %v612_v14  ;;  %9419 = vst [vmem:[#allocation80_spill] sm:$0xff] %v6730_v20 }
 0x2d8   : > { %4801 = vmatpush.msrb.mxu3 %v612_v14  ;;  %1434 = vmatpush.msrb.mxu0 %v611_v62  ;;  %9420 = vst [vmem:[#allocation81_spill] sm:$0xff] %v6741_v45 }
 0x2d9   : > { %4802 = vmatpush.msra.mxu1 %v611_v62 }
 0x2da   : > { %v808_v16 = vpop.xlane.xlu2 %807  ;;  %v834_v0 = vpop.xlane.xlu0 %833  ;;  %4803 = vmatpush.msrb.mxu3 %v611_v62  ;;  %1435 = vmatpush.msrb.mxu0 %v610_v17  ;;  %v6735_v62 = vld [vmem:[#allocation2 + $0xb0] sm:$0xff] }
 0x2db   : > { %v6717_v3 = vmax.f32 %v6707_v21, %v808_v16  ;;  %v6720_v15 = vmax.f32 %v6709_v29, %v834_v0  ;;  %4804 = vmatpush.msra.mxu1 %v610_v17  ;;  %v6737_v0 = vld [vmem:[#allocation2 + $0x48] sm:$0xff] }
 0x2dc   : > { %4805 = vmatpush.msrb.mxu3 %v610_v17  ;;  %1436 = vmatpush.msrb.mxu0 %v609_v18 }
 0x2dd   : > { %1841 = vst.msk [vmem:[#allocation2 + $0x40] sm:$0xff] %vm1399_vm1, %v6717_v3  ;;  %1020 = vperm.xlu1 %5127, %v6693_v5   ;;  %1025 = vperm.xlu0 %5128, %v6717_v3  }
 0x2de   : > { %1854 = vst.msk [vmem:[#allocation2 + $0xa8] sm:$0xff] %vm1399_vm1, %v6720_v15  ;;  %4806 = vmatpush.msra.mxu1 %v609_v18  ;;  %4807 = vmatpush.msrb.mxu3 %v609_v18  ;;  %v606_v18 = vld [vmem:[%s6224_s0 + $0x40] sm:$0xff] }
 0x2df   : > { %1584 = vperm.xlu2 %5126, %v6730_v20   ;;  %1437 = vmatpush.msrb.mxu0 %v608_v25  ;;  %v6749_v20 = vpop.eup %5135 }
 0x2e0   : > { %4808 = vmatpush.msra.mxu1 %v608_v25  ;;  %4809 = vmatpush.msrb.mxu3 %v608_v25  ;;  %9421 = vst [vmem:[#allocation82_spill] sm:$0xff] %v6749_v20  ;;  %v892_v25 = vsub.f32 %v6638_v46, %v6655_v37 }
 0x2e1   : > { %1438 = vmatpush.msrb.mxu0 %v607_v1 }
 0x2e2   : > { %v836_v14 = vpop.xlane.xlu1 %835  ;;  %v810_v27 = vpop.xlane.xlu0 %809  ;;  %4810 = vmatpush.msra.mxu1 %v607_v1  ;;  %4811 = vmatpush.msrb.mxu3 %v607_v1  ;;  %v929_v37 = vmul.f32 1.442695, %v892_v25  ;;  %v6791_v25 = vld [vmem:[#allocation2 + $0xc0] sm:$0xff] }
 0x2e3   : > { %v6744_v16 = vmax.f32 %v6735_v62, %v836_v14  ;;  %v6747_v17 = vmax.f32 %v6737_v0, %v810_v27  ;;  %1439 = vmatpush.msrb.mxu0 %v606_v18  ;;  %v605_v14 = vld [vmem:[%s6224_s0 + $0x38] sm:$0xff] }
 0x2e4   : > { %4812 = vmatpush.msra.mxu1 %v606_v18  ;;  %v6762_v27 = vld [vmem:[#allocation2 + $0xb8] sm:$0xff]  ;;  %4813 = vmatpush.msrb.mxu3 %v606_v18  ;;  %v890_v18 = vsub.f32 %v6588_v49, %v6595_v32  ;;  %v600_v49 = vld [vmem:[%s6224_s0 + $0x10] sm:$0xff]  ;;  %5137 = vpow2.f32 %v929_v37  ;;  %v895_v32 = vsub.f32 %v6707_v21, %v6717_v3  ;;  %v599_v21 = vld [vmem:[%s6224_s0 + $0x8] sm:$0xff] }
 0x2e5   : > { %1579 = vperm.xlu1 %5127, %v6741_v45   ;;  %1599 = vperm.xlu0 %5128, %v6749_v20   ;;  %1855 = vst.msk [vmem:[#allocation2 + $0xb0] sm:$0xff] %vm1399_vm1, %v6744_v16  ;;  %v6764_v20 = vld [vmem:[#allocation2 + $0x50] sm:$0xff] }
 0x2e6   : > { %1842 = vst.msk [vmem:[#allocation2 + $0x48] sm:$0xff] %vm1399_vm1, %v6747_v17  ;;  %1440 = vmatpush.msrb.mxu0 %v605_v14  ;;  %v604_v45 = vld [vmem:[%s6224_s0 + $0x30] sm:$0xff]  ;;  %4814 = vmatpush.msra.mxu1 %v605_v14  ;;  %v935_v3 = vmul.f32 1.442695, %v895_v32 }
 0x2e7   : > { %1090 = vperm.xlu2 %5126, %v6720_v15   ;;  %4815 = vmatpush.msrb.mxu3 %v605_v14  ;;  %v6789_v14 = vld [vmem:[#allocation2 + $0x58] sm:$0xff] }
 0x2e8   : > { %1441 = vmatpush.msrb.mxu0 %v604_v45  ;;  %4816 = vmatpush.msra.mxu1 %v604_v45 }
 0x2e9   : > { %4817 = vmatpush.msrb.mxu3 %v604_v45 }
 0x2ea   : > { %v838_v59 = vpop.xlane.xlu2 %837  ;;  %v812_v60 = vpop.xlane.xlu1 %811  ;;  %1442 = vmatpush.msrb.mxu0 %v603_v13  ;;  %4818 = vmatpush.msra.mxu1 %v603_v13 }
 0x2eb   : > { %v6769_v1 = vmax.f32 %v6762_v27, %v838_v59  ;;  %v865_v46 = vmax.f32 %v6764_v20, %v812_v60  ;;  %v894_v59 = vsub.f32 %v6687_v42, %v6693_v5  ;;  %v601_v60 = vld [vmem:[%s6224_s0 + $0x18] sm:$0xff]  ;;  %v925_v5 = vmul.f32 1.442695, %v890_v18  ;;  %4819 = vmatpush.msrb.mxu3 %v603_v13  ;;  %v6806_v18 = vpop.eup %5137 }
 0x2ec   : > { %1443 = vmatpush.msrb.mxu0 %v602_v12  ;;  %4820 = vmatpush.msra.mxu1 %v602_v12  ;;  %v893_v13 = vsub.f32 %v6664_v38, %v6673_v33  ;;  %9422 = vst [vmem:[#allocation83_spill] sm:$0xff] %v6806_v18  ;;  %v6814_v33 = vld [vmem:[#allocation2 + $0x60] sm:$0xff] }
 0x2ed   : > { %1856 = vst.msk [vmem:[#allocation2 + $0xb8] sm:$0xff] %vm1399_vm1, %v6769_v1  ;;  %1095 = vperm.xlu1 %5127, %v6744_v16   ;;  %1100 = vperm.xlu0 %5128, %v6769_v1   ;;  %v933_v42 = vmul.f32 1.442695, %v894_v59  ;;  %5139 = vpow2.f32 %v925_v5 }
 0x2ee   : > { %1843 = vst.msk [vmem:[#allocation2 + $0x50] sm:$0xff] %vm1399_vm1, %v865_v46  ;;  %1444 = vmatpush.msrb.mxu0 %v601_v60  ;;  %4822 = vmatpush.msra.mxu1 %v601_v60  ;;  %v931_v38 = vmul.f32 1.442695, %v893_v13 }
 0x2ef   : > { %1030 = vperm.xlu2 %5126, %v6747_v17   ;;  %4821 = vmatpush.msrb.mxu3 %v602_v12  ;;  %5141 = vpow2.f32 %v933_v42  ;;  %v6812_v12 = vld [vmem:[#allocation2 + $0xc8] sm:$0xff] }
 0x2f0   : > { %1445 = vmatpush.msrb.mxu0 %v600_v49  ;;  %4824 = vmatpush.msra.mxu1 %v600_v49  ;;  %5143 = vpow2.f32 %v935_v3 }
 0x2f1   : > { %4823 = vmatpush.msrb.mxu3 %v601_v60  ;;  %5145 = vpow2.f32 %v931_v38 }
 0x2f2   : > { %v814_v57 = vpop.xlane.xlu2 %813  ;;  %v840_v10 = vpop.xlane.xlu0 %839  ;;  %1446 = vmatpush.msrb.mxu0 %v599_v21  ;;  %4826 = vmatpush.msra.mxu1 %v599_v21 }
 0x2f3   : > { %v6794_v45 = vmax.f32 %v6789_v14, %v814_v57  ;;  %v6797_v37 = vmax.f32 %v6791_v25, %v840_v10  ;;  %v598_v57 = vld [vmem:[%s6224_s0] sm:$0xff]  ;;  %v897_v10 = vsub.f32 %v6764_v20, %v865_v46  ;;  %4825 = vmatpush.msrb.mxu3 %v600_v49  ;;  %v6816_v42 = vpop.eup %5139  ;;  %v6832_v49 = vld [vmem:[#allocation2 + $0xd0] sm:$0xff] }
 0x2f4   : > { %1447 = vmatpush.msrb.mxu0 %v598_v57  ;;  %4828 = vmatpush.msra.mxu1 %v598_v57 }
 0x2f5   : > { %1844 = vst.msk [vmem:[#allocation2 + $0x58] sm:$0xff] %vm1399_vm1, %v6794_v45  ;;  %1035 = vperm.xlu1 %5127, %v865_v46   ;;  %1040 = vperm.xlu0 %5128, %v6794_v45   ;;  %v939_v59 = vmul.f32 1.442695, %v897_v10 }
 0x2f6   : > { %1857 = vst.msk [vmem:[#allocation2 + $0xc0] sm:$0xff] %vm1399_vm1, %v6797_v37  ;;  %4827 = vmatpush.msrb.mxu3 %v599_v21  ;;  %v9425_v21 = vsub.f32 %v6530_v23, %v6535_v26  ;;  %v896_v23 = vsub.f32 %v6737_v0, %v6747_v17  ;;  %v898_v26 = vsub.f32 %v6789_v14, %v6794_v45 }
 0x2f7   : > { %1604 = vperm.xlu2 %5126, %v6806_v18   ;;  %v6822_v18 = vpop.eup %5141  ;;  %5147 = vpow2.f32 %v939_v59  ;;  %v9428_v17 = vsub.f32 %v6613_v19, %v6618_v36 }
 0x2f8   : > { %9423 = vst [vmem:[#allocation84_spill] sm:$0xff] %v6822_v18  ;;  %v6828_v60 = vpop.eup %5143  ;;  %4829 = vmatpush.msrb.mxu3 %v598_v57  ;;  %v945_v3 = vmul.f32 1.442695, %v9425_v21  ;;  %v6853_v57 = vld [vmem:[#allocation2 + $0xd8] sm:$0xff]  ;;  %v937_v59 = vmul.f32 1.442695, %v896_v23 }
 0x2f9   : > { %9424 = vst [vmem:[#allocation85_spill] sm:$0xff] %v6828_v60  ;;  %v6837_v10 = vpop.eup %5145  ;;  %v951_v14 = vmul.f32 1.442695, %v9428_v17 }
 0x2fa   : > { %v842_v32 = vpop.xlane.xlu1 %841  ;;  %v816_v5 = vpop.xlane.xlu0 %815  ;;  %5149 = vpow2.f32 %v945_v3  ;;  %v941_v3 = vmul.f32 1.442695, %v898_v26 }
 0x2fb   : > { %v6819_v20 = vmax.f32 %v6812_v12, %v842_v32  ;;  %v867_v46 = vmax.f32 %v6814_v33, %v816_v5  ;;  %5151 = vpow2.f32 %v937_v59  ;;  %v9430_v59 = vsub.f32 %v6549_v31, %v6555_v35 }
 0x2fc   : > { %v9432_v31 = vsub.f32 %v6662_v22, %v6670_v40  ;;  %v909_v22 = vsub.f32 %v6735_v62, %v6744_v16 }
 0x2fd   : > { %1594 = vperm.xlu1 %5127, %v6816_v42   ;;  %1614 = vperm.xlu0 %5128, %v6822_v18   ;;  %1858 = vst.msk [vmem:[#allocation2 + $0xc8] sm:$0xff] %vm1399_vm1, %v6819_v20  ;;  %v6842_v32 = vpop.eup %5147  ;;  %v899_v36 = vsub.f32 %v6814_v33, %v867_v46 }
 0x2fe   : > { %1845 = vst.msk [vmem:[#allocation2 + $0x60] sm:$0xff] %vm1399_vm1, %v867_v46  ;;  %v957_v35 = vmul.f32 1.442695, %v9432_v31 }
 0x2ff   : > { %1619 = vperm.xlu2 %5126, %v6828_v60   ;;  %9426 = vst [vmem:[#allocation86_spill] sm:$0xff] %v6842_v32 }
 0x302   : > { %v844_v13 = vpop.xlane.xlu2 %843 }
 0x303   : > { %v6840_v38 = vmax.f32 %v6832_v49, %v844_v13 }
 0x305   : > { %1859 = vst.msk [vmem:[#allocation2 + $0xd0] sm:$0xff] %vm1399_vm1, %v6840_v38  ;;  %1609 = vperm.xlu1 %5127, %v6837_v10   ;;  %1629 = vperm.xlu0 %5128, %v6842_v32   ;;  %v6859_v32 = vpop.eup %5149 }
 0x306   : > { %v6875_v26 = vpop.eup %5151 }
 0x307   : > { %1105 = vperm.xlu2 %5126, %v6797_v37   ;;  %9429 = vst [vmem:[#allocation87_spill] sm:$0xff] %v6875_v26 }
 0x30a   : > { %v986_v5 = vpop.permute.xlu2 %985  ;;  %v846_v21 = vpop.xlane.xlu0 %845 }
 0x30b   : > { %v1143_v13 = vsub.f32 %v6425_v50, %v986_v5  ;;  %v6857_v18 = vmax.f32 %v6853_v57, %v846_v21  ;;  %v9427_v50 = vsub.f32 %v6567_v39, %v6573_v44  ;;  %v943_v44 = vmul.f32 1.442695, %v899_v36 }
 0x30d   : > { %v1175_v60 = vmul.f32 1.442695, %v1143_v13  ;;  %1110 = vperm.xlu1 %5127, %v6819_v20   ;;  %1644 = vperm.xlu0 %5128, %v6859_v32   ;;  %1860 = vst.msk [vmem:[#allocation2 + $0xd8] sm:$0xff] %vm1399_vm1, %v6857_v18  ;;  %v949_v0 = vmul.f32 1.442695, %v9427_v50 }
 0x30f   : > { %5153 = vpow2.f32 %v1175_v60  ;;  %1045 = vperm.xlu2 %5126, %v867_v46   ;;  %v947_v60 = vmul.f32 1.442695, %v9430_v59 }
 0x310   : > { %5155 = vpow2.f32 %v941_v3 }
 0x311   : > { %5157 = vpow2.f32 %v949_v0  ;;  %v9433_v0 = vsub.f32 %v6636_v24, %v6645_v28  ;;  %v912_v24 = vsub.f32 %v6812_v12, %v6819_v20 }
 0x312   : > { %v6871_v45 = vpop.permute.xlu1 %1050  ;;  %v6873_v23 = vpop.permute.xlu2 %1060  ;;  %5159 = vpow2.f32 %v951_v14  ;;  %v963_v14 = vmul.f32 1.442695, %v909_v22 }
 0x313   : > { %5161 = vpow2.f32 %v947_v60  ;;  %v955_v17 = vmul.f32 1.442695, %v9433_v0 }
 0x314   : > { %5163 = vpow2.f32 %v957_v35 }
 0x315   : > { %v6880_v5 = vpop.eup %5153  ;;  %1624 = vperm.xlu1 %5127, %v6875_v26   ;;  %1115 = vperm.xlu0 %5128, %v6840_v38   ;;  %5165 = vpow2.f32 %v943_v44 }
 0x316   : > { %v6884_v39 = vpop.eup %5155  ;;  %1448 = vmatmul.f32.vlgmr.msrb.gmra.mxu0 %v6880_v5 }
 0x317   : > { %9431 = vst [vmem:[#allocation88_spill] sm:$0xff] %v6884_v39  ;;  %1634 = vperm.xlu2 %5126, %v6884_v39   ;;  %v6896_v13 = vpop.eup %5157 }
 0x318   : > { %v6898_v3 = vpop.eup %5159 }
 0x319   : > { %v6902_v46 = vpop.eup %5161 }
 0x31a   : > { %v6892_v19 = vpop.permute.xlu1 %1125  ;;  %v6894_v21 = vpop.permute.xlu2 %1135 }
 0x31b   : > { %v6911_v36 = vpop.eup %5163 }
 0x31c   : > { %v6914_v35 = vpop.eup %5165 }
 0x31d   : > { %1654 = vperm.xlu1 %5127, %v6896_v13   ;;  %1659 = vperm.xlu0 %5128, %v6898_v3   ;;  %v991_v33 = vpop.permute.xlu0 %990  ;;  %9434 = vst [vmem:[#allocation89_spill] sm:$0xff] %v6914_v35 }
 0x31e   : > { %v1144_v40 = vsub.f32 %v6431_v52, %v991_v33  ;;  %v9435_v52 = vsub.f32 %v6615_v48, %v6627_v47  ;;  %v9436_v47 = vsub.f32 %v6709_v29, %v6720_v15  ;;  %v969_v33 = vmul.f32 1.442695, %v912_v24 }
 0x31f   : > { %1649 = vperm.xlu2 %5126, %v6902_v46   ;;  %v914_v24 = vsub.f32 %v6853_v57, %v6857_v18 }
 0x320   : > { %v1177_v50 = vmul.f32 1.442695, %v1144_v40  ;;  %v953_v16 = vmul.f32 1.442695, %v9435_v52  ;;  %v961_v48 = vmul.f32 1.442695, %v9436_v47 }
 0x322   : > { %5167 = vpow2.f32 %v1177_v50  ;;  %v996_v59 = vpop.permute.xlu1 %995  ;;  %v1001_v60 = vpop.permute.xlu2 %1000 }
 0x323   : > { %v1145_v31 = vsub.f32 %v6440_v55, %v996_v59  ;;  %5169 = vpow2.f32 %v955_v17  ;;  %v1146_v55 = vsub.f32 %v6448_v58, %v1001_v60  ;;  %v9438_v58 = vsub.f32 %v6685_v41, %v6690_v43 }
 0x324   : > { %5171 = vpow2.f32 %v963_v14  ;;  %v911_v17 = vsub.f32 %v6791_v25, %v6797_v37  ;;  %v9439_v14 = vsub.f32 %v6547_v30, %v6552_v34 }
 0x325   : > { %v1179_v62 = vmul.f32 1.442695, %v1145_v31  ;;  %1674 = vperm.xlu0 %5128, %v6911_v36   ;;  %1639 = vperm.xlu1 %5127, %v6914_v35   ;;  %v6921_v28 = vpop.permute.xlu0 %1055  ;;  %v1181_v50 = vmul.f32 1.442695, %v1146_v55  ;;  %v959_v20 = vmul.f32 1.442695, %v9438_v58 }
 0x326   : > { %v975_v59 = vmul.f32 1.442695, %v9439_v14  ;;  %v967_v60 = vmul.f32 1.442695, %v911_v17  ;;  %v973_v55 = vmul.f32 1.442695, %v914_v24 }
 0x327   : > { %5173 = vpow2.f32 %v1179_v62  ;;  %1120 = vperm.xlu2 %5126, %v6857_v18  }
 0x328   : > { %v6927_v44 = vpop.eup %5167  ;;  %5175 = vpow2.f32 %v953_v16 }
 0x329   : > { %1451 = vmatmul.f32.gmra.mxu0 %v6927_v44  ;;  %v6933_v40 = vpop.eup %5169  ;;  %5177 = vpow2.f32 %v961_v48 }
 0x32a   : > { %v1006_v22 = vpop.permute.xlu2 %1005  ;;  %v6935_v12 = vpop.eup %5171  ;;  %5179 = vpow2.f32 %v969_v33 }
 0x32b   : > { %9437 = vst [vmem:[#allocation90_spill] sm:$0xff] %v6935_v12  ;;  %5181 = vpow2.f32 %v1181_v50  ;;  %v1147_v43 = vsub.f32 %v6457_v61, %v1006_v22  ;;  %v9441_v61 = vsub.f32 %v6762_v27, %v6769_v1  ;;  %v913_v1 = vsub.f32 %v6832_v49, %v6840_v38 }
 0x32c   : > { %5183 = vpow2.f32 %v959_v20 }
 0x32d   : > { %v6940_v0 = vpop.eup %5173  ;;  %1689 = vperm.xlu0 %5128, %v6935_v12   ;;  %1669 = vperm.xlu1 %5127, %v6933_v40   ;;  %v6944_v15 = vpop.permute.xlu0 %1130  ;;  %v1183_v25 = vmul.f32 1.442695, %v1147_v43  ;;  %v965_v16 = vmul.f32 1.442695, %v9441_v61  ;;  %5185 = vpow2.f32 %v975_v59  ;;  %v971_v22 = vmul.f32 1.442695, %v913_v1 }
 0x32e   : > { %v6946_v29 = vpop.eup %5175  ;;  %1454 = vmatmul.f32.vlgmr.msra.gmra.mxu1 %v6940_v0  ;;  %5187 = vpow2.f32 %v967_v60 }
 0x32f   : > { %v6952_v41 = vpop.permute.xlu1 %1065  ;;  %1664 = vperm.xlu2 %5126, %v6946_v29   ;;  %v6960_v52 = vpop.eup %5177  ;;  %5189 = vpow2.f32 %v1183_v25 }
 0x330   : > { %v6962_v37 = vpop.eup %5179  ;;  %5191 = vpow2.f32 %v965_v16 }
 0x331   : > { %9440 = vst [vmem:[#allocation91_spill] sm:$0xff] %v6962_v37  ;;  %v6967_v62 = vpop.eup %5181  ;;  %5193 = vpow2.f32 %v973_v55 }
 0x332   : > { %v6958_v31 = vpop.permute.xlu2 %1075  ;;  %v6973_v34 = vpop.eup %5183  ;;  %5195 = vpow2.f32 %v971_v22 }
 0x333   : > { %v6983_v48 = vpop.eup %5185 }
 0x334   : > { %v6985_v33 = vpop.eup %5187 }
 0x335   : > { %1704 = vperm.xlu0 %5128, %v6962_v37   ;;  %1684 = vperm.xlu1 %5127, %v6960_v52   ;;  %v6971_v30 = vpop.permute.xlu0 %1070  ;;  %9442 = vst [vmem:[#allocation92_spill] sm:$0xff] %v6985_v33  ;;  %v6987_v50 = vpop.eup %5189 }
 0x336   : > { %1457 = vmatmul.f32.gmra.mxu1 %v6967_v62  ;;  %v6991_v18 = vpop.eup %5191 }
 0x337   : > { %v6978_v27 = vpop.permute.xlu1 %1140  ;;  %1679 = vperm.xlu2 %5126, %v6973_v34   ;;  %9443 = vst [vmem:[#allocation93_spill] sm:$0xff] %v6991_v18  ;;  %v7000_v17 = vpop.eup %5193 }
 0x338   : > { %9444 = vst [vmem:[#allocation94_spill] sm:$0xff] %v7000_v17  ;;  %v7004_v14 = vpop.eup %5195 }
 0x339   : > { %9445 = vst [vmem:[#allocation95_spill] sm:$0xff] %v7004_v14 }
 0x33a   : > { %v1016_v47 = vpop.permute.xlu2 %1015 }
 0x33b   : > { %v1149_v43 = vsub.f32 %v6472_v2, %v1016_v47 }
 0x33d   : > { %1719 = vperm.xlu0 %5128, %v6983_v48   ;;  %1699 = vperm.xlu1 %5127, %v6985_v33   ;;  %v6994_v57 = vpop.permute.xlu0 %1589  ;;  %v1187_v25 = vmul.f32 1.442695, %v1149_v43 }
 0x33e   : > { %1460 = vmatmul.f32.gmra.mxu1 %v6987_v50 }
 0x33f   : > { %v1011_v49 = vpop.permute.xlu1 %1010  ;;  %1694 = vperm.xlu2 %5126, %v6991_v18  }
 0x340   : > { %v1148_v38 = vsub.f32 %v6463_v63, %v1011_v49 }
 0x342   : > { %v1185_v58 = vmul.f32 1.442695, %v1148_v38  ;;  %v6998_v20 = vpop.permute.xlu2 %1584 }
 0x344   : > { %5197 = vpow2.f32 %v1185_v58 }
 0x345   : > { %1714 = vperm.xlu1 %5127, %v7000_v17   ;;  %5199 = vpow2.f32 %v1187_v25 }
 0x347   : > { %v7006_v59 = vpop.permute.xlu1 %1080  ;;  %1709 = vperm.xlu2 %5126, %v7004_v14   ;;  %v7009_v60 = vpop.permute.xlu0 %1085 }
 0x34a   : > { %v7011_v63 = vpop.eup %5197  ;;  %v1091_v61 = vpop.permute.xlu2 %1090 }
 0x34b   : > { %v1164_v16 = vsub.f32 %v6487_v7, %v1091_v61  ;;  %1463 = vmatmul.f32.gmra.mxu1 %v7011_v63  ;;  %v7016_v47 = vpop.eup %5199 }
 0x34d   : > { %v1217_v2 = vmul.f32 1.442695, %v1164_v16 }
 0x34f   : > { %5201 = vpow2.f32 %v1217_v2  ;;  %v1021_v24 = vpop.permute.xlu1 %1020  ;;  %v1026_v1 = vpop.permute.xlu0 %1025 }
 0x350   : > { %v1150_v55 = vsub.f32 %v6479_v4, %v1021_v24  ;;  %v1151_v38 = vsub.f32 %v6485_v6, %v1026_v1  ;;  %v1156_v6 = vsub.f32 %v6428_v51, %v6871_v45  ;;  %v1171_v45 = vsub.f32 %v6434_v53, %v6892_v19 }
 0x352   : > { %v1189_v22 = vmul.f32 1.442695, %v1150_v55  ;;  %v1031_v49 = vpop.permute.xlu2 %1030  ;;  %v1191_v25 = vmul.f32 1.442695, %v1151_v38  ;;  %v1157_v55 = vsub.f32 %v6436_v54, %v6921_v28  ;;  %v1231_v19 = vmul.f32 1.442695, %v1171_v45 }
 0x353   : > { %1466 = vmatmul.f32.gmra.mxu1 %v7016_v47  ;;  %v1152_v16 = vsub.f32 %v6491_v8, %v1031_v49  ;;  %v1201_v8 = vmul.f32 1.442695, %v1156_v6 }
 0x354   : > { %5203 = vpow2.f32 %v1189_v22  ;;  %v1203_v51 = vmul.f32 1.442695, %v1157_v55  ;;  %v9448_v55 = vld [vmem:[#allocation67_spill] sm:$0xff] }
 0x355   : > { %v7020_v58 = vpop.eup %5201  ;;  %5205 = vpow2.f32 %v1191_v25  ;;  %v1193_v2 = vmul.f32 1.442695, %v1152_v16  ;;  %v1172_v25 = vsub.f32 %v6442_v56, %v6944_v15  ;;  %v9446_v16 = vld [vmem:[#allocation66_spill] sm:$0xff]  ;;  %v9449_v15 = vld [vmem:[#allocation68_spill] sm:$0xff] }
 0x356   : > { %1511 = vmatmul.f32.vlgmr.msrb.gmra.mxu3 %v7020_v58 }
 0x357   : > { %v7023_v7 = vpop.permute.xlu1 %1579  ;;  %v7025_v43 = vpop.permute.xlu0 %1599  ;;  %5207 = vpow2.f32 %v1193_v2  ;;  %v9447_v2 = vld [vmem:[#allocation58_spill] sm:$0xff]  ;;  %v1233_v56 = vmul.f32 1.442695, %v1172_v25 }
 0x35a   : > { %v7027_v61 = vpop.eup %5203  ;;  %v7029_v4 = vpop.permute.xlu2 %1604 }
 0x35b   : > { %1469 = vmatmul.f32.gmra.mxu1 %v7027_v61  ;;  %v7038_v38 = vpop.eup %5205 }
 0x35f   : > { %v1096_v24 = vpop.permute.xlu1 %1095  ;;  %v1101_v1 = vpop.permute.xlu0 %1100 }
 0x360   : > { %v1165_v22 = vsub.f32 %v6493_v9, %v1096_v24  ;;  %v1166_v49 = vsub.f32 %v6499_v11, %v1101_v1  ;;  %v7050_v11 = vpop.eup %5207 }
 0x362   : > { %v1219_v17 = vmul.f32 1.442695, %v1165_v22  ;;  %v7040_v35 = vpop.permute.xlu2 %1619  ;;  %v1221_v54 = vmul.f32 1.442695, %v1166_v49 }
 0x363   : > { %1472 = vmatmul.f32.gmra.mxu1 %v7038_v38 }
 0x364   : > { %5209 = vpow2.f32 %v1219_v17  ;;  %v1158_v17 = vsub.f32 %v9447_v2, %v6873_v23 }
 0x365   : > { %5211 = vpow2.f32 %v1201_v8 }
 0x366   : > { %5213 = vpow2.f32 %v1203_v51  ;;  %v1205_v49 = vmul.f32 1.442695, %v1158_v17 }
 0x367   : > { %v1036_v28 = vpop.permute.xlu1 %1035  ;;  %1303 = vadd.xlane.f32.xlu0 %v6880_v5  ;;  %v1041_v9 = vpop.permute.xlu0 %1040  ;;  %5215 = vpow2.f32 %v1221_v54  ;;  %v9450_v54 = vld [vmem:[#allocation60_spill] sm:$0xff] }
 0x368   : > { %v1153_v6 = vsub.f32 %v9446_v16, %v1036_v28  ;;  %v1154_v5 = vsub.f32 %v9448_v55, %v1041_v9  ;;  %v1159_v9 = vsub.f32 %v9450_v54, %v6952_v41  ;;  %v9452_v41 = vld [vmem:[#allocation69_spill] sm:$0xff] }
 0x36a   : > { %v7054_v24 = vpop.eup %5209  ;;  %v1195_v1 = vmul.f32 1.442695, %v1153_v6  ;;  %v1106_v53 = vpop.permute.xlu2 %1105  ;;  %v1197_v51 = vmul.f32 1.442695, %v1154_v5  ;;  %v9451_v6 = vld [vmem:[#allocation59_spill] sm:$0xff] }
 0x36b   : > { %1475 = vmatmul.f32.gmra.mxu1 %v7050_v11  ;;  %1514 = vmatmul.f32.gmra.mxu3 %v7054_v24  ;;  %v1167_v22 = vsub.f32 %v9449_v15, %v1106_v53  ;;  %v7060_v8 = vpop.eup %5211  ;;  %v1173_v2 = vsub.f32 %v9451_v6, %v6894_v21  ;;  %v1207_v53 = vmul.f32 1.442695, %v1159_v9  ;;  %v9453_v21 = vld [vmem:[#allocation61_spill] sm:$0xff] }
 0x36c   : > { %5217 = vpow2.f32 %v1195_v1  ;;  %v7062_v23 = vpop.eup %5213  ;;  %v1160_v15 = vsub.f32 %v9453_v21, %v6971_v30 }
 0x36d   : > { %5219 = vpow2.f32 %v1231_v19  ;;  %v1223_v25 = vmul.f32 1.442695, %v1167_v22  ;;  %v7073_v16 = vpop.eup %5215 }
 0x36e   : > { %5221 = vpow2.f32 %v1233_v56 }
 0x36f   : > { %v7064_v28 = vpop.permute.xlu1 %1594  ;;  %1329 = vadd.xlane.f32.xlu0 %v7060_v8  ;;  %1331 = vadd.xlane.f32.xlu1 %v7062_v23  ;;  %v7068_v45 = vpop.permute.xlu0 %1614  ;;  %5223 = vpow2.f32 %v1205_v49 }
 0x370   : > { %1305 = vadd.xlane.f32.xlu2 %v6927_v44  ;;  %5225 = vpow2.f32 %v1197_v51  ;;  %v1235_v44 = vmul.f32 1.442695, %v1173_v2  ;;  %v9454_v51 = vld [vmem:[#allocation62_spill] sm:$0xff]  ;;  %v1209_v2 = vmul.f32 1.442695, %v1160_v15  ;;  %v9456_v15 = vld [vmem:[#allocation63_spill] sm:$0xff] }
 0x371   : > { %5227 = vpow2.f32 %v1223_v25  ;;  %v1174_v54 = vsub.f32 %v9454_v51, %v6978_v27  ;;  %v1161_v51 = vsub.f32 %v9456_v15, %v6958_v31  ;;  %v9458_v31 = vld [vmem:[#allocation65_spill] sm:$0xff] }
 0x372   : > { %v7077_v17 = vpop.eup %5217  ;;  %v1046_v1 = vpop.permute.xlu2 %1045  ;;  %5229 = vpow2.f32 %v1207_v53  ;;  %v1163_v15 = vsub.f32 %v9458_v31, %v7009_v60  ;;  %v1545_v60 = vld [vmem:[#allocation4 + $0xb0] sm:$0xff]  ;;  %v9462_v31 = vld [vmem:[#allocation78_spill] sm:$0xff] }
 0x373   : > { %1478 = vmatmul.f32.gmra.mxu1 %v7077_v17  ;;  %1517 = vmatmul.f32.gmra.mxu3 %v7073_v16  ;;  %v1155_v19 = vsub.f32 %v9452_v41, %v1046_v1  ;;  %v7082_v55 = vpop.eup %5219  ;;  %5231 = vpow2.f32 %v1235_v44  ;;  %v1237_v1 = vmul.f32 1.442695, %v1174_v54  ;;  %v9455_v44 = vld [vmem:[#allocation70_spill] sm:$0xff] }
 0x374   : > { %v7084_v5 = vpop.eup %5221 }
 0x375   : > { %v7086_v56 = vpop.eup %5223  ;;  %v1199_v9 = vmul.f32 1.442695, %v1155_v19 }
 0x376   : > { %v7099_v25 = vpop.eup %5225 }
 0x377   : > { %v7090_v22 = vpop.permute.xlu1 %1609  ;;  %1359 = vadd.xlane.f32.xlu0 %v7082_v55  ;;  %1361 = vadd.xlane.f32.xlu1 %v7084_v5  ;;  %v7094_v49 = vpop.permute.xlu0 %1629  ;;  %5233 = vpow2.f32 %v1199_v9 }
 0x378   : > { %1333 = vadd.xlane.f32.xlu2 %v7086_v56  ;;  %v7101_v6 = vpop.eup %5227  ;;  %5235 = vpow2.f32 %v1209_v2 }
 0x379   : > { %v7107_v53 = vpop.eup %5229  ;;  %5237 = vpow2.f32 %v1237_v1  ;;  %v9457_v1 = vld [vmem:[#allocation64_spill] sm:$0xff] }
 0x37a   : > { %v7103_v30 = vpop.permute.xlu2 %1634  ;;  %v7109_v27 = vpop.eup %5231 }
 0x37b   : > { %1481 = vmatmul.f32.gmra.mxu1 %v7099_v25  ;;  %1520 = vmatmul.f32.gmra.mxu3 %v7101_v6 }
 0x37d   : > { %v7119_v54 = vpop.eup %5233 }
 0x37e   : > { %v5236_v2 = vpop.eup %5235 }
 0x37f   : > { %v1111_v41 = vpop.permute.xlu1 %1110  ;;  %1335 = vadd.xlane.f32.xlu0 %v7107_v53  ;;  %1307 = vadd.xlane.f32.xlu1 %v6940_v0  ;;  %v7113_v19 = vpop.permute.xlu0 %1644  ;;  %v1211_v0 = vmul.f32 1.442695, %v1161_v51 }
 0x380   : > { %v1168_v21 = vsub.f32 %v9455_v44, %v1111_v41  ;;  %1363 = vadd.xlane.f32.xlu2 %v7109_v27  ;;  %v7124_v14 = vpop.eup %5237  ;;  %v1162_v41 = vsub.f32 %v9457_v1, %v7006_v59  ;;  %v1215_v59 = vmul.f32 1.442695, %v1163_v15  ;;  %v9460_v1 = vld [vmem:[#allocation72_spill] sm:$0xff] }
 0x382   : > { %v1225_v9 = vmul.f32 1.442695, %v1168_v21  ;;  %v7121_v37 = vpop.permute.xlu2 %1649  ;;  %v9459_v21 = vld [vmem:[#allocation71_spill] sm:$0xff]  ;;  %v1213_v26 = vmul.f32 1.442695, %v1162_v41 }
 0x383   : > { %1484 = vmatmul.f32.gmra.mxu1 %v7119_v54 }
 0x384   : > { %5239 = vpow2.f32 %v1225_v9 }
 0x385   : > { %5241 = vpow2.f32 %v1211_v0  ;;  %v1737_v0 = vmul.f32 %v7023_v7, %v1545_v60  ;;  %v1547_v7 = vld [vmem:[#allocation4 + $0xd8] sm:$0xff] }
 0x387   : > { %1365 = vadd.xlane.f32.xlu0 %v7124_v14  ;;  %1337 = vadd.xlane.f32.xlu1 %v5236_v2  ;;  %v1116_v44 = vpop.permute.xlu0 %1115 }
 0x388   : > { %v1169_v33 = vsub.f32 %v9459_v21, %v1116_v44  ;;  %1309 = vadd.xlane.f32.xlu2 %v6967_v62 }
 0x38a   : > { %v7133_v9 = vpop.eup %5239  ;;  %v1227_v51 = vmul.f32 1.442695, %v1169_v33  ;;  %v1121_v39 = vpop.permute.xlu2 %1120 }
 0x38b   : > { %1487 = vmatmul.f32.gmra.mxu1 %v7060_v8  ;;  %1523 = vmatmul.f32.gmra.mxu3 %v7133_v9  ;;  %v1170_v12 = vsub.f32 %v9460_v1, %v1121_v39  ;;  %v5242_v18 = vpop.eup %5241 }
 0x38c   : > { %5243 = vpow2.f32 %v1227_v51 }
 0x38d   : > { %5245 = vpow2.f32 %v1213_v26  ;;  %v1229_v62 = vmul.f32 1.442695, %v1170_v12  ;;  %v7144_v12 = vpop.permute.xlu1 %1624 }
 0x38e   : > { %5247 = vpow2.f32 %v1215_v59 }
 0x38f   : > { %1311 = vadd.xlane.f32.xlu0 %v6987_v50  ;;  %1313 = vadd.xlane.f32.xlu1 %v7011_v63  ;;  %5249 = vpow2.f32 %v1229_v62  ;;  %v1546_v50 = vld [vmem:[#allocation4] sm:$0xff] }
 0x390   : > { %1339 = vadd.xlane.f32.xlu2 %v5242_v18  ;;  %v1738_v63 = vmul.f32 %v6998_v20, %v1546_v50 }
 0x392   : > { %v5244_v33 = vpop.eup %5243 }
 0x393   : > { %v1449_v8 = vpop.f32.mrf.mxu0  ;;  %1490 = vmatmul.f32.gmra.mxu1 %v7062_v23  ;;  %1526 = vmatmul.f32.gmra.mxu3 %v5244_v33  ;;  %v5246_v39 = vpop.eup %5245 }
 0x394   : > { %v1769_v41 = vadd.f32 %v1737_v0, %v1449_v8  ;;  %v5248_v44 = vpop.eup %5247 }
 0x395   : > { %v5250_v26 = vpop.eup %5249 }
 0x396   : > { %1801 = vst [vmem:[#allocation4 + $0xb0] sm:$0xff] %v1769_v41  ;;  %v1551_v41 = vld [vmem:[#allocation4 + $0x30] sm:$0xff] }
 0x397   : > { %1341 = vadd.xlane.f32.xlu0 %v5246_v39  ;;  %1343 = vadd.xlane.f32.xlu1 %v5248_v44 }
 0x398   : > { %1315 = vadd.xlane.f32.xlu2 %v7016_v47 }
 0x39b   : > { %1493 = vmatmul.f32.gmra.mxu1 %v7086_v56  ;;  %1529 = vmatmul.f32.gmra.mxu3 %v5250_v26  ;;  %v7154_v56 = vpop.permute.xlu1 %1654 }
 0x39f   : > { %1317 = vadd.xlane.f32.xlu0 %v7027_v61  ;;  %1319 = vadd.xlane.f32.xlu1 %v7038_v38  ;;  %v7158_v61 = vpop.permute.xlu0 %1659 }
 0x3a0   : > { %1345 = vadd.xlane.f32.xlu2 %v7020_v58  ;;  %v1739_v58 = vmul.f32 %v6994_v57, %v1547_v7 }
 0x3a3   : > { %1496 = vmatmul.f32.gmra.mxu1 %v7107_v53  ;;  %1532 = vmatmul.f32.gmra.mxu3 %v7082_v55  ;;  %v1548_v55 = vld [vmem:[#allocation4 + $0x18] sm:$0xff]  ;;  %v1549_v53 = vld [vmem:[#allocation4 + $0x50] sm:$0xff] }
 0x3a6   : > { %v1452_v47 = vpop.f32.mrf.mxu0 }
 0x3a7   : > { %v1770_v23 = vadd.f32 %v1738_v63, %v1452_v47  ;;  %1347 = vadd.xlane.f32.xlu0 %v7054_v24  ;;  %1349 = vadd.xlane.f32.xlu1 %v7073_v16  ;;  %v7165_v24 = vpop.permute.xlu1 %1639  ;;  %v7168_v16 = vpop.permute.xlu0 %1674 }
 0x3a8   : > { %1321 = vadd.xlane.f32.xlu2 %v7050_v11  ;;  %v1740_v11 = vmul.f32 %v7064_v28, %v1548_v55  ;;  %v1566_v55 = vld [vmem:[#allocation4 + $0x90] sm:$0xff] }
 0x3a9   : > { %1802 = vst [vmem:[#allocation4] sm:$0xff] %v1770_v23 }
 0x3ab   : > { %v1455_v38 = vpop.f32.mrf.mxu1  ;;  %1499 = vmatmul.f32.gmra.mxu1 %v5236_v2  ;;  %1535 = vmatmul.f32.gmra.mxu3 %v7084_v5  ;;  %v9461_v2 = vld [vmem:[#allocation77_spill] sm:$0xff] }
 0x3ac   : > { %v1771_v20 = vadd.f32 %v1739_v58, %v1455_v38  ;;  %v9463_v15 = vsub.f32 %v9461_v2, %v9462_v31 }
 0x3ae   : > { %1803 = vst [vmem:[#allocation4 + $0xd8] sm:$0xff] %v1771_v20  ;;  %v981_v21 = vmul.f32 1.442695, %v9463_v15  ;;  %v1552_v20 = vld [vmem:[#allocation4 + $0x48] sm:$0xff] }
 0x3af   : > { %1323 = vadd.xlane.f32.xlu0 %v7077_v17  ;;  %1325 = vadd.xlane.f32.xlu1 %v7099_v25  ;;  %v1741_v17 = vmul.f32 %v7025_v43, %v1549_v53  ;;  %v7174_v28 = vpop.permute.xlu1 %1669  ;;  %v1550_v43 = vld [vmem:[#allocation4 + $0x68] sm:$0xff] }
 0x3b0   : > { %1351 = vadd.xlane.f32.xlu2 %v7101_v6  ;;  %v7176_v6 = vpop.permute.xlu2 %1664  ;;  %5251 = vpow2.f32 %v981_v21  ;;  %v1742_v1 = vmul.f32 %v7029_v4, %v1550_v43  ;;  %v1743_v4 = vmul.f32 %v7090_v22, %v1551_v41 }
 0x3b3   : > { %v1458_v57 = vpop.f32.mrf.mxu1  ;;  %1502 = vmatmul.f32.gmra.mxu1 %v5242_v18  ;;  %1538 = vmatmul.f32.gmra.mxu3 %v7109_v27  ;;  %v7178_v27 = vpop.permute.xlu0 %1689 }
 0x3b4   : > { %v1772_v5 = vadd.f32 %v1740_v11, %v1458_v57  ;;  %v1239_v11 = vld [vmem:[#allocation3] sm:$0xff] }
 0x3b6   : > { %1804 = vst [vmem:[#allocation4 + $0x18] sm:$0xff] %v1772_v5  ;;  %v7191_v8 = vpop.eup %5251  ;;  %v1744_v5 = vmul.f32 %v7068_v45, %v1552_v20  ;;  %v1253_v45 = vld [vmem:[#allocation3 + $0x70] sm:$0xff]  ;;  %v1554_v20 = vld [vmem:[#allocation4 + $0x88] sm:$0xff] }
 0x3b7   : > { %1353 = vadd.xlane.f32.xlu0 %v7133_v9  ;;  %1355 = vadd.xlane.f32.xlu1 %v5244_v33  ;;  %v9465_v9 = vld [vmem:[#allocation76_spill] sm:$0xff]  ;;  %v1685_v59 = vpop.permute.xlu1 %1684 }
 0x3b8   : > { %1327 = vadd.xlane.f32.xlu2 %v7119_v54  ;;  %v9464_v54 = vld [vmem:[#allocation75_spill] sm:$0xff]  ;;  %v7187_v60 = vpop.permute.xlu2 %1679  ;;  %v1758_v53 = vmul.f32 %v1685_v59, %v1566_v55 }
 0x3b9   : > { %v9466_v51 = vsub.f32 %v9464_v54, %v9465_v9  ;;  %v1553_v9 = vld [vmem:[#allocation4 + $0x80] sm:$0xff]  ;;  %v1240_v59 = vld [vmem:[#allocation3 + $0x8] sm:$0xff] }
 0x3bb   : > { %v1461_v25 = vpop.f32.mrf.mxu1  ;;  %1505 = vmatmul.f32.gmra.mxu1 %v5246_v39  ;;  %1541 = vmatmul.f32.gmra.mxu3 %v7124_v14  ;;  %v979_v14 = vmul.f32 1.442695, %v9466_v51  ;;  %v7189_v62 = vpop.permute.xlu0 %1704  ;;  %v9467_v39 = vld [vmem:[#allocation73_spill] sm:$0xff]  ;;  %v1252_v51 = vld [vmem:[#allocation3 + $0x68] sm:$0xff] }
 0x3bc   : > { %v1773_v18 = vadd.f32 %v1741_v17, %v1461_v25  ;;  %v1284_v41 = vmul.f32 %v6859_v32, %v1252_v51  ;;  %v1254_v32 = vld [vmem:[#allocation3 + $0x78] sm:$0xff] }
 0x3bd   : > { %5253 = vpow2.f32 %v979_v14  ;;  %v1745_v14 = vmul.f32 %v7040_v35, %v1553_v9  ;;  %v1268_v35 = vld [vmem:[#allocation3 + $0xe8] sm:$0xff] }
 0x3be   : > { %1805 = vst [vmem:[#allocation4 + $0x50] sm:$0xff] %v1773_v18  ;;  %v9470_v18 = vld [vmem:[#allocation81_spill] sm:$0xff] }
 0x3bf   : > { %v7200_v47 = vpop.permute.xlu1 %1699  ;;  %v1271_v2 = vmul.f32 %v9470_v18, %v1239_v11  ;;  %v1267_v11 = vld [vmem:[#allocation3 + $0xe0] sm:$0xff] }
 0x3c0   : > { %1357 = vadd.xlane.f32.xlu2 %v5250_v26  ;;  %v7203_v23 = vpop.permute.xlu2 %1694 }
 0x3c3   : > { %1508 = vmatmul.f32.gmra.mxu1 %v5248_v44  ;;  %v9468_v44 = vld [vmem:[#allocation74_spill] sm:$0xff]  ;;  %v7197_v63 = vpop.eup %5253  ;;  %v7205_v38 = vpop.permute.xlu0 %1719 }
 0x3c4   : > { %v9469_v26 = vsub.f32 %v9467_v39, %v9468_v44 }
 0x3c6   : > { %v977_v50 = vmul.f32 1.442695, %v9469_v26  ;;  %v9471_v26 = vld [vmem:[#allocation80_spill] sm:$0xff] }
 0x3c7   : > { %v7209_v31 = vpop.permute.xlu1 %1714 }
 0x3c8   : > { %v1464_v33 = vpop.f32.mrf.mxu1  ;;  %5255 = vpow2.f32 %v977_v50  ;;  %v7211_v43 = vpop.permute.xlu2 %1709  ;;  %v1272_v50 = vmul.f32 %v9471_v26, %v1240_v59 }
 0x3c9   : > { %v1774_v0 = vadd.f32 %v1742_v1, %v1464_v33 }
 0x3cb   : > { %1806 = vst [vmem:[#allocation4 + $0x68] sm:$0xff] %v1774_v0  ;;  %1734 = vperm.xlu0 %5128, %v7191_v8   ;;  %v1285_v0 = vmul.f32 %v6902_v46, %v1253_v45  ;;  %v1746_v46 = vmul.f32 %v7144_v12, %v1554_v20  ;;  %v1555_v45 = vld [vmem:[#allocation4 + $0xe8] sm:$0xff]  ;;  %v1556_v20 = vld [vmem:[#allocation4 + $0xb8] sm:$0xff] }
 0x3cc   : > { %v1747_v59 = vmul.f32 %v7094_v49, %v1555_v45 }
 0x3ce   : > { %v5256_v57 = vpop.eup %5255 }
 0x3d0   : > { %v1467_v7 = vpop.f32.mrf.mxu1  ;;  %1729 = vperm.xlu1 %5127, %v7197_v63  }
 0x3d1   : > { %v1775_v58 = vadd.f32 %v1743_v4, %v1467_v7 }
 0x3d3   : > { %1807 = vst [vmem:[#allocation4 + $0x30] sm:$0xff] %v1775_v58 }
 0x3d8   : > { %v1470_v22 = vpop.f32.mrf.mxu1  ;;  %1724 = vperm.xlu2 %5126, %v5256_v57  }
 0x3d9   : > { %v1776_v17 = vadd.f32 %v1744_v5, %v1470_v22  ;;  %v1512_v25 = vpop.f32.mrf.mxu3  ;;  %v1300_v22 = vmul.f32 %v5256_v57, %v1268_v35 }
 0x3da   : > { %v1790_v15 = vadd.f32 %v1758_v53, %v1512_v25  ;;  %v1304_v21 = vpop.xlane.xlu0 %1303  ;;  %v1567_v25 = vld [vmem:[#allocation4 + $0x70] sm:$0xff] }
 0x3db   : > { %1808 = vst [vmem:[#allocation4 + $0x48] sm:$0xff] %v1776_v17  ;;  %v1367_v54 = vadd.f32 %v1304_v21, %v1271_v2  ;;  %v1299_v17 = vmul.f32 %v6983_v48, %v1267_v11  ;;  %v1759_v12 = vmul.f32 %v7178_v27, %v1567_v25  ;;  %v1255_v48 = vld [vmem:[#allocation3 + $0x80] sm:$0xff]  ;;  %v1569_v25 = vld [vmem:[#allocation4 + $0xa8] sm:$0xff] }
 0x3dc   : > { %1822 = vst [vmem:[#allocation4 + $0x90] sm:$0xff] %v1790_v15  ;;  %v1286_v15 = vmul.f32 %v6896_v13, %v1254_v32  ;;  %v1287_v27 = vmul.f32 %v6898_v3, %v1255_v48  ;;  %v1270_v3 = vld [vmem:[#allocation3 + $0xf8] sm:$0xff]  ;;  %v1748_v32 = vmul.f32 %v7103_v30, %v1556_v20 }
 0x3dd   : > { %1400 = vst.msk [vmem:[#allocation3] sm:$0xff] %vm1399_vm1, %v1367_v54 }
 0x3e0   : > { %v1473_v1 = vpop.f32.mrf.mxu1 }
 0x3e1   : > { %v1777_v33 = vadd.f32 %v1745_v14, %v1473_v1  ;;  %v1241_v14 = vld [vmem:[#allocation3 + $0x10] sm:$0xff] }
 0x3e2   : > { %v1332_v39 = vpop.xlane.xlu1 %1331  ;;  %v1330_v44 = vpop.xlane.xlu0 %1329  ;;  %v1269_v1 = vld [vmem:[#allocation3 + $0xf0] sm:$0xff] }
 0x3e3   : > { %1809 = vst [vmem:[#allocation4 + $0x80] sm:$0xff] %v1777_v33  ;;  %v1381_v4 = vadd.f32 %v1332_v39, %v1285_v0  ;;  %v1380_v7 = vadd.f32 %v1330_v44, %v1284_v41  ;;  %v1306_v58 = vpop.xlane.xlu2 %1305  ;;  %v9472_v41 = vld [vmem:[#allocation79_spill] sm:$0xff]  ;;  %v1568_v44 = vld [vmem:[#allocation4 + $0xc0] sm:$0xff] }
 0x3e4   : > { %v1368_v55 = vadd.f32 %v1306_v58, %v1272_v50  ;;  %v1273_v39 = vmul.f32 %v9472_v41, %v1241_v14  ;;  %v1760_v35 = vmul.f32 %v7203_v23, %v1568_v44  ;;  %v1302_v23 = vmul.f32 %v7191_v8, %v1270_v3  ;;  %v1243_v8 = vld [vmem:[#allocation3 + $0x20] sm:$0xff]  ;;  %v1257_v14 = vld [vmem:[#allocation3 + $0x90] sm:$0xff] }
 0x3e5   : > { %1414 = vst.msk [vmem:[#allocation3 + $0x70] sm:$0xff] %vm1399_vm1, %v1381_v4  ;;  %v1301_v4 = vmul.f32 %v7197_v63, %v1269_v1 }
 0x3e6   : > { %1413 = vst.msk [vmem:[#allocation3 + $0x68] sm:$0xff] %vm1399_vm1, %v1380_v7 }
 0x3e7   : > { %1401 = vst.msk [vmem:[#allocation3 + $0x8] sm:$0xff] %vm1399_vm1, %v1368_v55 }
 0x3e8   : > { %v1476_v5 = vpop.f32.mrf.mxu1 }
 0x3e9   : > { %v1778_v53 = vadd.f32 %v1746_v46, %v1476_v5  ;;  %v1256_v46 = vld [vmem:[#allocation3 + $0x88] sm:$0xff]  ;;  %v1242_v5 = vld [vmem:[#allocation3 + $0x18] sm:$0xff] }
 0x3ea   : > { %v1362_v18 = vpop.xlane.xlu1 %1361  ;;  %v1360_v2 = vpop.xlane.xlu0 %1359 }
 0x3eb   : > { %1810 = vst [vmem:[#allocation4 + $0x88] sm:$0xff] %v1778_v53  ;;  %v1396_v21 = vadd.f32 %v1362_v18, %v1300_v22  ;;  %v1395_v54 = vadd.f32 %v1360_v2, %v1299_v17  ;;  %v1334_v9 = vpop.xlane.xlu2 %1333  ;;  %v1288_v17 = vmul.f32 %v6946_v29, %v1256_v46 }
 0x3ec   : > { %v1382_v51 = vadd.f32 %v1334_v9, %v1286_v15  ;;  %v1274_v15 = vmul.f32 %v6816_v42, %v1242_v5  ;;  %v1557_v9 = vld [vmem:[#allocation4 + $0x60] sm:$0xff] }
 0x3ed   : > { %1429 = vst.msk [vmem:[#allocation3 + $0xe8] sm:$0xff] %vm1399_vm1, %v1396_v21 }
 0x3ee   : > { %1428 = vst.msk [vmem:[#allocation3 + $0xe0] sm:$0xff] %vm1399_vm1, %v1395_v54  ;;  %v1515_v57 = vpop.f32.mrf.mxu3 }
 0x3ef   : > { %1415 = vst.msk [vmem:[#allocation3 + $0x78] sm:$0xff] %vm1399_vm1, %v1382_v51  ;;  %v1791_v13 = vadd.f32 %v1759_v12, %v1515_v57  ;;  %v1761_v51 = vmul.f32 %v7200_v47, %v1569_v25  ;;  %v1244_v12 = vld [vmem:[#allocation3 + $0x28] sm:$0xff]  ;;  %v1749_v57 = vmul.f32 %v7165_v24, %v1557_v9  ;;  %v1558_v24 = vld [vmem:[#allocation4 + $0xf0] sm:$0xff] }
 0x3f0   : > { %v1479_v33 = vpop.f32.mrf.mxu1  ;;  %v1571_v9 = vld [vmem:[#allocation4 + $0x10] sm:$0xff] }
 0x3f1   : > { %1823 = vst [vmem:[#allocation4 + $0x70] sm:$0xff] %v1791_v13  ;;  %v1779_v0 = vadd.f32 %v1747_v59, %v1479_v33  ;;  %v9473_v13 = vld [vmem:[#allocation83_spill] sm:$0xff]  ;;  %v9474_v33 = vld [vmem:[#allocation82_spill] sm:$0xff] }
 0x3f2   : > { %v1308_v26 = vpop.xlane.xlu1 %1307  ;;  %v1336_v50 = vpop.xlane.xlu0 %1335  ;;  %v1276_v1 = vmul.f32 %v9473_v13, %v1244_v12  ;;  %v1275_v47 = vmul.f32 %v9474_v33, %v1243_v8  ;;  %v1261_v13 = vld [vmem:[#allocation3 + $0xb0] sm:$0xff]  ;;  %v1248_v33 = vld [vmem:[#allocation3 + $0x48] sm:$0xff] }
 0x3f3   : > { %1811 = vst [vmem:[#allocation4 + $0xe8] sm:$0xff] %v1779_v0  ;;  %v1369_v7 = vadd.f32 %v1308_v26, %v1273_v39  ;;  %v1383_v58 = vadd.f32 %v1336_v50, %v1287_v27  ;;  %v1364_v49 = vpop.xlane.xlu2 %1363  ;;  %v1289_v39 = vmul.f32 %v6933_v40, %v1257_v14  ;;  %v1763_v14 = vmul.f32 %v7211_v43, %v1571_v9 }
 0x3f4   : > { %v1397_v55 = vadd.f32 %v1364_v49, %v1301_v4  ;;  %v1259_v4 = vld [vmem:[#allocation3 + $0xa0] sm:$0xff]  ;;  %v1245_v49 = vld [vmem:[#allocation3 + $0x30] sm:$0xff] }
 0x3f5   : > { %1402 = vst.msk [vmem:[#allocation3 + $0x10] sm:$0xff] %vm1399_vm1, %v1369_v7  ;;  %v1258_v7 = vld [vmem:[#allocation3 + $0x98] sm:$0xff]  ;;  %v1291_v40 = vmul.f32 %v6973_v34, %v1259_v4 }
 0x3f6   : > { %1416 = vst.msk [vmem:[#allocation3 + $0x80] sm:$0xff] %vm1399_vm1, %v1383_v58  ;;  %v1518_v11 = vpop.f32.mrf.mxu3  ;;  %v1750_v58 = vmul.f32 %v7113_v19, %v1558_v24 }
 0x3f7   : > { %1430 = vst.msk [vmem:[#allocation3 + $0xf0] sm:$0xff] %vm1399_vm1, %v1397_v55  ;;  %v1792_v63 = vadd.f32 %v1760_v35, %v1518_v11  ;;  %v1290_v35 = vmul.f32 %v6911_v36, %v1258_v7  ;;  %v1570_v11 = vld [vmem:[#allocation4 + $0xd0] sm:$0xff]  ;;  %v1246_v36 = vld [vmem:[#allocation3 + $0x38] sm:$0xff] }
 0x3f8   : > { %v1482_v53 = vpop.f32.mrf.mxu1 }
 0x3f9   : > { %1824 = vst [vmem:[#allocation4 + $0xc0] sm:$0xff] %v1792_v63  ;;  %v1780_v22 = vadd.f32 %v1748_v32, %v1482_v53  ;;  %v1277_v32 = vmul.f32 %v6837_v10, %v1245_v49  ;;  %v1561_v49 = vld [vmem:[#allocation4 + $0x38] sm:$0xff] }
 0x3fa   : > { %v1338_v18 = vpop.xlane.xlu1 %1337  ;;  %v1366_v2 = vpop.xlane.xlu0 %1365 }
 0x3fb   : > { %1812 = vst [vmem:[#allocation4 + $0xb8] sm:$0xff] %v1780_v22  ;;  %v1384_v21 = vadd.f32 %v1338_v18, %v1288_v17  ;;  %v1398_v54 = vadd.f32 %v1366_v2, %v1302_v23  ;;  %v1310_v30 = vpop.xlane.xlu2 %1309  ;;  %v1559_v22 = vld [vmem:[#allocation4 + $0x8] sm:$0xff]  ;;  %v1762_v17 = vmul.f32 %v7189_v62, %v1570_v11  ;;  %v1247_v23 = vld [vmem:[#allocation3 + $0x40] sm:$0xff]  ;;  %v1249_v11 = vld [vmem:[#allocation3 + $0x50] sm:$0xff] }
 0x3fc   : > { %v1370_v45 = vadd.f32 %v1310_v30, %v1274_v15  ;;  %v1751_v25 = vmul.f32 %v7121_v37, %v1559_v22  ;;  %v1260_v18 = vld [vmem:[#allocation3 + $0xa8] sm:$0xff]  ;;  %v9476_v30 = vld [vmem:[#allocation84_spill] sm:$0xff] }
 0x3fd   : > { %1417 = vst.msk [vmem:[#allocation3 + $0x88] sm:$0xff] %vm1399_vm1, %v1384_v21  ;;  %v9475_v21 = vld [vmem:[#allocation85_spill] sm:$0xff]  ;;  %v1278_v62 = vmul.f32 %v9476_v30, %v1246_v36  ;;  %v9482_v36 = vld [vmem:[#allocation92_spill] sm:$0xff] }
 0x3fe   : > { %1431 = vst.msk [vmem:[#allocation3 + $0xf8] sm:$0xff] %vm1399_vm1, %v1398_v54  ;;  %v1521_v29 = vpop.f32.mrf.mxu3  ;;  %v1279_v54 = vmul.f32 %v9475_v21, %v1247_v23  ;;  %v1265_v30 = vld [vmem:[#allocation3 + $0xd0] sm:$0xff] }
 0x3ff   : > { %1403 = vst.msk [vmem:[#allocation3 + $0x18] sm:$0xff] %vm1399_vm1, %v1370_v45  ;;  %v1793_v42 = vadd.f32 %v1761_v51, %v1521_v29  ;;  %v1292_v29 = vmul.f32 %v6960_v52, %v1260_v18 }
 0x400   : > { %v1485_v48 = vpop.f32.mrf.mxu1 }
 0x401   : > { %1825 = vst [vmem:[#allocation4 + $0xa8] sm:$0xff] %v1793_v42  ;;  %v1781_v59 = vadd.f32 %v1749_v57, %v1485_v48  ;;  %v1560_v57 = vld [vmem:[#allocation4 + $0x78] sm:$0xff] }
 0x402   : > { %v1314_v0 = vpop.xlane.xlu1 %1313  ;;  %v1312_v41 = vpop.xlane.xlu0 %1311 }
 0x403   : > { %1813 = vst [vmem:[#allocation4 + $0x60] sm:$0xff] %v1781_v59  ;;  %v1372_v27 = vadd.f32 %v1314_v0, %v1276_v1  ;;  %v1371_v44 = vadd.f32 %v1312_v41, %v1275_v47  ;;  %v1340_v26 = vpop.xlane.xlu2 %1339  ;;  %v1262_v59 = vld [vmem:[#allocation3 + $0xb8] sm:$0xff]  ;;  %v1752_v1 = vmul.f32 %v7154_v56, %v1560_v57  ;;  %v9484_v57 = vld [vmem:[#allocation91_spill] sm:$0xff] }
 0x404   : > { %v1385_v50 = vadd.f32 %v1340_v26, %v1289_v39  ;;  %v9477_v41 = vld [vmem:[#allocation93_spill] sm:$0xff] }
 0x405   : > { %1405 = vst.msk [vmem:[#allocation3 + $0x28] sm:$0xff] %vm1399_vm1, %v1372_v27  ;;  %v1294_v39 = vmul.f32 %v9477_v41, %v1262_v59  ;;  %v9478_v27 = vld [vmem:[#allocation90_spill] sm:$0xff]  ;;  %v1266_v41 = vld [vmem:[#allocation3 + $0xd8] sm:$0xff] }
 0x406   : > { %1404 = vst.msk [vmem:[#allocation3 + $0x20] sm:$0xff] %vm1399_vm1, %v1371_v44  ;;  %v1293_v43 = vmul.f32 %v9478_v27, %v1261_v13  ;;  %v1572_v44 = vld [vmem:[#allocation4 + $0x28] sm:$0xff] }
 0x407   : > { %1418 = vst.msk [vmem:[#allocation3 + $0x90] sm:$0xff] %vm1399_vm1, %v1385_v50  ;;  %v9479_v50 = vld [vmem:[#allocation87_spill] sm:$0xff] }
 0x408   : > { %v1488_v20 = vpop.f32.mrf.mxu1  ;;  %v1280_v4 = vmul.f32 %v9479_v50, %v1248_v33 }
 0x409   : > { %v1782_v55 = vadd.f32 %v1750_v58, %v1488_v20 }
 0x40a   : > { %v1344_v46 = vpop.xlane.xlu1 %1343  ;;  %v1342_v3 = vpop.xlane.xlu0 %1341 }
 0x40b   : > { %1814 = vst [vmem:[#allocation4 + $0xf0] sm:$0xff] %v1782_v55  ;;  %v1387_v63 = vadd.f32 %v1344_v46, %v1291_v40  ;;  %v1386_v5 = vadd.f32 %v1342_v3, %v1290_v35  ;;  %v1316_v53 = vpop.xlane.xlu2 %1315  ;;  %v1764_v55 = vmul.f32 %v7209_v31, %v1572_v44  ;;  %v1250_v35 = vld [vmem:[#allocation3 + $0x58] sm:$0xff]  ;;  %v1753_v46 = vmul.f32 %v7158_v61, %v1561_v49 }
 0x40c   : > { %v1373_v19 = vadd.f32 %v1316_v53, %v1277_v32  ;;  %v1263_v32 = vld [vmem:[#allocation3 + $0xc0] sm:$0xff]  ;;  %v9480_v53 = vld [vmem:[#allocation88_spill] sm:$0xff]  ;;  %v1574_v49 = vld [vmem:[#allocation4 + $0xf8] sm:$0xff] }
 0x40d   : > { %1420 = vst.msk [vmem:[#allocation3 + $0xa0] sm:$0xff] %vm1399_vm1, %v1387_v63  ;;  %v1282_v22 = vmul.f32 %v9480_v53, %v1250_v35  ;;  %v1575_v53 = vld [vmem:[#allocation4 + $0x20] sm:$0xff] }
 0x40e   : > { %1419 = vst.msk [vmem:[#allocation3 + $0x98] sm:$0xff] %vm1399_vm1, %v1386_v5  ;;  %v1524_v34 = vpop.f32.mrf.mxu3 }
 0x40f   : > { %1406 = vst.msk [vmem:[#allocation3 + $0x30] sm:$0xff] %vm1399_vm1, %v1373_v19  ;;  %v1794_v10 = vadd.f32 %v1762_v17, %v1524_v34  ;;  %v9481_v19 = vld [vmem:[#allocation86_spill] sm:$0xff] }
 0x410   : > { %v1491_v2 = vpop.f32.mrf.mxu1  ;;  %v1281_v31 = vmul.f32 %v9481_v19, %v1249_v11  ;;  %v1573_v17 = vld [vmem:[#allocation4 + $0xa0] sm:$0xff] }
 0x411   : > { %1826 = vst [vmem:[#allocation4 + $0xd0] sm:$0xff] %v1794_v10  ;;  %v1783_v15 = vadd.f32 %v1751_v25, %v1491_v2  ;;  %v1295_v25 = vmul.f32 %v9482_v36, %v1263_v32  ;;  %v1562_v2 = vld [vmem:[#allocation4 + $0x58] sm:$0xff]  ;;  %v1765_v21 = vmul.f32 %v7205_v38, %v1573_v17 }
 0x412   : > { %v1320_v45 = vpop.xlane.xlu1 %1319  ;;  %v1318_v51 = vpop.xlane.xlu0 %1317  ;;  %v1754_v9 = vmul.f32 %v7176_v6, %v1562_v2  ;;  %v1563_v6 = vld [vmem:[#allocation4 + $0x40] sm:$0xff] }
 0x413   : > { %1815 = vst [vmem:[#allocation4 + $0x8] sm:$0xff] %v1783_v15  ;;  %v1375_v12 = vadd.f32 %v1320_v45, %v1279_v54  ;;  %v1374_v8 = vadd.f32 %v1318_v51, %v1278_v62  ;;  %v1346_v37 = vpop.xlane.xlu2 %1345  ;;  %v1264_v62 = vld [vmem:[#allocation3 + $0xc8] sm:$0xff]  ;;  %v1251_v51 = vld [vmem:[#allocation3 + $0x60] sm:$0xff] }
 0x414   : > { %v1388_v42 = vadd.f32 %v1346_v37, %v1292_v29  ;;  %v1296_v38 = vmul.f32 %v9484_v57, %v1264_v62 }
 0x415   : > { %1408 = vst.msk [vmem:[#allocation3 + $0x40] sm:$0xff] %vm1399_vm1, %v1375_v12 }
 0x416   : > { %1407 = vst.msk [vmem:[#allocation3 + $0x38] sm:$0xff] %vm1399_vm1, %v1374_v8  ;;  %v1527_v48 = vpop.f32.mrf.mxu3  ;;  %v9483_v8 = vld [vmem:[#allocation95_spill] sm:$0xff] }
 0x417   : > { %1421 = vst.msk [vmem:[#allocation3 + $0xa8] sm:$0xff] %vm1399_vm1, %v1388_v42  ;;  %v1795_v52 = vadd.f32 %v1763_v14, %v1527_v48  ;;  %v1297_v37 = vmul.f32 %v9483_v8, %v1265_v30  ;;  %v9485_v48 = vld [vmem:[#allocation89_spill] sm:$0xff] }
 0x418   : > { %v1494_v47 = vpop.f32.mrf.mxu1  ;;  %v1283_v59 = vmul.f32 %v9485_v48, %v1251_v51 }
 0x419   : > { %1827 = vst [vmem:[#allocation4 + $0x10] sm:$0xff] %v1795_v52  ;;  %v1784_v0 = vadd.f32 %v1752_v1, %v1494_v47 }
 0x41a   : > { %v1350_v26 = vpop.xlane.xlu1 %1349  ;;  %v1348_v24 = vpop.xlane.xlu0 %1347 }
 0x41b   : > { %1816 = vst [vmem:[#allocation4 + $0x78] sm:$0xff] %v1784_v0  ;;  %v1390_v7 = vadd.f32 %v1350_v26, %v1294_v39  ;;  %v1389_v58 = vadd.f32 %v1348_v24, %v1293_v43  ;;  %v1322_v56 = vpop.xlane.xlu2 %1321  ;;  %v1755_v0 = vmul.f32 %v7174_v28, %v1563_v6  ;;  %v9486_v43 = vld [vmem:[#allocation94_spill] sm:$0xff]  ;;  %v1564_v24 = vld [vmem:[#allocation4 + $0xc8] sm:$0xff] }
 0x41c   : > { %v1376_v20 = vadd.f32 %v1322_v56, %v1280_v4  ;;  %v1298_v44 = vmul.f32 %v9486_v43, %v1266_v41 }
 0x41d   : > { %1423 = vst.msk [vmem:[#allocation3 + $0xb8] sm:$0xff] %vm1399_vm1, %v1390_v7  ;;  %v1756_v7 = vmul.f32 %v7168_v16, %v1564_v24 }
 0x41e   : > { %1422 = vst.msk [vmem:[#allocation3 + $0xb0] sm:$0xff] %vm1399_vm1, %v1389_v58  ;;  %v1530_v40 = vpop.f32.mrf.mxu3 }
 0x41f   : > { %1409 = vst.msk [vmem:[#allocation3 + $0x48] sm:$0xff] %vm1399_vm1, %v1376_v20  ;;  %v1796_v3 = vadd.f32 %v1764_v55, %v1530_v40  ;;  %v1576_v20 = vld [vmem:[#allocation4 + $0x98] sm:$0xff]  ;;  %v1565_v55 = vld [vmem:[#allocation4 + $0xe0] sm:$0xff] }
 0x420   : > { %v1497_v63 = vpop.f32.mrf.mxu1  ;;  %v1757_v32 = vmul.f32 %v7187_v60, %v1565_v55 }
 0x421   : > { %1828 = vst [vmem:[#allocation4 + $0x28] sm:$0xff] %v1796_v3  ;;  %v1785_v5 = vadd.f32 %v1753_v46, %v1497_v63 }
 0x422   : > { %v1326_v34 = vpop.xlane.xlu1 %1325  ;;  %v1324_v23 = vpop.xlane.xlu0 %1323 }
 0x423   : > { %1817 = vst [vmem:[#allocation4 + $0x38] sm:$0xff] %v1785_v5  ;;  %v1378_v10 = vadd.f32 %v1326_v34, %v1282_v22  ;;  %v1377_v18 = vadd.f32 %v1324_v23, %v1281_v31  ;;  %v1352_v61 = vpop.xlane.xlu2 %1351 }
 0x424   : > { %v1391_v15 = vadd.f32 %v1352_v61, %v1295_v25 }
 0x425   : > { %1411 = vst.msk [vmem:[#allocation3 + $0x58] sm:$0xff] %vm1399_vm1, %v1378_v10 }
 0x426   : > { %1410 = vst.msk [vmem:[#allocation3 + $0x50] sm:$0xff] %vm1399_vm1, %v1377_v18  ;;  %v1533_v54 = vpop.f32.mrf.mxu3 }
 0x427   : > { %1424 = vst.msk [vmem:[#allocation3 + $0xc0] sm:$0xff] %vm1399_vm1, %v1391_v15  ;;  %v1797_v45 = vadd.f32 %v1765_v21, %v1533_v54 }
 0x428   : > { %v1500_v29 = vpop.f32.mrf.mxu1 }
 0x429   : > { %1829 = vst [vmem:[#allocation4 + $0xa0] sm:$0xff] %v1797_v45  ;;  %v1786_v12 = vadd.f32 %v1754_v9, %v1500_v29 }
 0x42a   : > { %v1356_v42 = vpop.xlane.xlu1 %1355  ;;  %v1354_v14 = vpop.xlane.xlu0 %1353 }
 0x42b   : > { %1818 = vst [vmem:[#allocation4 + $0x58] sm:$0xff] %v1786_v12  ;;  %v1393_v13 = vadd.f32 %v1356_v42, %v1297_v37  ;;  %v1392_v1 = vadd.f32 %v1354_v14, %v1296_v38  ;;  %v1328_v52 = vpop.xlane.xlu2 %1327 }
 0x42c   : > { %v1379_v33 = vadd.f32 %v1328_v52, %v1283_v59 }
 0x42d   : > { %1426 = vst.msk [vmem:[#allocation3 + $0xd0] sm:$0xff] %vm1399_vm1, %v1393_v13 }
 0x42e   : > { %1425 = vst.msk [vmem:[#allocation3 + $0xc8] sm:$0xff] %vm1399_vm1, %v1392_v1  ;;  %v1536_v47 = vpop.f32.mrf.mxu3 }
 0x42f   : > { %1412 = vst.msk [vmem:[#allocation3 + $0x60] sm:$0xff] %vm1399_vm1, %v1379_v33 }
 0x430   : > { %v1503_v39 = vpop.f32.mrf.mxu1 }
 0x431   : > { %v1787_v27 = vadd.f32 %v1755_v0, %v1503_v39 }
 0x433   : > { %1819 = vst [vmem:[#allocation4 + $0x40] sm:$0xff] %v1787_v27  ;;  %v1358_v26 = vpop.xlane.xlu2 %1357 }
 0x434   : > { %v1394_v50 = vadd.f32 %v1358_v26, %v1298_v44 }
 0x436   : > { %1427 = vst.msk [vmem:[#allocation3 + $0xd8] sm:$0xff] %vm1399_vm1, %v1394_v50  ;;  %v1539_v4 = vpop.f32.mrf.mxu3 }
 0x438   : > { %v1506_v58 = vpop.f32.mrf.mxu1 }
 0x439   : > { %v1788_v56 = vadd.f32 %v1756_v7, %v1506_v58 }
 0x43b   : > { %1820 = vst [vmem:[#allocation4 + $0xc8] sm:$0xff] %v1788_v56  ;;  %v1725_v28 = vpop.permute.xlu2 %1724 }
 0x43c   : > { %v1766_v40 = vmul.f32 %v1725_v28, %v1574_v49 }
 0x43d   : > { %v1735_v35 = vpop.permute.xlu0 %1734 }
 0x43e   : > { %v1798_v11 = vadd.f32 %v1766_v40, %v1536_v47  ;;  %v1768_v46 = vmul.f32 %v1735_v35, %v1576_v20  ;;  %v1542_v3 = vpop.f32.mrf.mxu3 }
 0x440   : > { %1830 = vst [vmem:[#allocation4 + $0xf8] sm:$0xff] %v1798_v11  ;;  %v1800_v63 = vadd.f32 %v1768_v46, %v1542_v3  ;;  %v1509_v5 = vpop.f32.mrf.mxu1 }
 0x441   : > { %v1789_v22 = vadd.f32 %v1757_v32, %v1509_v5 }
 0x442   : > { %1832 = vst [vmem:[#allocation4 + $0x98] sm:$0xff] %v1800_v63  ;;  %v1730_v16 = vpop.permute.xlu1 %1729 }
 0x443   : > { %1821 = vst [vmem:[#allocation4 + $0xe0] sm:$0xff] %v1789_v22  ;;  %v1767_v19 = vmul.f32 %v1730_v16, %v1575_v53 }
 0x445   : > { %v1799_v31 = vadd.f32 %v1767_v19, %v1539_v4 }
 0x447   : > { %1831 = vst [vmem:[#allocation4 + $0x20] sm:$0xff] %v1799_v31 }
 0x448 PF: > { %p4734_p3 = scmp.ne.s32.totalorder %s6238_s1, %s6233_s9 }
 0x44a   : > { %1868 = sbr.rel (%p4734_p3) target bundleno = 1997 (0x7cd), region = 56 }
 0x44f   : > { %v1884_v60 = vld [vmem:[%s6217_s29 + $0x78] sm:$0xff]  ;;  %v1883_v17 = vld [vmem:[%s6217_s29 + $0x70] sm:$0xff]  ;;  %v1882_v34 = vld [vmem:[%s6217_s29 + $0x68] sm:$0xff]  ;;  %v2046_v28 = vlaneseq }
 0x450   : > { %1933 = vmatpush.xpose.msra.mxu0 %v1884_v60  ;;  %4830 = vmatpush.xpose.msra.mxu2 %v1884_v60  ;;  %v1881_v23 = vld [vmem:[%s6217_s29 + $0x60] sm:$0xff]  ;;  %v1880_v36 = vld [vmem:[%s6217_s29 + $0x58] sm:$0xff]  ;;  %v1879_v25 = vld [vmem:[%s6217_s29 + $0x50] sm:$0xff] }
 0x451   : > { %4831 = vmatpush.xpose.msra.mxu3 %v1884_v60  ;;  %v1878_v10 = vld [vmem:[%s6217_s29 + $0x48] sm:$0xff]  ;;  %v1877_v18 = vld [vmem:[%s6217_s29 + $0x40] sm:$0xff]  ;;  %v1876_v61 = vld [vmem:[%s6217_s29 + $0x38] sm:$0xff]  ;;  %v7313_v20 = vshrl.u32 %v2046_v28, 7  ;;  %v7315_v55 = vand.u32 127, %v2046_v28 }
 0x452   : > { %v1875_v2 = vld [vmem:[%s6217_s29 + $0x30] sm:$0xff]  ;;  %v1874_v15 = vld [vmem:[%s6217_s29 + $0x28] sm:$0xff]  ;;  %v1873_v21 = vld [vmem:[%s6217_s29 + $0x20] sm:$0xff] }
 0x453   : > { %v1872_v54 = vld [vmem:[%s6217_s29 + $0x18] sm:$0xff]  ;;  %v1871_v30 = vld [vmem:[%s6217_s29 + $0x10] sm:$0xff]  ;;  %v1870_v62 = vld [vmem:[%s6217_s29 + $0x8] sm:$0xff]  ;;  %v2085_v40 = vand.u32 127, %v7313_v20  ;;  %v2060_v35 = vadd.s32 104, %v7313_v20  ;;  %v2048_v11 = vadd.s32 8, %v7313_v20 }
 0x454   : > { %1934 = vmatpush.xpose.msra.mxu0 %v1883_v17  ;;  %4832 = vmatpush.xpose.msra.mxu2 %v1883_v17  ;;  %v1869_v9 = vld [vmem:[%s6217_s29] sm:$0xff]  ;;  %v1929_v29 = vld [vmem:[#allocation5 + $0xb8] sm:$0xff]  ;;  %v1902_v12 = vld [vmem:[#allocation5 + $0xc8] sm:$0xff]  ;;  %v2075_v5 = vadd.s32 224, %v7313_v20  ;;  %v2061_v53 = vadd.s32 112, %v7313_v20 }
 0x455   : > { %4833 = vmatpush.xpose.msra.mxu3 %v1883_v17  ;;  %v1901_v45 = vld [vmem:[#allocation5 + $0x80] sm:$0xff]  ;;  %v1915_v8 = vld [vmem:[#allocation5 + $0x18] sm:$0xff]  ;;  %v1903_v57 = vld [vmem:[#allocation5 + $0xe8] sm:$0xff]  ;;  %vm2465_vm2 = vcmp.le.s32.totalorder %v7315_v55, %v2085_v40  ;;  %v2176_v3 = vand.u32 127, %v2060_v35  ;;  %v2092_v63 = vand.u32 127, %v2048_v11 }
 0x456   : > { %v1914_v51 = vld [vmem:[#allocation5 + $0x60] sm:$0xff]  ;;  %v1916_v38 = vld [vmem:[#allocation5 + $0x68] sm:$0xff]  ;;  %v1904_v14 = vld [vmem:[#allocation5 + $0x78] sm:$0xff]  ;;  %v2281_v16 = vand.u32 127, %v2075_v5  ;;  %v2183_v60 = vand.u32 127, %v2061_v53  ;;  %v2054_v5 = vadd.s32 56, %v7313_v20 }
 0x457   : > { %v1930_v37 = vld [vmem:[#allocation5] sm:$0xff]  ;;  %v1931_v42 = vld [vmem:[#allocation5 + $0x28] sm:$0xff]  ;;  %v1917_v48 = vld [vmem:[#allocation5 + $0x10] sm:$0xff]  ;;  %vm2478_vm3 = vcmp.le.s32.totalorder %v7315_v55, %v2176_v3  ;;  %vm2466_vm4 = vcmp.le.s32.totalorder %v7315_v55, %v2092_v63  ;;  %v2067_v53 = vadd.s32 160, %v7313_v20 }
 0x458   : > { %1935 = vmatpush.xpose.msra.mxu0 %v1882_v34  ;;  %4834 = vmatpush.xpose.msra.mxu2 %v1882_v34  ;;  %v1932_v59 = vld [vmem:[#allocation5 + $0x98] sm:$0xff]  ;;  %v1905_v13 = vld [vmem:[#allocation5 + $0x8] sm:$0xff]  ;;  %v1918_v1 = vld [vmem:[#allocation5 + $0x70] sm:$0xff]  ;;  %vm2493_vm5 = vcmp.le.s32.totalorder %v7315_v55, %v2281_v16  ;;  %vm2479_vm6 = vcmp.le.s32.totalorder %v7315_v55, %v2183_v60 }
 0x459   : > { %4835 = vmatpush.xpose.msra.mxu3 %v1882_v34  ;;  %v1919_v52 = vld [vmem:[#allocation5 + $0x50] sm:$0xff]  ;;  %v1920_v33 = vld [vmem:[#allocation5 + $0xa0] sm:$0xff]  ;;  %v1907_v47 = vld [vmem:[#allocation5 + $0x58] sm:$0xff] }
 0x45a   : > { %v1906_v6 = vld [vmem:[#allocation5 + $0x90] sm:$0xff]  ;;  %v1921_v0 = vld [vmem:[#allocation5 + $0xd8] sm:$0xff]  ;;  %v1908_v41 = vld [vmem:[#allocation5 + $0xa8] sm:$0xff] }
 0x45b   : > { %v1922_v39 = vld [vmem:[#allocation5 + $0x30] sm:$0xff]  ;;  %v1923_v43 = vld [vmem:[#allocation5 + $0x20] sm:$0xff]  ;;  %v1911_v24 = vld [vmem:[#allocation5 + $0x38] sm:$0xff] }
 0x45c   : > { %1936 = vmatpush.xpose.msra.mxu0 %v1881_v23  ;;  %4836 = vmatpush.xpose.msra.mxu2 %v1881_v23  ;;  %v1909_v27 = vld [vmem:[#allocation5 + $0xd0] sm:$0xff]  ;;  %v1925_v50 = vld [vmem:[#allocation5 + $0x88] sm:$0xff]  ;;  %v1912_v4 = vld [vmem:[#allocation5 + $0x40] sm:$0xff] }
 0x45d   : > { %4837 = vmatpush.xpose.msra.mxu3 %v1881_v23  ;;  %v1910_v44 = vld [vmem:[#allocation5 + $0xb0] sm:$0xff]  ;;  %v1926_v7 = vld [vmem:[#allocation5 + $0x48] sm:$0xff]  ;;  %v1913_v58 = vld [vmem:[#allocation5 + $0xe0] sm:$0xff]  ;;  %v2049_v23 = vadd.s32 16, %v7313_v20 }
 0x45e   : > { %v1924_v26 = vld [vmem:[#allocation5 + $0xf0] sm:$0xff]  ;;  %v1927_v56 = vld [vmem:[#allocation5 + $0xf8] sm:$0xff]  ;;  %v1928_v49 = vld [vmem:[#allocation5 + $0xc0] sm:$0xff] }
 0x460   : > { %1937 = vmatpush.xpose.msra.mxu0 %v1880_v36  ;;  %4838 = vmatpush.xpose.msra.mxu2 %v1880_v36 }
 0x461   : > { %4839 = vmatpush.xpose.msra.mxu3 %v1880_v36  ;;  %v2076_v36 = vadd.s32 232, %v7313_v20 }
 0x464   : > { %1938 = vmatpush.xpose.msra.mxu0 %v1879_v25  ;;  %4840 = vmatpush.xpose.msra.mxu2 %v1879_v25 }
 0x465   : > { %4841 = vmatpush.xpose.msra.mxu3 %v1879_v25  ;;  %v2062_v25 = vadd.s32 120, %v7313_v20 }
 0x468   : > { %1939 = vmatpush.xpose.msra.mxu0 %v1878_v10  ;;  %4842 = vmatpush.xpose.msra.mxu2 %v1878_v10 }
 0x469   : > { %4843 = vmatpush.xpose.msra.mxu3 %v1878_v10 }
 0x46c   : > { %1940 = vmatpush.xpose.msra.mxu0 %v1877_v18  ;;  %4844 = vmatpush.xpose.msra.mxu2 %v1877_v18 }
 0x46d   : > { %4845 = vmatpush.xpose.msra.mxu3 %v1877_v18 }
 0x470   : > { %1941 = vmatpush.xpose.msra.mxu0 %v1876_v61  ;;  %4846 = vmatpush.xpose.msra.mxu2 %v1876_v61 }
 0x471   : > { %4847 = vmatpush.xpose.msra.mxu3 %v1876_v61  ;;  %v2099_v61 = vand.u32 127, %v2049_v23 }
 0x473   : > { %vm2467_vm7 = vcmp.le.s32.totalorder %v7315_v55, %v2099_v61 }
 0x474   : > { %1942 = vmatpush.xpose.msra.mxu0 %v1875_v2  ;;  %4848 = vmatpush.xpose.msra.mxu2 %v1875_v2 }
 0x475   : > { %4849 = vmatpush.xpose.msra.mxu3 %v1875_v2 }
 0x478   : > { %1943 = vmatpush.xpose.msra.mxu0 %v1874_v15  ;;  %4850 = vmatpush.xpose.msra.mxu2 %v1874_v15 }
 0x479   : > { %4851 = vmatpush.xpose.msra.mxu3 %v1874_v15  ;;  %v2288_v15 = vand.u32 127, %v2076_v36  ;;  %v2055_v36 = vadd.s32 64, %v7313_v20 }
 0x47b   : > { %vm2494_vm8 = vcmp.le.s32.totalorder %v7315_v55, %v2288_v15  ;;  %v2141_v15 = vand.u32 127, %v2055_v36 }
 0x47c   : > { %1944 = vmatpush.xpose.msra.mxu0 %v1873_v21  ;;  %4852 = vmatpush.xpose.msra.mxu2 %v1873_v21 }
 0x47d   : > { %4853 = vmatpush.xpose.msra.mxu3 %v1873_v21 }
 0x480   : > { %1945 = vmatpush.xpose.msra.mxu0 %v1872_v54  ;;  %4854 = vmatpush.xpose.msra.mxu2 %v1872_v54 }
 0x481   : > { %4855 = vmatpush.xpose.msra.mxu3 %v1872_v54  ;;  %v2190_v54 = vand.u32 127, %v2062_v25  ;;  %v2068_v25 = vadd.s32 168, %v7313_v20 }
 0x483   : > { %vm2480_vm9 = vcmp.le.s32.totalorder %v7315_v55, %v2190_v54  ;;  %v2232_v54 = vand.u32 127, %v2068_v25 }
 0x484   : > { %1946 = vmatpush.xpose.msra.mxu0 %v1871_v30  ;;  %4856 = vmatpush.xpose.msra.mxu2 %v1871_v30 }
 0x485   : > { %4857 = vmatpush.xpose.msra.mxu3 %v1871_v30 }
 0x488   : > { %1947 = vmatpush.xpose.msra.mxu0 %v1870_v62  ;;  %4858 = vmatpush.xpose.msra.mxu2 %v1870_v62 }
 0x489   : > { %4859 = vmatpush.xpose.msra.mxu3 %v1870_v62  ;;  %v2050_v62 = vadd.s32 24, %v7313_v20 }
 0x48c   : > { %1948 = vmatpush.xpose.msra.mxu0 %v1869_v9  ;;  %4860 = vmatpush.xpose.msra.mxu2 %v1869_v9 }
 0x48d   : > { %4861 = vmatpush.xpose.msra.mxu3 %v1869_v9  ;;  %v2077_v9 = vadd.s32 240, %v7313_v20 }
 0x48f   : > { %1949 = vmatmul.f32.vlgmr.msra.gmra.mxu0 %v1901_v45  ;;  %1988 = vmatmul.f32.vlgmr.msra.gmra.mxu2 %v1914_v51 }
 0x490   : > { %2033 = vmatmul.f32.vlgmr.msra.gmra.mxu3 %v1929_v29 }
 0x497   : > { %1952 = vmatmul.f32.gmra.mxu0 %v1902_v12  ;;  %1991 = vmatmul.f32.gmra.mxu2 %v1915_v8  ;;  %v2106_v12 = vand.u32 127, %v2050_v62  ;;  %v2051_v8 = vadd.s32 32, %v7313_v20  ;;  %v2056_v62 = vadd.s32 72, %v7313_v20 }
 0x498   : > { %2036 = vmatmul.f32.gmra.mxu3 %v1930_v37  ;;  %v2295_v37 = vand.u32 127, %v2077_v9  ;;  %v2069_v9 = vadd.s32 176, %v7313_v20 }
 0x499   : > { %vm2468_vm10 = vcmp.le.s32.totalorder %v7315_v55, %v2106_v12 }
 0x49a   : > { %vm2495_vm11 = vcmp.le.s32.totalorder %v7315_v55, %v2295_v37 }
 0x49f   : > { %1955 = vmatmul.f32.gmra.mxu0 %v1903_v57  ;;  %1994 = vmatmul.f32.gmra.mxu2 %v1916_v38 }
 0x4a0   : > { %2039 = vmatmul.f32.gmra.mxu3 %v1931_v42  ;;  %v2113_v42 = vand.u32 127, %v2051_v8  ;;  %v2148_v8 = vand.u32 127, %v2056_v62  ;;  %v2529_v62 = vld [vmem:[#allocation2] sm:$0xff] }
 0x4a2   : > { %vm2469_vm12 = vcmp.le.s32.totalorder %v7315_v55, %v2113_v42 }
 0x4a7   : > { %1958 = vmatmul.f32.gmra.mxu0 %v1904_v14  ;;  %1997 = vmatmul.f32.gmra.mxu2 %v1917_v48  ;;  %v2063_v48 = vadd.s32 128, %v7313_v20 }
 0x4a8   : > { %2042 = vmatmul.f32.gmra.mxu3 %v1932_v59 }
 0x4af   : > { %1961 = vmatmul.f32.gmra.mxu0 %v1905_v13  ;;  %2000 = vmatmul.f32.gmra.mxu2 %v1918_v1 }
 0x4b7   : > { %2003 = vmatmul.f32.gmra.mxu2 %v1919_v52  ;;  %1964 = vmatmul.f32.gmra.mxu0 %v1906_v6  ;;  %v2064_v52 = vadd.s32 136, %v7313_v20 }
 0x4bf   : > { %2006 = vmatmul.f32.gmra.mxu2 %v1920_v33  ;;  %1967 = vmatmul.f32.gmra.mxu0 %v1907_v47  ;;  %v2197_v33 = vand.u32 127, %v2063_v48  ;;  %v2070_v48 = vadd.s32 184, %v7313_v20 }
 0x4c1   : > { %vm2481_vm13 = vcmp.le.s32.totalorder %v7315_v55, %v2197_v33 }
 0x4c7   : > { %2009 = vmatmul.f32.gmra.mxu2 %v1921_v0  ;;  %1970 = vmatmul.f32.gmra.mxu0 %v1908_v41  ;;  %v2204_v0 = vand.u32 127, %v2064_v52  ;;  %v2078_v41 = vadd.s32 248, %v7313_v20 }
 0x4c9   : > { %vm2482_vm14 = vcmp.le.s32.totalorder %v7315_v55, %v2204_v0  ;;  %v2246_v0 = vand.u32 127, %v2070_v48 }
 0x4cf   : > { %2012 = vmatmul.f32.gmra.mxu2 %v1922_v39  ;;  %1973 = vmatmul.f32.gmra.mxu0 %v1909_v27  ;;  %v2065_v39 = vadd.s32 144, %v7313_v20  ;;  %v2052_v27 = vadd.s32 40, %v7313_v20 }
 0x4d7   : > { %2015 = vmatmul.f32.gmra.mxu2 %v1923_v43  ;;  %1976 = vmatmul.f32.gmra.mxu0 %v1910_v44  ;;  %v2302_v44 = vand.u32 127, %v2078_v41 }
 0x4d9   : > { %vm2496_vm15 = vcmp.le.s32.totalorder %v7315_v55, %v2302_v44 }
 0x4df   : > { %2018 = vmatmul.f32.gmra.mxu2 %v1924_v26  ;;  %1979 = vmatmul.f32.gmra.mxu0 %v1911_v24  ;;  %v2211_v24 = vand.u32 127, %v2065_v39  ;;  %v2058_v39 = vadd.s32 88, %v7313_v20 }
 0x4e1   : > { %vm2483_vm0 = vcmp.le.s32.totalorder %v7315_v55, %v2211_v24  ;;  %v2162_v24 = vand.u32 127, %v2058_v39 }
 0x4e7   : > { %2021 = vmatmul.f32.gmra.mxu2 %v1925_v50  ;;  %1982 = vmatmul.f32.gmra.mxu0 %v1912_v4  ;;  %v2120_v4 = vand.u32 127, %v2052_v27  ;;  %v2071_v27 = vadd.s32 192, %v7313_v20 }
 0x4e9   : > { %vm2470_vm1 = vcmp.le.s32.totalorder %v7315_v55, %v2120_v4  ;;  %v2253_v4 = vand.u32 127, %v2071_v27 }
 0x4ef   : > { %2024 = vmatmul.f32.gmra.mxu2 %v1926_v7  ;;  %1985 = vmatmul.f32.gmra.mxu0 %v1913_v58 }
 0x4f7   : > { %2027 = vmatmul.f32.gmra.mxu2 %v1927_v56  ;;  %v2053_v56 = vadd.s32 48, %v7313_v20 }
 0x4f9   : > { %v2127_v35 = vand.u32 127, %v2053_v56  ;;  %v2059_v56 = vadd.s32 96, %v7313_v20 }
 0x4ff   : > { %2030 = vmatmul.f32.gmra.mxu2 %v1928_v49  ;;  %v2066_v49 = vadd.s32 152, %v7313_v20 }
 0x501   : > { %v2218_v3 = vand.u32 127, %v2066_v49  ;;  %v2072_v49 = vadd.s32 200, %v7313_v20 }
 0x50c   : > { %v1950_v46 = vpop.f32.mrf.mxu0 }
 0x50d   : > { %v7321_v32 = vsel %vm2465_vm2, %v1950_v46, -1e+30  ;;  %vm2471_vm2 = vcmp.le.s32.totalorder %v7315_v55, %v2127_v35 }
 0x50e   : > { %2561 = vmax.xlane.f32.xlu0 %v7321_v32 }
 0x512   : > { %v1989_v22 = vpop.f32.mrf.mxu2 }
 0x513   : > { %v7328_v19 = vsel %vm2478_vm3, %v1989_v22, -1e+30  ;;  %v2034_v34 = vpop.f32.mrf.mxu3  ;;  %vm2484_vm3 = vcmp.le.s32.totalorder %v7315_v55, %v2218_v3  ;;  %v2169_v3 = vand.u32 127, %v2059_v56 }
 0x514   : > { %2587 = vmax.xlane.f32.xlu1 %v7328_v19  ;;  %v1953_v31 = vpop.f32.mrf.mxu0  ;;  %v7339_v10 = vsel %vm2493_vm5, %v2034_v34, -1e+30  ;;  %v2225_v34 = vand.u32 127, %v2067_v53  ;;  %v5786_v53 = vmov 0  }
 0x515   : > { %v7331_v17 = vsel %vm2466_vm4, %v1953_v31, -1e+30  ;;  %v2134_v31 = vand.u32 127, %v2054_v5  ;;  %v2260_v5 = vand.u32 127, %v2072_v49  ;;  %5258 = vset.pattern.permute.xlu1 %v5786_v53  ;;  %5257 = vset.pattern.permute.xlu2 %v5786_v53  ;;  %v7488_v49 = vld [vmem:[#allocation2 + $0x78] sm:$0xff] }
 0x516   : > { %2563 = vmax.xlane.f32.xlu0 %v7331_v17  ;;  %vm2485_vm5 = vcmp.le.s32.totalorder %v7315_v55, %v2225_v34 }
 0x517   : > { %vm2472_vm4 = vcmp.le.s32.totalorder %v7315_v55, %v2134_v31  ;;  %5259 = vset.pattern.permute.xlu0 %v5786_v53  ;;  %v2073_v31 = vadd.s32 208, %v7313_v20 }
 0x519   : > { %v2267_v25 = vand.u32 127, %v2073_v31 }
 0x51a   : > { %v1992_v18 = vpop.f32.mrf.mxu2 }
 0x51b   : > { %v7341_v2 = vsel %vm2479_vm6, %v1992_v18, -1e+30  ;;  %v2037_v30 = vpop.f32.mrf.mxu3  ;;  %vm2473_vm6 = vcmp.le.s32.totalorder %v7315_v55, %v2141_v15 }
 0x51c   : > { %2617 = vmax.xlane.f32.xlu1 %v7339_v10  ;;  %2589 = vmax.xlane.f32.xlu2 %v7341_v2  ;;  %v1956_v21 = vpop.f32.mrf.mxu0  ;;  %v7352_v29 = vsel %vm2494_vm8, %v2037_v30, -1e+30  ;;  %vm2474_vm8 = vcmp.le.s32.totalorder %v7315_v55, %v2148_v8 }
 0x51d   : > { %v7350_v45 = vsel %vm2467_vm7, %v1956_v21, -1e+30  ;;  %vm2486_vm7 = vcmp.le.s32.totalorder %v7315_v55, %v2232_v54 }
 0x522   : > { %v1995_v51 = vpop.f32.mrf.mxu2 }
 0x523   : > { %v7355_v57 = vsel %vm2480_vm9, %v1995_v51, -1e+30  ;;  %v2040_v14 = vpop.f32.mrf.mxu3 }
 0x524   : > { %2591 = vmax.xlane.f32.xlu0 %v7355_v57  ;;  %2565 = vmax.xlane.f32.xlu1 %v7350_v45  ;;  %v1959_v38 = vpop.f32.mrf.mxu0  ;;  %v7365_v13 = vsel %vm2495_vm11, %v2040_v14, -1e+30  ;;  %v2057_v14 = vadd.s32 80, %v7313_v20  ;;  %vm2488_vm11 = vcmp.le.s32.totalorder %v7315_v55, %v2246_v0 }
 0x525   : > { %2619 = vmax.xlane.f32.xlu2 %v7352_v29  ;;  %v7363_v59 = vsel %vm2468_vm10, %v1959_v38, -1e+30  ;;  %v2239_v38 = vand.u32 127, %v2069_v9 }
 0x527   : > { %vm2487_vm9 = vcmp.le.s32.totalorder %v7315_v55, %v2239_v38 }
 0x52a   : > { %v1998_v1 = vpop.f32.mrf.mxu2 }
 0x52b   : > { %v7379_v26 = vsel %vm2481_vm13, %v1998_v1, -1e+30  ;;  %v2043_v58 = vpop.f32.mrf.mxu3  ;;  %vm2489_vm13 = vcmp.le.s32.totalorder %v7315_v55, %v2253_v4 }
 0x52c   : > { %2567 = vmax.xlane.f32.xlu1 %v7363_v59  ;;  %v1962_v6 = vpop.f32.mrf.mxu0  ;;  %2621 = vmax.xlane.f32.xlu0 %v7365_v13  ;;  %v7390_v28 = vsel %vm2496_vm15, %v2043_v58, -1e+30  ;;  %vm2490_vm15 = vcmp.le.s32.totalorder %v7315_v55, %v2260_v5 }
 0x52d   : > { %v7371_v47 = vsel %vm2469_vm12, %v1962_v6, -1e+30  ;;  %v2155_v6 = vand.u32 127, %v2057_v14  ;;  %vm2476_vm12 = vcmp.le.s32.totalorder %v7315_v55, %v2162_v24  ;;  %v2530_v14 = vld [vmem:[#allocation2 + $0x8] sm:$0xff] }
 0x52e   : > { %2569 = vmax.xlane.f32.xlu2 %v7371_v47 }
 0x52f   : > { %vm2475_vm10 = vcmp.le.s32.totalorder %v7315_v55, %v2155_v6 }
 0x532   : > { %v2001_v43 = vpop.f32.mrf.mxu2 }
 0x533   : > { %v7382_v7 = vsel %vm2482_vm14, %v2001_v43, -1e+30  ;;  %vm2477_vm14 = vcmp.le.s32.totalorder %v7315_v55, %v2169_v3  ;;  %v7492_v3 = vld [vmem:[#allocation2 + $0xe8] sm:$0xff] }
 0x534   : > { %2593 = vmax.xlane.f32.xlu1 %v7379_v26  ;;  %v1965_v50 = vpop.f32.mrf.mxu0 }
 0x535   : > { %v7394_v46 = vsel %vm2470_vm1, %v1965_v50, -1e+30 }
 0x536   : > { %2595 = vmax.xlane.f32.xlu2 %v7382_v7 }
 0x53a   : > { %v2004_v40 = vpop.f32.mrf.mxu2 }
 0x53b   : > { %v7392_v11 = vsel %vm2483_vm0, %v2004_v40, -1e+30  ;;  %vm2491_vm0 = vcmp.le.s32.totalorder %v7315_v55, %v2267_v25 }
 0x53c   : > { %2597 = vmax.xlane.f32.xlu0 %v7392_v11  ;;  %2623 = vmax.xlane.f32.xlu1 %v7390_v28  ;;  %v1968_v63 = vpop.f32.mrf.mxu0 }
 0x53d   : > { %v7403_v22 = vsel %vm2471_vm2, %v1968_v63, -1e+30  ;;  %vm3169_vm2 = vcmask 7168  }
 0x53e   : > { %2571 = vmax.xlane.f32.xlu2 %v7394_v46 }
 0x542   : > { %v2007_v16 = vpop.f32.mrf.mxu2 }
 0x543   : > { %v7405_v60 = vsel %vm2484_vm3, %v2007_v16, -1e+30 }
 0x544   : > { %2599 = vmax.xlane.f32.xlu1 %v7405_v60  ;;  %2573 = vmax.xlane.f32.xlu0 %v7403_v22  ;;  %v1971_v23 = vpop.f32.mrf.mxu0 }
 0x545   : > { %v7413_v18 = vsel %vm2472_vm4, %v1971_v23, -1e+30 }
 0x54a   : > { %v2010_v61 = vpop.f32.mrf.mxu2 }
 0x54b   : > { %v7415_v21 = vsel %vm2485_vm5, %v2010_v61, -1e+30  ;;  %v2074_v61 = vadd.s32 216, %v7313_v20  ;;  %v2542_v20 = vld [vmem:[#allocation2 + $0x68] sm:$0xff] }
 0x54c   : > { %2601 = vmax.xlane.f32.xlu2 %v7415_v21  ;;  %2575 = vmax.xlane.f32.xlu1 %v7413_v18  ;;  %v1974_v30 = vpop.f32.mrf.mxu0 }
 0x54d   : > { %v7423_v51 = vsel %vm2473_vm6, %v1974_v30, -1e+30  ;;  %v2274_v30 = vand.u32 127, %v2074_v61 }
 0x54f   : > { %vm2492_vm1 = vcmp.le.s32.totalorder %v7315_v55, %v2274_v30  ;;  %v2557_v55 = vld [vmem:[#allocation2 + $0xe0] sm:$0xff]  ;;  %v7512_v30 = vld [vmem:[#allocation2 + $0x18] sm:$0xff] }
 0x552   : > { %v2013_v12 = vpop.f32.mrf.mxu2 }
 0x553   : > { %v7425_v37 = vsel %vm2486_vm7, %v2013_v12, -1e+30 }
 0x554   : > { %2603 = vmax.xlane.f32.xlu0 %v7425_v37  ;;  %2577 = vmax.xlane.f32.xlu2 %v7423_v51  ;;  %v1977_v42 = vpop.f32.mrf.mxu0 }
 0x555   : > { %v7433_v1 = vsel %vm2474_vm8, %v1977_v42, -1e+30 }
 0x55a   : > { %v2016_v52 = vpop.f32.mrf.mxu2 }
 0x55b   : > { %v7435_v33 = vsel %vm2487_vm9, %v2016_v52, -1e+30 }
 0x55c   : > { %2605 = vmax.xlane.f32.xlu1 %v7435_v33  ;;  %2579 = vmax.xlane.f32.xlu0 %v7433_v1  ;;  %v1980_v41 = vpop.f32.mrf.mxu0 }
 0x55d   : > { %v7443_v43 = vsel %vm2475_vm10, %v1980_v41, -1e+30  ;;  %v7480_v41 = vld [vmem:[#allocation2 + $0x70] sm:$0xff] }
 0x562   : > { %v2019_v44 = vpop.f32.mrf.mxu2 }
 0x563   : > { %v7445_v50 = vsel %vm2488_vm11, %v2019_v44, -1e+30 }
 0x564   : > { %2607 = vmax.xlane.f32.xlu2 %v7445_v50  ;;  %2581 = vmax.xlane.f32.xlu1 %v7443_v43  ;;  %v1983_v58 = vpop.f32.mrf.mxu0 }
 0x565   : > { %v7453_v40 = vsel %vm2476_vm12, %v1983_v58, -1e+30 }
 0x566   : > { %9487 = vst [vmem:[#allocation96_spill] sm:$0xff] %v7453_v40 }
 0x56a   : > { %v2022_v35 = vpop.f32.mrf.mxu2 }
 0x56b   : > { %v7455_v63 = vsel %vm2489_vm13, %v2022_v35, -1e+30  ;;  %v7490_v35 = vld [vmem:[#allocation2 + $0x10] sm:$0xff] }
 0x56c   : > { %9488 = vst [vmem:[#allocation97_spill] sm:$0xff] %v7455_v63  ;;  %2609 = vmax.xlane.f32.xlu0 %v7455_v63  ;;  %2583 = vmax.xlane.f32.xlu2 %v7453_v40  ;;  %v1986_v16 = vpop.f32.mrf.mxu0  ;;  %v1886_v40 = vld [vmem:[%s6224_s0 + $0x8] sm:$0xff] }
 0x56d   : > { %v7462_v34 = vsel %vm2477_vm14, %v1986_v16, -1e+30 }
 0x56e   : > { %9489 = vst [vmem:[#allocation98_spill] sm:$0xff] %v7462_v34 }
 0x572   : > { %v2025_v23 = vpop.f32.mrf.mxu2 }
 0x573   : > { %v7464_v36 = vsel %vm2490_vm15, %v2025_v23, -1e+30 }
 0x574   : > { %9490 = vst [vmem:[#allocation99_spill] sm:$0xff] %v7464_v36  ;;  %2611 = vmax.xlane.f32.xlu1 %v7464_v36  ;;  %2585 = vmax.xlane.f32.xlu0 %v7462_v34 }
 0x57a   : > { %v2028_v15 = vpop.f32.mrf.mxu2 }
 0x57b   : > { %v7470_v54 = vsel %vm2491_vm0, %v2028_v15, -1e+30 }
 0x57c   : > { %9491 = vst [vmem:[#allocation100_spill] sm:$0xff] %v7470_v54  ;;  %2613 = vmax.xlane.f32.xlu2 %v7470_v54 }
 0x581   : > { %v2562_v9 = vpop.xlane.xlu0 %2561 }
 0x582   : > { %v2031_v12 = vpop.f32.mrf.mxu2  ;;  %v2625_v8 = vmax.f32 %v2529_v62, %v2562_v9 }
 0x583   : > { %v7474_v38 = vsel %vm2492_vm1, %v2031_v12, -1e+30  ;;  %v7516_v12 = vld [vmem:[#allocation2 + $0x20] sm:$0xff] }
 0x584   : > { %9492 = vst [vmem:[#allocation101_spill] sm:$0xff] %v7474_v38  ;;  %2615 = vmax.xlane.f32.xlu0 %v7474_v38  ;;  %v2657_v39 = vsub.f32 %v2529_v62, %v2625_v8  ;;  %v7514_v62 = vld [vmem:[#allocation2 + $0xf0] sm:$0xff] }
 0x585   : > { %3603 = vst.msk [vmem:[#allocation2] sm:$0xff] %vm3169_vm2, %v2625_v8 }
 0x586   : > { %v2689_v56 = vmul.f32 1.442695, %v2657_v39 }
 0x587   : > { %v2588_v42 = vpop.xlane.xlu1 %2587 }
 0x588   : > { %v2638_v48 = vmax.f32 %v2542_v20, %v2588_v42 }
 0x589   : > { %v2564_v52 = vpop.xlane.xlu0 %2563 }
 0x58a   : > { %3616 = vst.msk [vmem:[#allocation2 + $0x68] sm:$0xff] %vm3169_vm2, %v2638_v48  ;;  %v2626_v6 = vmax.f32 %v2530_v14, %v2564_v52 }
 0x58c   : > { %v2658_v0 = vsub.f32 %v2530_v14, %v2626_v6  ;;  %3604 = vst.msk [vmem:[#allocation2 + $0x8] sm:$0xff] %vm3169_vm2, %v2626_v6  ;;  %v2670_v14 = vsub.f32 %v2542_v20, %v2638_v48 }
 0x58d   : > { %2820 = vperm.xlu1 %5258, %v2638_v48   ;;  %v7534_v48 = vld [vmem:[#allocation2 + $0x88] sm:$0xff] }
 0x58e   : > { %v2691_v27 = vmul.f32 1.442695, %v2658_v0  ;;  %v2715_v39 = vmul.f32 1.442695, %v2670_v14 }
 0x58f   : > { %v2618_v44 = vpop.xlane.xlu1 %2617  ;;  %v2590_v24 = vpop.xlane.xlu2 %2589 }
 0x590   : > { %v2653_v4 = vmax.f32 %v2557_v55, %v2618_v44  ;;  %v7483_v58 = vmax.f32 %v7480_v41, %v2590_v24  ;;  %5260 = vpow2.f32 %v2691_v27  ;;  %v7532_v27 = vld [vmem:[#allocation2 + $0x80] sm:$0xff] }
 0x591   : > { %5262 = vpow2.f32 %v2689_v56 }
 0x592   : > { %3631 = vst.msk [vmem:[#allocation2 + $0xe0] sm:$0xff] %vm3169_vm2, %v2653_v4  ;;  %5264 = vpow2.f32 %v2715_v39  ;;  %v2685_v24 = vsub.f32 %v2557_v55, %v2653_v4  ;;  %v7557_v39 = vld [vmem:[#allocation2 + $0x28] sm:$0xff] }
 0x593   : > { %3617 = vst.msk [vmem:[#allocation2 + $0x70] sm:$0xff] %vm3169_vm2, %v7483_v58 }
 0x594   : > { %2755 = vperm.xlu2 %5257, %v2625_v8  }
 0x595   : > { %2895 = vperm.xlu1 %5258, %v2653_v4   ;;  %v7553_v4 = vld [vmem:[#allocation2 + $0xf8] sm:$0xff] }
 0x596   : > { %v7498_v25 = vpop.eup %5260 }
 0x597   : > { %v2592_v5 = vpop.xlane.xlu0 %2591  ;;  %v2566_v53 = vpop.xlane.xlu1 %2565  ;;  %9493 = vst [vmem:[#allocation102_spill] sm:$0xff] %v7498_v25 }
 0x598   : > { %v2640_v16 = vmax.f32 %v7488_v49, %v2592_v5  ;;  %v7496_v31 = vmax.f32 %v7490_v35, %v2566_v53  ;;  %2760 = vperm.xlu0 %5259, %v2626_v6   ;;  %v2620_v23 = vpop.xlane.xlu2 %2619  ;;  %v7506_v15 = vpop.eup %5262  ;;  %v2745_v53 = vmul.f32 1.442695, %v2685_v24 }
 0x599   : > { %v7501_v61 = vmax.f32 %v7492_v3, %v2620_v23  ;;  %9494 = vst [vmem:[#allocation103_spill] sm:$0xff] %v7506_v15  ;;  %v2671_v23 = vsub.f32 %v7480_v41, %v7483_v58 }
 0x59a   : > { %3618 = vst.msk [vmem:[#allocation2 + $0x78] sm:$0xff] %vm3169_vm2, %v2640_v16  ;;  %v2672_v55 = vsub.f32 %v7488_v49, %v2640_v16  ;;  %5266 = vpow2.f32 %v2745_v53  ;;  %v7581_v53 = vld [vmem:[#allocation2 + $0x98] sm:$0xff] }
 0x59b   : > { %3605 = vst.msk [vmem:[#allocation2 + $0x10] sm:$0xff] %vm3169_vm2, %v7496_v31  ;;  %v2717_v41 = vmul.f32 1.442695, %v2671_v23  ;;  %v7583_v23 = vld [vmem:[#allocation2 + $0x30] sm:$0xff] }
 0x59c   : > { %3632 = vst.msk [vmem:[#allocation2 + $0xe8] sm:$0xff] %vm3169_vm2, %v7501_v61  ;;  %3354 = vperm.xlu2 %5257, %v7498_v25   ;;  %v2719_v24 = vmul.f32 1.442695, %v2672_v55 }
 0x59d   : > { %3349 = vperm.xlu1 %5258, %v7506_v15   ;;  %5268 = vpow2.f32 %v2717_v41 }
 0x59e   : > { %5270 = vpow2.f32 %v2719_v24  ;;  %v7607_v24 = vld [vmem:[#allocation2 + $0x38] sm:$0xff] }
 0x59f   : > { %v2568_v9 = vpop.xlane.xlu1 %2567  ;;  %v2622_v42 = vpop.xlane.xlu0 %2621 }
 0x5a0   : > { %v7519_v8 = vmax.f32 %v7512_v30, %v2568_v9  ;;  %2825 = vperm.xlu0 %5259, %v7483_v58   ;;  %v2655_v6 = vmax.f32 %v7514_v62, %v2622_v42  ;;  %v7550_v9 = vld [vmem:[#allocation2 + $0x90] sm:$0xff]  ;;  %v7555_v42 = vpop.eup %5264  ;;  %v2659_v58 = vsub.f32 %v7490_v35, %v7496_v31 }
 0x5a1   : > { %v2570_v52 = vpop.xlane.xlu2 %2569  ;;  %9495 = vst [vmem:[#allocation104_spill] sm:$0xff] %v7555_v42 }
 0x5a2   : > { %3606 = vst.msk [vmem:[#allocation2 + $0x18] sm:$0xff] %vm3169_vm2, %v7519_v8  ;;  %v7526_v0 = vmax.f32 %v7516_v12, %v2570_v52  ;;  %v2693_v35 = vmul.f32 1.442695, %v2659_v58  ;;  %v2687_v55 = vsub.f32 %v7514_v62, %v2655_v6 }
 0x5a3   : > { %3633 = vst.msk [vmem:[#allocation2 + $0xf0] sm:$0xff] %vm3169_vm2, %v2655_v6 }
 0x5a4   : > { %3607 = vst.msk [vmem:[#allocation2 + $0x20] sm:$0xff] %vm3169_vm2, %v7526_v0  ;;  %2830 = vperm.xlu2 %5257, %v2640_v16   ;;  %5272 = vpow2.f32 %v2693_v35  ;;  %v2749_v41 = vmul.f32 1.442695, %v2687_v55  ;;  %v2660_v35 = vsub.f32 %v7512_v30, %v7519_v8  ;;  %v2661_v38 = vsub.f32 %v7516_v12, %v7526_v0 }
 0x5a5   : > { %2765 = vperm.xlu1 %5258, %v7496_v31   ;;  %v2686_v31 = vsub.f32 %v7492_v3, %v7501_v61 }
 0x5a7   : > { %v2594_v20 = vpop.xlane.xlu1 %2593 }
 0x5a8   : > { %v7537_v44 = vmax.f32 %v7532_v27, %v2594_v20  ;;  %2900 = vperm.xlu0 %5259, %v7501_v61   ;;  %v2747_v61 = vmul.f32 1.442695, %v2686_v31 }
 0x5a9   : > { %v2596_v56 = vpop.xlane.xlu2 %2595 }
 0x5aa   : > { %3619 = vst.msk [vmem:[#allocation2 + $0x80] sm:$0xff] %vm3169_vm2, %v7537_v44  ;;  %v7543_v5 = vmax.f32 %v7534_v48, %v2596_v56  ;;  %5274 = vpow2.f32 %v2747_v61 }
 0x5ab   : > { %5276 = vpow2.f32 %v2749_v41  ;;  %v1900_v41 = vld [vmem:[%s6224_s0 + $0x78] sm:$0xff] }
 0x5ac   : > { %3620 = vst.msk [vmem:[#allocation2 + $0x88] sm:$0xff] %vm3169_vm2, %v7543_v5  ;;  %2905 = vperm.xlu2 %5257, %v2655_v6   ;;  %v7605_v6 = vld [vmem:[#allocation2 + $0xa0] sm:$0xff]  ;;  %3202 = vmatpush.msrb.mxu0 %v1900_v41  ;;  %v2674_v12 = vsub.f32 %v7534_v48, %v7543_v5 }
 0x5ad   : > { %2835 = vperm.xlu1 %5258, %v7537_v44   ;;  %4862 = vmatpush.msra.mxu1 %v1900_v41 }
 0x5ae   : > { %4863 = vmatpush.msrb.mxu3 %v1900_v41  ;;  %v1897_v41 = vld [vmem:[%s6224_s0 + $0x60] sm:$0xff]  ;;  %v2723_v36 = vmul.f32 1.442695, %v2674_v12  ;;  %v7714_v12 = vld [vmem:[#allocation2 + $0x58] sm:$0xff] }
 0x5af   : > { %v2598_v14 = vpop.xlane.xlu0 %2597  ;;  %v2624_v52 = vpop.xlane.xlu1 %2623 }
 0x5b0   : > { %v7560_v20 = vmax.f32 %v7550_v9, %v2598_v14  ;;  %3414 = vperm.xlu0 %5259, %v7555_v42   ;;  %v7566_v49 = vmax.f32 %v7553_v4, %v2624_v52  ;;  %v7586_v14 = vpop.eup %5266 }
 0x5b1   : > { %v2572_v16 = vpop.xlane.xlu2 %2571  ;;  %9496 = vst [vmem:[#allocation105_spill] sm:$0xff] %v7586_v14  ;;  %v7597_v58 = vpop.eup %5268 }
 0x5b2   : > { %3621 = vst.msk [vmem:[#allocation2 + $0x90] sm:$0xff] %vm3169_vm2, %v7560_v20  ;;  %v7571_v56 = vmax.f32 %v7557_v39, %v2572_v16  ;;  %v7601_v62 = vpop.eup %5270 }
 0x5b3   : > { %3634 = vst.msk [vmem:[#allocation2 + $0xf8] sm:$0xff] %vm3169_vm2, %v7566_v49  ;;  %v7611_v31 = vpop.eup %5272 }
 0x5b4   : > { %2770 = vperm.xlu2 %5257, %v7519_v8   ;;  %3608 = vst.msk [vmem:[#allocation2 + $0x28] sm:$0xff] %vm3169_vm2, %v7571_v56  ;;  %v7624_v30 = vpop.eup %5274 }
 0x5b5   : > { %2910 = vperm.xlu1 %5258, %v7566_v49   ;;  %9497 = vst [vmem:[#allocation106_spill] sm:$0xff] %v7597_v58  ;;  %v7628_v8 = vpop.eup %5276 }
 0x5b6   : > { %9498 = vst [vmem:[#allocation107_spill] sm:$0xff] %v7601_v62 }
 0x5b7   : > { %v2600_v52 = vpop.xlane.xlu1 %2599  ;;  %v2574_v16 = vpop.xlane.xlu0 %2573  ;;  %9499 = vst [vmem:[#allocation108_spill] sm:$0xff] %v7611_v31 }
 0x5b8   : > { %v7589_v25 = vmax.f32 %v7581_v53, %v2600_v52  ;;  %3489 = vperm.xlu0 %5259, %v7586_v14   ;;  %v7593_v3 = vmax.f32 %v7583_v23, %v2574_v16  ;;  %v2695_v14 = vmul.f32 1.442695, %v2660_v35  ;;  %9500 = vst [vmem:[#allocation109_spill] sm:$0xff] %v7624_v30 }
 0x5b9   : > { %9501 = vst [vmem:[#allocation110_spill] sm:$0xff] %v7628_v8 }
 0x5ba   : > { %3622 = vst.msk [vmem:[#allocation2 + $0x98] sm:$0xff] %vm3169_vm2, %v7589_v25  ;;  %5278 = vpow2.f32 %v2695_v14  ;;  %v2688_v14 = vsub.f32 %v7553_v4, %v7566_v49  ;;  %v7658_v49 = vld [vmem:[#allocation2 + $0xb0] sm:$0xff] }
 0x5bb   : > { %3609 = vst.msk [vmem:[#allocation2 + $0x30] sm:$0xff] %vm3169_vm2, %v7593_v3 }
 0x5bc   : > { %3419 = vperm.xlu2 %5257, %v7597_v58   ;;  %v2751_v4 = vmul.f32 1.442695, %v2688_v14 }
 0x5bd   : > { %3424 = vperm.xlu1 %5258, %v7601_v62   ;;  %v2673_v62 = vsub.f32 %v7532_v27, %v7537_v44  ;;  %v7635_v27 = vld [vmem:[#allocation2 + $0x40] sm:$0xff]  ;;  %v1899_v44 = vld [vmem:[%s6224_s0 + $0x70] sm:$0xff] }
 0x5be   : > { %3203 = vmatpush.msrb.mxu0 %v1899_v44  ;;  %4864 = vmatpush.msra.mxu1 %v1899_v44 }
 0x5bf   : > { %v2602_v55 = vpop.xlane.xlu2 %2601  ;;  %v2576_v52 = vpop.xlane.xlu1 %2575  ;;  %4865 = vmatpush.msrb.mxu3 %v1899_v44  ;;  %v7660_v44 = vld [vmem:[#allocation2 + $0x48] sm:$0xff] }
 0x5c0   : > { %v7614_v16 = vmax.f32 %v7605_v6, %v2602_v55  ;;  %3359 = vperm.xlu0 %5259, %v7611_v31   ;;  %v7618_v61 = vmax.f32 %v7607_v24, %v2576_v52  ;;  %v2721_v55 = vmul.f32 1.442695, %v2673_v62  ;;  %v7633_v52 = vld [vmem:[#allocation2 + $0xa8] sm:$0xff] }
 0x5c2   : > { %3623 = vst.msk [vmem:[#allocation2 + $0xa0] sm:$0xff] %vm3169_vm2, %v7614_v16  ;;  %5280 = vpow2.f32 %v2721_v55  ;;  %v1896_v55 = vld [vmem:[%s6224_s0 + $0x58] sm:$0xff] }
 0x5c3   : > { %3610 = vst.msk [vmem:[#allocation2 + $0x38] sm:$0xff] %vm3169_vm2, %v7618_v61  ;;  %5282 = vpow2.f32 %v2751_v4  ;;  %v1891_v4 = vld [vmem:[%s6224_s0 + $0x30] sm:$0xff] }
 0x5c4   : > { %3494 = vperm.xlu2 %5257, %v7624_v30  }
 0x5c5   : > { %3499 = vperm.xlu1 %5258, %v7628_v8   ;;  %v1898_v8 = vld [vmem:[%s6224_s0 + $0x68] sm:$0xff] }
 0x5c6   : > { %3204 = vmatpush.msrb.mxu0 %v1898_v8  ;;  %4866 = vmatpush.msra.mxu1 %v1898_v8 }
 0x5c7   : > { %v2604_v35 = vpop.xlane.xlu0 %2603  ;;  %v2578_v31 = vpop.xlane.xlu2 %2577  ;;  %4867 = vmatpush.msrb.mxu3 %v1898_v8 }
 0x5c8   : > { %v7639_v30 = vmax.f32 %v7633_v52, %v2604_v35  ;;  %2840 = vperm.xlu0 %5259, %v7543_v5   ;;  %v7643_v62 = vmax.f32 %v7635_v27, %v2578_v31  ;;  %3205 = vmatpush.msrb.mxu0 %v1897_v41  ;;  %v7653_v31 = vpop.eup %5278  ;;  %v1895_v35 = vld [vmem:[%s6224_s0 + $0x50] sm:$0xff]  ;;  %v1890_v5 = vld [vmem:[%s6224_s0 + $0x28] sm:$0xff] }
 0x5c9   : > { %9502 = vst [vmem:[#allocation111_spill] sm:$0xff] %v7653_v31  ;;  %4868 = vmatpush.msra.mxu1 %v1897_v41  ;;  %4869 = vmatpush.msrb.mxu3 %v1897_v41  ;;  %v7663_v8 = vpop.eup %5280  ;;  %v2697_v41 = vmul.f32 1.442695, %v2661_v38 }
 0x5ca   : > { %3624 = vst.msk [vmem:[#allocation2 + $0xa8] sm:$0xff] %vm3169_vm2, %v7639_v30  ;;  %3206 = vmatpush.msrb.mxu0 %v1896_v55 }
 0x5cb   : > { %3611 = vst.msk [vmem:[#allocation2 + $0x40] sm:$0xff] %vm3169_vm2, %v7643_v62  ;;  %4870 = vmatpush.msra.mxu1 %v1896_v55  ;;  %4871 = vmatpush.msrb.mxu3 %v1896_v55  ;;  %v7687_v55 = vld [vmem:[#allocation2 + $0x50] sm:$0xff]  ;;  %5284 = vpow2.f32 %v2697_v41  ;;  %v7712_v41 = vld [vmem:[#allocation2 + $0xc0] sm:$0xff] }
 0x5cc   : > { %2775 = vperm.xlu2 %5257, %v7526_v0   ;;  %9503 = vst [vmem:[#allocation112_spill] sm:$0xff] %v7663_v8  ;;  %3207 = vmatpush.msrb.mxu0 %v1895_v35  ;;  %v7685_v0 = vld [vmem:[#allocation2 + $0xb8] sm:$0xff]  ;;  %5286 = vpow2.f32 %v2723_v36 }
 0x5cd   : > { %3364 = vperm.xlu1 %5258, %v7653_v31   ;;  %v1894_v31 = vld [vmem:[%s6224_s0 + $0x48] sm:$0xff]  ;;  %4872 = vmatpush.msra.mxu1 %v1895_v35 }
 0x5ce   : > { %3208 = vmatpush.msrb.mxu0 %v1894_v31  ;;  %4873 = vmatpush.msrb.mxu3 %v1895_v35  ;;  %v7690_v35 = vpop.eup %5282 }
 0x5cf   : > { %v2606_v42 = vpop.xlane.xlu1 %2605  ;;  %v2580_v58 = vpop.xlane.xlu0 %2579  ;;  %4874 = vmatpush.msra.mxu1 %v1894_v31  ;;  %9504 = vst [vmem:[#allocation113_spill] sm:$0xff] %v7690_v35 }
 0x5d0   : > { %v7666_v15 = vmax.f32 %v7658_v49, %v2606_v42  ;;  %3429 = vperm.xlu0 %5259, %v7663_v8   ;;  %v7670_v14 = vmax.f32 %v7660_v44, %v2580_v58  ;;  %v1893_v42 = vld [vmem:[%s6224_s0 + $0x40] sm:$0xff]  ;;  %v1892_v58 = vld [vmem:[%s6224_s0 + $0x38] sm:$0xff]  ;;  %4875 = vmatpush.msrb.mxu3 %v1894_v31  ;;  %v2675_v31 = vsub.f32 %v7550_v9, %v7560_v20 }
 0x5d1   : > { %3209 = vmatpush.msrb.mxu0 %v1893_v42  ;;  %4876 = vmatpush.msra.mxu1 %v1893_v42 }
 0x5d2   : > { %3625 = vst.msk [vmem:[#allocation2 + $0xb0] sm:$0xff] %vm3169_vm2, %v7666_v15  ;;  %4877 = vmatpush.msrb.mxu3 %v1893_v42  ;;  %v2662_v42 = vsub.f32 %v7557_v39, %v7571_v56 }
 0x5d3   : > { %3612 = vst.msk [vmem:[#allocation2 + $0x48] sm:$0xff] %vm3169_vm2, %v7670_v14  ;;  %3210 = vmatpush.msrb.mxu0 %v1892_v58  ;;  %4878 = vmatpush.msra.mxu1 %v1892_v58 }
 0x5d4   : > { %2845 = vperm.xlu2 %5257, %v7560_v20   ;;  %4879 = vmatpush.msrb.mxu3 %v1892_v58  ;;  %v1887_v58 = vld [vmem:[%s6224_s0 + $0x10] sm:$0xff]  ;;  %v2699_v9 = vmul.f32 1.442695, %v2662_v42  ;;  %v2725_v20 = vmul.f32 1.442695, %v2675_v31  ;;  %v2663_v31 = vsub.f32 %v7583_v23, %v7593_v3 }
 0x5d5   : > { %2780 = vperm.xlu1 %5258, %v7571_v56   ;;  %3211 = vmatpush.msrb.mxu0 %v1891_v4 }
 0x5d6   : > { %4880 = vmatpush.msra.mxu1 %v1891_v4  ;;  %4881 = vmatpush.msrb.mxu3 %v1891_v4  ;;  %v1885_v4 = vld [vmem:[%s6224_s0] sm:$0xff]  ;;  %5288 = vpow2.f32 %v2699_v9 }
 0x5d7   : > { %v2608_v8 = vpop.xlane.xlu2 %2607  ;;  %v2582_v54 = vpop.xlane.xlu1 %2581  ;;  %3212 = vmatpush.msrb.mxu0 %v1890_v5  ;;  %5290 = vpow2.f32 %v2725_v20  ;;  %v7763_v20 = vld [vmem:[#allocation2 + $0xd0] sm:$0xff] }
 0x5d8   : > { %v7693_v38 = vmax.f32 %v7685_v0, %v2608_v8  ;;  %3504 = vperm.xlu0 %5259, %v7690_v35   ;;  %v7697_v48 = vmax.f32 %v7687_v55, %v2582_v54  ;;  %v1889_v8 = vld [vmem:[%s6224_s0 + $0x20] sm:$0xff]  ;;  %4882 = vmatpush.msra.mxu1 %v1890_v5  ;;  %v1888_v54 = vld [vmem:[%s6224_s0 + $0x18] sm:$0xff]  ;;  %v7719_v35 = vpop.eup %5284 }
 0x5d9   : > { %3213 = vmatpush.msrb.mxu0 %v1889_v8  ;;  %9505 = vst [vmem:[#allocation114_spill] sm:$0xff] %v7719_v35  ;;  %4883 = vmatpush.msrb.mxu3 %v1890_v5  ;;  %v7732_v63 = vpop.eup %5286  ;;  %v7740_v5 = vld [vmem:[#allocation2 + $0x60] sm:$0xff] }
 0x5da   : > { %3626 = vst.msk [vmem:[#allocation2 + $0xb8] sm:$0xff] %vm3169_vm2, %v7693_v38  ;;  %4884 = vmatpush.msra.mxu1 %v1889_v8 }
 0x5db   : > { %3613 = vst.msk [vmem:[#allocation2 + $0x50] sm:$0xff] %vm3169_vm2, %v7697_v48  ;;  %3214 = vmatpush.msrb.mxu0 %v1888_v54  ;;  %4885 = vmatpush.msrb.mxu3 %v1889_v8 }
 0x5dc   : > { %2785 = vperm.xlu2 %5257, %v7593_v3   ;;  %4886 = vmatpush.msra.mxu1 %v1888_v54  ;;  %v7755_v23 = vpop.eup %5288 }
 0x5dd   : > { %2850 = vperm.xlu1 %5258, %v7589_v25   ;;  %3215 = vmatpush.msrb.mxu0 %v1887_v58  ;;  %v7759_v3 = vpop.eup %5290 }
 0x5de   : > { %4888 = vmatpush.msra.mxu1 %v1887_v58  ;;  %4887 = vmatpush.msrb.mxu3 %v1888_v54  ;;  %v2701_v54 = vmul.f32 1.442695, %v2663_v31  ;;  %9506 = vst [vmem:[#allocation115_spill] sm:$0xff] %v7759_v3  ;;  %v2677_v31 = vsub.f32 %v7605_v6, %v7614_v16  ;;  %v2665_v6 = vsub.f32 %v7635_v27, %v7643_v62 }
 0x5df   : > { %v2610_v36 = vpop.xlane.xlu0 %2609  ;;  %v2584_v34 = vpop.xlane.xlu2 %2583  ;;  %3216 = vmatpush.msrb.mxu0 %v1886_v40 }
 0x5e0   : > { %v7722_v39 = vmax.f32 %v7712_v41, %v2610_v36  ;;  %3369 = vperm.xlu0 %5259, %v7719_v35   ;;  %v7726_v56 = vmax.f32 %v7714_v12, %v2584_v34  ;;  %4890 = vmatpush.msra.mxu1 %v1886_v40  ;;  %v7738_v34 = vld [vmem:[#allocation2 + $0xc8] sm:$0xff]  ;;  %v2676_v35 = vsub.f32 %v7581_v53, %v7589_v25  ;;  %5292 = vpow2.f32 %v2701_v54 }
 0x5e1   : > { %3217 = vmatpush.msrb.mxu0 %v1885_v4  ;;  %4889 = vmatpush.msrb.mxu3 %v1887_v58  ;;  %v2664_v53 = vsub.f32 %v7607_v24, %v7618_v61 }
 0x5e2   : > { %3627 = vst.msk [vmem:[#allocation2 + $0xc0] sm:$0xff] %vm3169_vm2, %v7722_v39  ;;  %4892 = vmatpush.msra.mxu1 %v1885_v4  ;;  %v2727_v58 = vmul.f32 1.442695, %v2676_v35 }
 0x5e3   : > { %3614 = vst.msk [vmem:[#allocation2 + $0x58] sm:$0xff] %vm3169_vm2, %v7726_v56  ;;  %4891 = vmatpush.msrb.mxu3 %v1886_v40 }
 0x5e4   : > { %3434 = vperm.xlu2 %5257, %v7732_v63   ;;  %5294 = vpow2.f32 %v2727_v58 }
 0x5e5   : > { %2790 = vperm.xlu1 %5258, %v7618_v61   ;;  %4893 = vmatpush.msrb.mxu3 %v1885_v4  ;;  %v2729_v4 = vmul.f32 1.442695, %v2677_v31 }
 0x5e6   : > { %v7775_v35 = vpop.eup %5292 }
 0x5e7   : > { %v2612_v42 = vpop.xlane.xlu1 %2611  ;;  %v2586_v36 = vpop.xlane.xlu0 %2585 }
 0x5e8   : > { %v7745_v8 = vmax.f32 %v7738_v34, %v2612_v42  ;;  %2855 = vperm.xlu0 %5259, %v7614_v16   ;;  %v7749_v9 = vmax.f32 %v7740_v5, %v2586_v36  ;;  %v2703_v42 = vmul.f32 1.442695, %v2664_v53  ;;  %v7781_v36 = vld [vmem:[#allocation2 + $0xd8] sm:$0xff] }
 0x5ea   : > { %3628 = vst.msk [vmem:[#allocation2 + $0xc8] sm:$0xff] %vm3169_vm2, %v7745_v8  ;;  %v7783_v54 = vpop.eup %5294  ;;  %5296 = vpow2.f32 %v2703_v42 }
 0x5eb   : > { %3615 = vst.msk [vmem:[#allocation2 + $0x60] sm:$0xff] %vm3169_vm2, %v7749_v9 }
 0x5ec   : > { %3374 = vperm.xlu2 %5257, %v7755_v23  }
 0x5ed   : > { %3439 = vperm.xlu1 %5258, %v7759_v3  }
 0x5ef   : > { %v2614_v40 = vpop.xlane.xlu2 %2613 }
 0x5f0   : > { %v7766_v25 = vmax.f32 %v7763_v20, %v2614_v40  ;;  %2795 = vperm.xlu0 %5259, %v7643_v62   ;;  %v7798_v16 = vpop.eup %5296  ;;  %v2679_v62 = vsub.f32 %v7658_v49, %v7666_v15 }
 0x5f1   : > { %9507 = vst [vmem:[#allocation116_spill] sm:$0xff] %v7798_v16 }
 0x5f2   : > { %3629 = vst.msk [vmem:[#allocation2 + $0xd0] sm:$0xff] %vm3169_vm2, %v7766_v25 }
 0x5f4   : > { %2860 = vperm.xlu2 %5257, %v7639_v30  }
 0x5f5   : > { %3379 = vperm.xlu1 %5258, %v7775_v35  }
 0x5f7   : > { %v2756_v24 = vpop.permute.xlu2 %2755  ;;  %v2616_v61 = vpop.xlane.xlu0 %2615 }
 0x5f8   : > { %v2913_v58 = vsub.f32 %v7321_v32, %v2756_v24  ;;  %v7787_v40 = vmax.f32 %v7781_v36, %v2616_v61  ;;  %3444 = vperm.xlu0 %5259, %v7783_v54   ;;  %v2678_v32 = vsub.f32 %v7633_v52, %v7639_v30  ;;  %v2666_v30 = vsub.f32 %v7660_v44, %v7670_v14 }
 0x5f9   : > { %v2733_v44 = vmul.f32 1.442695, %v2679_v62 }
 0x5fa   : > { %v2945_v3 = vmul.f32 1.442695, %v2913_v58  ;;  %3630 = vst.msk [vmem:[#allocation2 + $0xd8] sm:$0xff] %vm3169_vm2, %v7787_v40  ;;  %v2707_v61 = vmul.f32 1.442695, %v2666_v30 }
 0x5fc   : > { %5298 = vpow2.f32 %v2945_v3  ;;  %2800 = vperm.xlu2 %5257, %v7670_v14   ;;  %v2705_v3 = vmul.f32 1.442695, %v2665_v6 }
 0x5fd   : > { %5300 = vpow2.f32 %v2729_v4  ;;  %2865 = vperm.xlu1 %5258, %v7666_v15   ;;  %v2731_v4 = vmul.f32 1.442695, %v2678_v32 }
 0x5fe   : > { %5302 = vpow2.f32 %v2705_v3 }
 0x5ff   : > { %v7800_v53 = vpop.permute.xlu1 %2820  ;;  %v7802_v31 = vpop.permute.xlu2 %3354  ;;  %5304 = vpow2.f32 %v2731_v4 }
 0x600   : > { %3384 = vperm.xlu0 %5259, %v7798_v16   ;;  %5306 = vpow2.f32 %v2707_v61  ;;  %v2681_v61 = vsub.f32 %v7712_v41, %v7722_v39 }
 0x602   : > { %v7805_v42 = vpop.eup %5298 }
 0x603   : > { %v7807_v24 = vpop.eup %5300  ;;  %3218 = vmatmul.f32.vlgmr.msrb.gmra.mxu0 %v7805_v42 }
 0x604   : > { %3449 = vperm.xlu2 %5257, %v7807_v24   ;;  %v7821_v6 = vpop.eup %5302 }
 0x605   : > { %2805 = vperm.xlu1 %5258, %v7697_v48   ;;  %v7824_v3 = vpop.eup %5304 }
 0x606   : > { %9508 = vst [vmem:[#allocation117_spill] sm:$0xff] %v7824_v3  ;;  %v7837_v49 = vpop.eup %5306 }
 0x607   : > { %v7814_v52 = vpop.permute.xlu1 %2895  ;;  %v7816_v27 = vpop.permute.xlu2 %2830  ;;  %9509 = vst [vmem:[#allocation118_spill] sm:$0xff] %v7837_v49 }
 0x608   : > { %2870 = vperm.xlu0 %5259, %v7693_v38  }
 0x60a   : > { %v2761_v58 = vpop.permute.xlu0 %2760 }
 0x60b   : > { %v2914_v32 = vsub.f32 %v7331_v17, %v2761_v58  ;;  %v2667_v17 = vsub.f32 %v7687_v55, %v7697_v48 }
 0x60c   : > { %3389 = vperm.xlu2 %5257, %v7821_v6  }
 0x60d   : > { %v2947_v14 = vmul.f32 1.442695, %v2914_v32  ;;  %3454 = vperm.xlu1 %5258, %v7824_v3   ;;  %v2709_v62 = vmul.f32 1.442695, %v2667_v17  ;;  %v2737_v17 = vmul.f32 1.442695, %v2681_v61 }
 0x60f   : > { %5308 = vpow2.f32 %v2947_v14  ;;  %v7828_v4 = vpop.permute.xlu1 %3349  ;;  %v7830_v16 = vpop.permute.xlu2 %2905 }
 0x610   : > { %2810 = vperm.xlu0 %5259, %v7726_v56   ;;  %5310 = vpow2.f32 %v2733_v44  ;;  %v9510_v44 = vsub.f32 %v7685_v0, %v7693_v38  ;;  %v2669_v0 = vsub.f32 %v7740_v5, %v7749_v9 }
 0x611   : > { %5312 = vpow2.f32 %v2709_v62 }
 0x612   : > { %v7835_v15 = vpop.permute.xlu0 %2825  ;;  %v2735_v14 = vmul.f32 1.442695, %v9510_v44 }
 0x614   : > { %2875 = vperm.xlu2 %5257, %v7722_v39  }
 0x615   : > { %v7840_v30 = vpop.eup %5308  ;;  %3394 = vperm.xlu1 %5258, %v7837_v49  }
 0x616   : > { %3221 = vmatmul.f32.gmra.mxu0 %v7840_v30  ;;  %v7846_v58 = vpop.eup %5310 }
 0x617   : > { %v2766_v32 = vpop.permute.xlu1 %2765  ;;  %v2771_v55 = vpop.permute.xlu2 %2770 }
 0x618   : > { %v2915_v48 = vsub.f32 %v7350_v45, %v2766_v32  ;;  %3459 = vperm.xlu0 %5259, %v7846_v58   ;;  %v2916_v41 = vsub.f32 %v7363_v59, %v2771_v55  ;;  %v2668_v45 = vsub.f32 %v7714_v12, %v7726_v56  ;;  %v7862_v38 = vpop.eup %5312  ;;  %v2682_v59 = vsub.f32 %v7738_v34, %v7745_v8 }
 0x619   : > { %v2713_v56 = vmul.f32 1.442695, %v2669_v0  ;;  %v2684_v34 = vsub.f32 %v7781_v36, %v7787_v40 }
 0x61a   : > { %v2949_v49 = vmul.f32 1.442695, %v2915_v48  ;;  %v7853_v3 = vpop.permute.xlu0 %2900  ;;  %v2711_v61 = vmul.f32 1.442695, %v2668_v45 }
 0x61c   : > { %5314 = vpow2.f32 %v2949_v49  ;;  %2815 = vperm.xlu2 %5257, %v7749_v9   ;;  %v2951_v49 = vmul.f32 1.442695, %v2916_v41  ;;  %v2739_v9 = vmul.f32 1.442695, %v2682_v59 }
 0x61d   : > { %5316 = vpow2.f32 %v2735_v14  ;;  %2880 = vperm.xlu1 %5258, %v7745_v8   ;;  %v2743_v14 = vmul.f32 1.442695, %v2684_v34 }
 0x61e   : > { %5318 = vpow2.f32 %v2737_v17 }
 0x61f   : > { %v7864_v39 = vpop.permute.xlu1 %2835  ;;  %v7866_v62 = vpop.permute.xlu2 %3419  ;;  %5320 = vpow2.f32 %v2951_v49 }
 0x620   : > { %9511 = vst [vmem:[#allocation119_spill] sm:$0xff] %v7866_v62  ;;  %3399 = vperm.xlu0 %5259, %v7862_v38   ;;  %5322 = vpow2.f32 %v2711_v61  ;;  %v9518_v61 = vsub.f32 %v7763_v20, %v7766_v25 }
 0x621   : > { %5324 = vpow2.f32 %v2713_v56 }
 0x622   : > { %v7871_v12 = vpop.eup %5314  ;;  %v7873_v32 = vpop.permute.xlu0 %3414  ;;  %5326 = vpow2.f32 %v2739_v9  ;;  %v2741_v56 = vmul.f32 1.442695, %v9518_v61 }
 0x623   : > { %9512 = vst [vmem:[#allocation120_spill] sm:$0xff] %v7873_v32  ;;  %v7875_v55 = vpop.eup %5316  ;;  %3224 = vmatmul.f32.vlgmr.msra.gmra.mxu1 %v7871_v12  ;;  %5328 = vpow2.f32 %v2743_v14 }
 0x624   : > { %v7878_v5 = vpop.eup %5318  ;;  %3464 = vperm.xlu2 %5257, %v7875_v55  }
 0x625   : > { %3469 = vperm.xlu1 %5258, %v7878_v5   ;;  %v7889_v44 = vpop.eup %5320 }
 0x626   : > { %v7893_v41 = vpop.eup %5322 }
 0x627   : > { %v7884_v8 = vpop.permute.xlu1 %2910  ;;  %v7886_v48 = vpop.permute.xlu2 %3494 }
 0x628   : > { %9513 = vst [vmem:[#allocation121_spill] sm:$0xff] %v7886_v48  ;;  %2885 = vperm.xlu0 %5259, %v7766_v25   ;;  %v7896_v45 = vpop.eup %5324 }
 0x629   : > { %9515 = vst [vmem:[#allocation123_spill] sm:$0xff] %v7896_v45  ;;  %v7900_v36 = vpop.eup %5326 }
 0x62a   : > { %v7891_v17 = vpop.permute.xlu0 %3489  ;;  %9516 = vst [vmem:[#allocation124_spill] sm:$0xff] %v7900_v36 }
 0x62b   : > { %9514 = vst [vmem:[#allocation122_spill] sm:$0xff] %v7891_v17  ;;  %3227 = vmatmul.f32.gmra.mxu1 %v7889_v44  ;;  %v7911_v17 = vpop.eup %5328 }
 0x62c   : > { %3404 = vperm.xlu2 %5257, %v7893_v41   ;;  %9519 = vst [vmem:[#allocation126_spill] sm:$0xff] %v7911_v17 }
 0x62d   : > { %3409 = vperm.xlu1 %5258, %v7896_v45   ;;  %v2927_v45 = vsub.f32 %v7341_v2, %v7835_v15 }
 0x62f   : > { %v7902_v0 = vpop.permute.xlu1 %3424  ;;  %v2776_v49 = vpop.permute.xlu2 %2775 }
 0x630   : > { %9517 = vst [vmem:[#allocation125_spill] sm:$0xff] %v7902_v0  ;;  %v2917_v59 = vsub.f32 %v7371_v47, %v2776_v49  ;;  %3474 = vperm.xlu0 %5259, %v7900_v36  }
 0x632   : > { %v2953_v9 = vmul.f32 1.442695, %v2917_v59  ;;  %v7909_v34 = vpop.permute.xlu0 %3359 }
 0x634   : > { %5330 = vpow2.f32 %v2953_v9  ;;  %2890 = vperm.xlu2 %5257, %v7787_v40  }
 0x635   : > { %5332 = vpow2.f32 %v2741_v56  ;;  %3484 = vperm.xlu1 %5258, %v7911_v17  }
 0x637   : > { %v7915_v14 = vpop.permute.xlu1 %3499  ;;  %v7917_v47 = vpop.permute.xlu2 %2845 }
 0x638   : > { %9520 = vst [vmem:[#allocation127_spill] sm:$0xff] %v7915_v14 }
 0x63a   : > { %v7919_v49 = vpop.eup %5330  ;;  %v7921_v0 = vpop.permute.xlu0 %2840 }
 0x63b   : > { %v7923_v20 = vpop.eup %5332  ;;  %3230 = vmatmul.f32.gmra.mxu1 %v7919_v49 }
 0x63c   : > { %9521 = vst [vmem:[#allocation128_spill] sm:$0xff] %v7923_v20  ;;  %3479 = vperm.xlu2 %5257, %v7923_v20  }
 0x63f   : > { %v7927_v25 = vpop.permute.xlu1 %3364  ;;  %v2786_v40 = vpop.permute.xlu2 %2785 }
 0x640   : > { %v2919_v48 = vsub.f32 %v7403_v22, %v2786_v40 }
 0x642   : > { %v7929_v59 = vpop.permute.xlu0 %3429  ;;  %v2957_v36 = vmul.f32 1.442695, %v2919_v48 }
 0x643   : > { %9522 = vst [vmem:[#allocation129_spill] sm:$0xff] %v7929_v59 }
 0x647   : > { %v2781_v61 = vpop.permute.xlu1 %2780  ;;  %v7931_v56 = vpop.permute.xlu2 %3434 }
 0x648   : > { %9523 = vst [vmem:[#allocation130_spill] sm:$0xff] %v7931_v56  ;;  %v2918_v9 = vsub.f32 %v7394_v46, %v2781_v61  ;;  %v2926_v46 = vsub.f32 %v7328_v19, %v7800_v53  ;;  %v2973_v61 = vmul.f32 1.442695, %v2927_v45  ;;  %v2941_v53 = vsub.f32 %v7339_v10, %v7814_v52 }
 0x64a   : > { %v2955_v14 = vmul.f32 1.442695, %v2918_v9  ;;  %v7934_v17 = vpop.permute.xlu0 %3504  ;;  %v2971_v22 = vmul.f32 1.442695, %v2926_v46  ;;  %v2942_v9 = vsub.f32 %v7352_v29, %v7853_v3 }
 0x64b   : > { %9524 = vst [vmem:[#allocation131_spill] sm:$0xff] %v7934_v17 }
 0x64c   : > { %5334 = vpow2.f32 %v2955_v14  ;;  %v3003_v45 = vmul.f32 1.442695, %v2942_v9 }
 0x64d   : > { %5336 = vpow2.f32 %v2957_v36 }
 0x64e   : > { %5338 = vpow2.f32 %v2973_v61 }
 0x64f   : > { %v7937_v32 = vpop.permute.xlu1 %2850  ;;  %v7939_v62 = vpop.permute.xlu2 %3374  ;;  %5340 = vpow2.f32 %v2971_v22  ;;  %v2943_v22 = vsub.f32 %v7365_v13, %v7830_v16  ;;  %v2944_v13 = vsub.f32 %v7390_v28, %v7884_v8 }
 0x651   : > { %v3005_v9 = vmul.f32 1.442695, %v2943_v22 }
 0x652   : > { %v7943_v59 = vpop.eup %5334  ;;  %v7945_v20 = vpop.permute.xlu0 %3369 }
 0x653   : > { %3233 = vmatmul.f32.gmra.mxu1 %v7943_v59  ;;  %v7954_v48 = vpop.eup %5336 }
 0x654   : > { %v7962_v29 = vpop.eup %5338 }
 0x655   : > { %v7969_v36 = vpop.eup %5340 }
 0x657   : > { %v2791_v14 = vpop.permute.xlu1 %2790  ;;  %v2861_v40 = vpop.permute.xlu2 %2860 }
 0x658   : > { %v2920_v2 = vsub.f32 %v7413_v18, %v2791_v14  ;;  %v2934_v15 = vsub.f32 %v7425_v37, %v2861_v40  ;;  %v2928_v18 = vsub.f32 %v7355_v57, %v7816_v27  ;;  %v3001_v37 = vmul.f32 1.442695, %v2941_v53 }
 0x659   : > { %v2929_v57 = vsub.f32 %v7379_v26, %v7864_v39  ;;  %v2930_v39 = vsub.f32 %v7382_v7, %v7921_v0  ;;  %v3007_v7 = vmul.f32 1.442695, %v2944_v13  ;;  %v3315_v13 = vld [vmem:[#allocation4 + $0xb0] sm:$0xff] }
 0x65a   : > { %v2959_v17 = vmul.f32 1.442695, %v2920_v2  ;;  %v2987_v56 = vmul.f32 1.442695, %v2934_v15  ;;  %3073 = vadd.xlane.f32.xlu0 %v7805_v42  ;;  %v7957_v19 = vpop.permute.xlu0 %2855  ;;  %v2975_v52 = vmul.f32 1.442695, %v2928_v18 }
 0x65b   : > { %3236 = vmatmul.f32.gmra.mxu1 %v7954_v48  ;;  %v2977_v14 = vmul.f32 1.442695, %v2929_v57  ;;  %v2979_v15 = vmul.f32 1.442695, %v2930_v39 }
 0x65c   : > { %5342 = vpow2.f32 %v2959_v17 }
 0x65d   : > { %5344 = vpow2.f32 %v2987_v56 }
 0x65e   : > { %5346 = vpow2.f32 %v3003_v45 }
 0x65f   : > { %v7966_v3 = vpop.permute.xlu1 %3439  ;;  %v2801_v42 = vpop.permute.xlu2 %2800  ;;  %3101 = vadd.xlane.f32.xlu1 %v7962_v29  ;;  %5348 = vpow2.f32 %v3001_v37 }
 0x660   : > { %5350 = vpow2.f32 %v2975_v52  ;;  %v2922_v40 = vsub.f32 %v7433_v1, %v2801_v42 }
 0x662   : > { %v7971_v10 = vpop.eup %5342  ;;  %3099 = vadd.xlane.f32.xlu0 %v7969_v36  ;;  %v2796_v17 = vpop.permute.xlu0 %2795  ;;  %v2963_v1 = vmul.f32 1.442695, %v2922_v40 }
 0x663   : > { %v7974_v56 = vpop.eup %5344  ;;  %v2921_v27 = vsub.f32 %v7423_v51, %v2796_v17  ;;  %3239 = vmatmul.f32.gmra.mxu1 %v7971_v10 }
 0x664   : > { %3281 = vmatmul.f32.vlgmr.msrb.gmra.mxu3 %v7974_v56  ;;  %v7982_v61 = vpop.eup %5346 }
 0x665   : > { %v2961_v46 = vmul.f32 1.442695, %v2921_v27  ;;  %3075 = vadd.xlane.f32.xlu2 %v7840_v30  ;;  %v7994_v30 = vpop.eup %5348  ;;  %v2933_v27 = vsub.f32 %v7415_v21, %v7957_v19  ;;  %v9527_v19 = vld [vmem:[#allocation97_spill] sm:$0xff] }
 0x666   : > { %v8001_v16 = vpop.eup %5350 }
 0x667   : > { %5352 = vpow2.f32 %v2961_v46  ;;  %v7987_v26 = vpop.permute.xlu1 %3379  ;;  %v7989_v51 = vpop.permute.xlu2 %3449  ;;  %3131 = vadd.xlane.f32.xlu1 %v7982_v61  ;;  %v2985_v21 = vmul.f32 1.442695, %v2933_v27 }
 0x668   : > { %9525 = vst [vmem:[#allocation132_spill] sm:$0xff] %v7989_v51  ;;  %5354 = vpow2.f32 %v2977_v14  ;;  %v3343_v51 = vld [vmem:[#allocation4 + $0xa0] sm:$0xff] }
 0x669   : > { %5356 = vpow2.f32 %v3005_v9 }
 0x66a   : > { %3129 = vadd.xlane.f32.xlu0 %v7994_v30  ;;  %v7997_v2 = vpop.permute.xlu0 %3444  ;;  %5358 = vpow2.f32 %v2963_v1 }
 0x66b   : > { %9526 = vst [vmem:[#allocation133_spill] sm:$0xff] %v7997_v2  ;;  %5360 = vpow2.f32 %v2979_v15  ;;  %v3507_v15 = vmul.f32 %v7828_v4, %v3315_v13 }
 0x66c   : > { %5362 = vpow2.f32 %v3007_v7 }
 0x66d   : > { %v8003_v53 = vpop.eup %5352  ;;  %3103 = vadd.xlane.f32.xlu2 %v8001_v16 }
 0x66e   : > { %3242 = vmatmul.f32.gmra.mxu1 %v8003_v53  ;;  %v8011_v8 = vpop.eup %5354 }
 0x66f   : > { %v2866_v0 = vpop.permute.xlu1 %2865  ;;  %v8007_v45 = vpop.permute.xlu2 %3389  ;;  %3077 = vadd.xlane.f32.xlu1 %v7871_v12 }
 0x670   : > { %v2935_v28 = vsub.f32 %v7435_v33, %v2866_v0  ;;  %v8016_v42 = vpop.eup %5356  ;;  %v2931_v33 = vsub.f32 %v7392_v11, %v7917_v47  ;;  %v2932_v47 = vsub.f32 %v7405_v60, %v7937_v32 }
 0x671   : > { %v8018_v52 = vpop.eup %5358 }
 0x672   : > { %v2989_v18 = vmul.f32 1.442695, %v2935_v28  ;;  %3105 = vadd.xlane.f32.xlu0 %v8011_v8  ;;  %v8014_v37 = vpop.permute.xlu0 %3384  ;;  %v8021_v17 = vpop.eup %5360  ;;  %v2981_v40 = vmul.f32 1.442695, %v2931_v33  ;;  %v2983_v7 = vmul.f32 1.442695, %v2932_v47 }
 0x673   : > { %v8030_v22 = vpop.eup %5362  ;;  %v9528_v33 = vld [vmem:[#allocation96_spill] sm:$0xff] }
 0x674   : > { %5364 = vpow2.f32 %v2989_v18 }
 0x675   : > { %3133 = vadd.xlane.f32.xlu2 %v8016_v42 }
 0x676   : > { %3245 = vmatmul.f32.gmra.mxu1 %v8018_v52 }
 0x677   : > { %v2806_v12 = vpop.permute.xlu1 %2805  ;;  %v2876_v57 = vpop.permute.xlu2 %2875  ;;  %3107 = vadd.xlane.f32.xlu1 %v8021_v17 }
 0x678   : > { %v2923_v46 = vsub.f32 %v7443_v43, %v2806_v12  ;;  %v2937_v1 = vsub.f32 %v9527_v19, %v2876_v57 }
 0x67a   : > { %v8032_v14 = vpop.eup %5364  ;;  %v2965_v39 = vmul.f32 1.442695, %v2923_v46  ;;  %3135 = vadd.xlane.f32.xlu0 %v8030_v22  ;;  %v2871_v11 = vpop.permute.xlu0 %2870  ;;  %v2993_v18 = vmul.f32 1.442695, %v2937_v1  ;;  %v9529_v46 = vld [vmem:[#allocation98_spill] sm:$0xff]  ;;  %v9530_v1 = vld [vmem:[#allocation99_spill] sm:$0xff] }
 0x67b   : > { %v2936_v9 = vsub.f32 %v7445_v50, %v2871_v11  ;;  %3284 = vmatmul.f32.gmra.mxu3 %v8032_v14 }
 0x67c   : > { %5366 = vpow2.f32 %v2965_v39 }
 0x67d   : > { %v2991_v43 = vmul.f32 1.442695, %v2936_v9  ;;  %3079 = vadd.xlane.f32.xlu2 %v7889_v44  ;;  %5368 = vpow2.f32 %v2981_v40 }
 0x67f   : > { %5370 = vpow2.f32 %v2991_v43  ;;  %v8042_v0 = vpop.permute.xlu1 %3454  ;;  %v2816_v60 = vpop.permute.xlu2 %2815  ;;  %3083 = vadd.xlane.f32.xlu1 %v7943_v59  ;;  %v3316_v43 = vld [vmem:[#allocation4] sm:$0xff] }
 0x680   : > { %5372 = vpow2.f32 %v2985_v21  ;;  %v3219_v50 = vpop.f32.mrf.mxu0  ;;  %v2925_v40 = vsub.f32 %v9529_v46, %v2816_v60 }
 0x681   : > { %v3539_v32 = vadd.f32 %v3507_v15, %v3219_v50  ;;  %5374 = vpow2.f32 %v2983_v7  ;;  %v3508_v7 = vmul.f32 %v7802_v31, %v3316_v43 }
 0x682   : > { %v8045_v28 = vpop.eup %5366  ;;  %3081 = vadd.xlane.f32.xlu0 %v7919_v49  ;;  %v2811_v44 = vpop.permute.xlu0 %2810  ;;  %5376 = vpow2.f32 %v2993_v18  ;;  %v2969_v9 = vmul.f32 1.442695, %v2925_v40 }
 0x683   : > { %3571 = vst [vmem:[#allocation4 + $0xb0] sm:$0xff] %v3539_v32  ;;  %v2924_v4 = vsub.f32 %v9528_v33, %v2811_v44  ;;  %3248 = vmatmul.f32.gmra.mxu1 %v8045_v28  ;;  %v8050_v12 = vpop.eup %5368  ;;  %v9531_v33 = vld [vmem:[#allocation100_spill] sm:$0xff] }
 0x685   : > { %v5371_v57 = vpop.eup %5370  ;;  %v2967_v27 = vmul.f32 1.442695, %v2924_v4  ;;  %3109 = vadd.xlane.f32.xlu2 %v8050_v12 }
 0x686   : > { %v8053_v59 = vpop.eup %5372  ;;  %3287 = vmatmul.f32.gmra.mxu3 %v5371_v57 }
 0x687   : > { %5378 = vpow2.f32 %v2967_v27  ;;  %v8056_v49 = vpop.permute.xlu1 %3394  ;;  %3113 = vadd.xlane.f32.xlu1 %v8053_v59  ;;  %v8059_v39 = vpop.permute.xlu2 %3464  ;;  %v3317_v27 = vld [vmem:[#allocation4 + $0xd8] sm:$0xff] }
 0x688   : > { %v8061_v11 = vpop.eup %5374  ;;  %5380 = vpow2.f32 %v2969_v9  ;;  %v3509_v40 = vmul.f32 %v7909_v34, %v3317_v27 }
 0x689   : > { %v5377_v13 = vpop.eup %5376 }
 0x68a   : > { %3111 = vadd.xlane.f32.xlu0 %v8061_v11  ;;  %v8064_v47 = vpop.permute.xlu0 %3459 }
 0x68d   : > { %v5379_v21 = vpop.eup %5378  ;;  %3085 = vadd.xlane.f32.xlu2 %v7954_v48 }
 0x68e   : > { %3251 = vmatmul.f32.gmra.mxu1 %v5379_v21  ;;  %3290 = vmatmul.f32.gmra.mxu3 %v5377_v13  ;;  %v5381_v44 = vpop.eup %5380 }
 0x68f   : > { %v2881_v19 = vpop.permute.xlu1 %2880  ;;  %3089 = vadd.xlane.f32.xlu1 %v8003_v53  ;;  %v8070_v50 = vpop.permute.xlu2 %3404 }
 0x690   : > { %v2938_v15 = vsub.f32 %v9530_v1, %v2881_v19  ;;  %v3318_v19 = vld [vmem:[#allocation4 + $0x18] sm:$0xff] }
 0x692   : > { %v2995_v60 = vmul.f32 1.442695, %v2938_v15  ;;  %3087 = vadd.xlane.f32.xlu0 %v7971_v10  ;;  %v8073_v32 = vpop.permute.xlu0 %3399 }
 0x693   : > { %v3222_v18 = vpop.f32.mrf.mxu0 }
 0x694   : > { %5382 = vpow2.f32 %v2995_v60  ;;  %v3540_v48 = vadd.f32 %v3508_v7, %v3222_v18 }
 0x695   : > { %3115 = vadd.xlane.f32.xlu2 %v7974_v56  ;;  %v9532_v56 = vld [vmem:[#allocation101_spill] sm:$0xff] }
 0x696   : > { %3572 = vst [vmem:[#allocation4] sm:$0xff] %v3540_v48  ;;  %3254 = vmatmul.f32.gmra.mxu1 %v5381_v44 }
 0x697   : > { %3119 = vadd.xlane.f32.xlu1 %v5371_v57  ;;  %v2891_v10 = vpop.permute.xlu2 %2890  ;;  %v8086_v15 = vpop.permute.xlu1 %3469 }
 0x698   : > { %v2940_v9 = vsub.f32 %v9532_v56, %v2891_v10  ;;  %v3012_v56 = vld [vmem:[#allocation3 + $0x18] sm:$0xff] }
 0x69a   : > { %v5383_v53 = vpop.eup %5382  ;;  %3117 = vadd.xlane.f32.xlu0 %v8032_v14  ;;  %v2886_v31 = vpop.permute.xlu0 %2885  ;;  %v2999_v14 = vmul.f32 1.442695, %v2940_v9  ;;  %v9534_v9 = vld [vmem:[#allocation106_spill] sm:$0xff] }
 0x69b   : > { %v2939_v4 = vsub.f32 %v9531_v33, %v2886_v31  ;;  %3293 = vmatmul.f32.gmra.mxu3 %v5383_v53  ;;  %v3037_v31 = vld [vmem:[#allocation3 + $0xe0] sm:$0xff]  ;;  %v3038_v33 = vld [vmem:[#allocation3 + $0xe8] sm:$0xff] }
 0x69d   : > { %v2997_v46 = vmul.f32 1.442695, %v2939_v4  ;;  %3091 = vadd.xlane.f32.xlu2 %v8018_v52  ;;  %v3011_v4 = vld [vmem:[#allocation3 + $0x10] sm:$0xff] }
 0x69e   : > { %3257 = vmatmul.f32.gmra.mxu1 %v7969_v36  ;;  %v3510_v36 = vmul.f32 %v7927_v25, %v3318_v19 }
 0x69f   : > { %5384 = vpow2.f32 %v2997_v46  ;;  %3095 = vadd.xlane.f32.xlu1 %v5379_v21  ;;  %v8093_v7 = vpop.permute.xlu1 %3409  ;;  %v8105_v27 = vpop.permute.xlu2 %3479  ;;  %v3025_v46 = vld [vmem:[#allocation3 + $0x80] sm:$0xff] }
 0x6a0   : > { %v3225_v57 = vpop.f32.mrf.mxu1  ;;  %5386 = vpow2.f32 %v2999_v14  ;;  %v3027_v14 = vld [vmem:[#allocation3 + $0x90] sm:$0xff] }
 0x6a1   : > { %v3541_v43 = vadd.f32 %v3509_v40, %v3225_v57  ;;  %v3026_v40 = vld [vmem:[#allocation3 + $0x88] sm:$0xff]  ;;  %v3039_v57 = vld [vmem:[#allocation3 + $0xf0] sm:$0xff] }
 0x6a2   : > { %3093 = vadd.xlane.f32.xlu0 %v8045_v28  ;;  %v3319_v28 = vld [vmem:[#allocation4 + $0x50] sm:$0xff] }
 0x6a3   : > { %3573 = vst [vmem:[#allocation4 + $0xd8] sm:$0xff] %v3541_v43  ;;  %v3511_v25 = vmul.f32 %v7945_v20, %v3319_v28  ;;  %v9533_v20 = vld [vmem:[#allocation103_spill] sm:$0xff]  ;;  %v3013_v43 = vld [vmem:[#allocation3 + $0x20] sm:$0xff]  ;;  %v9536_v28 = vld [vmem:[#allocation102_spill] sm:$0xff] }
 0x6a5   : > { %v5385_v1 = vpop.eup %5384  ;;  %3121 = vadd.xlane.f32.xlu2 %v5377_v13 }
 0x6a6   : > { %3260 = vmatmul.f32.gmra.mxu1 %v7962_v29  ;;  %3296 = vmatmul.f32.gmra.mxu3 %v5385_v1  ;;  %v5387_v21 = vpop.eup %5386 }
 0x6a7   : > { %3125 = vadd.xlane.f32.xlu1 %v5385_v1  ;;  %v8099_v60 = vpop.permute.xlu1 %3484  ;;  %v3040_v1 = vld [vmem:[#allocation3 + $0xf8] sm:$0xff] }
 0x6a8   : > { %v3228_v34 = vpop.f32.mrf.mxu1 }
 0x6a9   : > { %v3542_v52 = vadd.f32 %v3510_v36, %v3228_v34  ;;  %v3028_v36 = vld [vmem:[#allocation3 + $0x98] sm:$0xff] }
 0x6aa   : > { %3123 = vadd.xlane.f32.xlu0 %v5383_v53  ;;  %v3010_v53 = vld [vmem:[#allocation3 + $0x8] sm:$0xff] }
 0x6ab   : > { %3574 = vst [vmem:[#allocation4 + $0x18] sm:$0xff] %v3542_v52  ;;  %v9535_v52 = vld [vmem:[#allocation104_spill] sm:$0xff] }
 0x6ad   : > { %3097 = vadd.xlane.f32.xlu2 %v5381_v44 }
 0x6ae   : > { %3263 = vmatmul.f32.gmra.mxu1 %v8001_v16  ;;  %3299 = vmatmul.f32.gmra.mxu3 %v5387_v21  ;;  %v8095_v16 = vpop.permute.xlu0 %3474 }
 0x6b5   : > { %3127 = vadd.xlane.f32.xlu2 %v5387_v21 }
 0x6b6   : > { %3266 = vmatmul.f32.gmra.mxu1 %v8011_v8  ;;  %3302 = vmatmul.f32.gmra.mxu3 %v7994_v30  ;;  %v3009_v8 = vld [vmem:[#allocation3] sm:$0xff]  ;;  %v3320_v30 = vld [vmem:[#allocation4 + $0x68] sm:$0xff] }
 0x6b7   : > { %v3041_v18 = vmul.f32 %v9533_v20, %v3009_v8  ;;  %v3029_v8 = vld [vmem:[#allocation3 + $0xa0] sm:$0xff]  ;;  %v3016_v20 = vld [vmem:[#allocation3 + $0x38] sm:$0xff] }
 0x6b8   : > { %v3231_v29 = vpop.f32.mrf.mxu1 }
 0x6b9   : > { %v3543_v13 = vadd.f32 %v3511_v25, %v3231_v29  ;;  %v3042_v25 = vmul.f32 %v9536_v28, %v3010_v53  ;;  %v9537_v29 = vld [vmem:[#allocation105_spill] sm:$0xff]  ;;  %v9543_v28 = vld [vmem:[#allocation110_spill] sm:$0xff] }
 0x6ba   : > { %v3030_v53 = vld [vmem:[#allocation3 + $0xa8] sm:$0xff] }
 0x6bb   : > { %3575 = vst [vmem:[#allocation4 + $0x50] sm:$0xff] %v3543_v13  ;;  %v8112_v13 = vmul.f32 %v9537_v29, %v3037_v31  ;;  %v8129_v29 = vmul.f32 %v9543_v28, %v3039_v57  ;;  %v9546_v57 = vld [vmem:[#allocation115_spill] sm:$0xff]  ;;  %v3033_v28 = vld [vmem:[#allocation3 + $0xc0] sm:$0xff] }
 0x6be   : > { %3269 = vmatmul.f32.gmra.mxu1 %v8021_v17  ;;  %3305 = vmatmul.f32.gmra.mxu3 %v7982_v61  ;;  %v3023_v61 = vld [vmem:[#allocation3 + $0x70] sm:$0xff]  ;;  %v3022_v17 = vld [vmem:[#allocation3 + $0x68] sm:$0xff] }
 0x6bf   : > { %v3054_v21 = vmul.f32 %v9535_v52, %v3022_v17  ;;  %v3017_v17 = vld [vmem:[#allocation3 + $0x40] sm:$0xff] }
 0x6c6   : > { %3272 = vmatmul.f32.gmra.mxu1 %v8050_v12  ;;  %3308 = vmatmul.f32.gmra.mxu3 %v8016_v42  ;;  %v3512_v12 = vmul.f32 %v7939_v62, %v3320_v30  ;;  %v3024_v42 = vld [vmem:[#allocation3 + $0x78] sm:$0xff]  ;;  %v3014_v62 = vld [vmem:[#allocation3 + $0x28] sm:$0xff]  ;;  %v3015_v30 = vld [vmem:[#allocation3 + $0x30] sm:$0xff] }
 0x6cd   : > { %v3074_v48 = vpop.xlane.xlu0 %3073 }
 0x6ce   : > { %v3137_v44 = vadd.f32 %v3074_v48, %v3041_v18  ;;  %3275 = vmatmul.f32.gmra.mxu1 %v8061_v11  ;;  %3311 = vmatmul.f32.gmra.mxu3 %v8030_v22  ;;  %v3055_v22 = vmul.f32 %v9534_v9, %v3023_v61  ;;  %v3321_v18 = vld [vmem:[#allocation4 + $0x30] sm:$0xff]  ;;  %v9538_v48 = vld [vmem:[#allocation109_spill] sm:$0xff]  ;;  %v9539_v61 = vld [vmem:[#allocation107_spill] sm:$0xff] }
 0x6d0   : > { %3170 = vst.msk [vmem:[#allocation3] sm:$0xff] %vm3169_vm2, %v3137_v44  ;;  %v3234_v10 = vpop.f32.mrf.mxu1  ;;  %v3070_v44 = vmul.f32 %v9538_v48, %v3038_v33  ;;  %v8132_v33 = vmul.f32 %v7732_v63, %v3026_v40  ;;  %v3032_v48 = vld [vmem:[#allocation3 + $0xb8] sm:$0xff]  ;;  %v3019_v40 = vld [vmem:[#allocation3 + $0x50] sm:$0xff] }
 0x6d1   : > { %v3544_v11 = vadd.f32 %v3512_v12, %v3234_v10  ;;  %v8116_v12 = vmul.f32 %v9539_v61, %v3024_v42  ;;  %v9540_v10 = vld [vmem:[#allocation108_spill] sm:$0xff]  ;;  %v9544_v42 = vld [vmem:[#allocation114_spill] sm:$0xff]  ;;  %v3018_v61 = vld [vmem:[#allocation3 + $0x48] sm:$0xff] }
 0x6d2   : > { %v3102_v19 = vpop.xlane.xlu1 %3101  ;;  %v8119_v9 = vmul.f32 %v9540_v10, %v3011_v4  ;;  %v8135_v4 = vmul.f32 %v9544_v42, %v3013_v43  ;;  %v3020_v63 = vld [vmem:[#allocation3 + $0x58] sm:$0xff]  ;;  %v3513_v43 = vmul.f32 %v7987_v26, %v3321_v18  ;;  %v8162_v26 = vmul.f32 %v7821_v6, %v3017_v17  ;;  %v3328_v18 = vld [vmem:[#allocation4 + $0xf0] sm:$0xff]  ;;  %v3345_v17 = vld [vmem:[#allocation4 + $0x20] sm:$0xff] }
 0x6d3   : > { %3576 = vst [vmem:[#allocation4 + $0x68] sm:$0xff] %v3544_v11  ;;  %v3151_v34 = vadd.f32 %v3102_v19, %v3055_v22  ;;  %v9541_v11 = vld [vmem:[#allocation111_spill] sm:$0xff]  ;;  %v9542_v19 = vld [vmem:[#allocation112_spill] sm:$0xff] }
 0x6d4   : > { %v8122_v22 = vmul.f32 %v9541_v11, %v3012_v56  ;;  %v8126_v52 = vmul.f32 %v9542_v19, %v3025_v46  ;;  %v3031_v56 = vld [vmem:[#allocation3 + $0xb0] sm:$0xff]  ;;  %v8142_v46 = vmul.f32 %v7755_v23, %v3014_v62  ;;  %v8145_v19 = vmul.f32 %v9546_v57, %v3027_v14  ;;  %v3034_v62 = vld [vmem:[#allocation3 + $0xc8] sm:$0xff]  ;;  %v3344_v57 = vld [vmem:[#allocation4 + $0xf8] sm:$0xff] }
 0x6d5   : > { %3184 = vst.msk [vmem:[#allocation3 + $0x70] sm:$0xff] %vm3169_vm2, %v3151_v34  ;;  %v3100_v31 = vpop.xlane.xlu0 %3099  ;;  %v9545_v34 = vld [vmem:[#allocation113_spill] sm:$0xff]  ;;  %v3035_v23 = vld [vmem:[#allocation3 + $0xd0] sm:$0xff]  ;;  %v3330_v6 = vld [vmem:[#allocation4 + $0x78] sm:$0xff] }
 0x6d6   : > { %v3150_v10 = vadd.f32 %v3100_v31, %v3054_v21  ;;  %3278 = vmatmul.f32.gmra.mxu1 %v8053_v59  ;;  %v8139_v11 = vmul.f32 %v9545_v34, %v3040_v1  ;;  %v8151_v21 = vmul.f32 %v7807_v24, %v3029_v8  ;;  %v8154_v59 = vmul.f32 %v7783_v54, %v3028_v36  ;;  %v3329_v14 = vld [vmem:[#allocation4 + $0x8] sm:$0xff]  ;;  %v9550_v24 = vld [vmem:[#allocation116_spill] sm:$0xff] }
 0x6d7   : > { %v8148_v42 = vld [vmem:[#allocation3] sm:$0xff]  ;;  %v8157_v1 = vmul.f32 %v7775_v35, %v3015_v30  ;;  %v8165_v8 = vmul.f32 %v9550_v24, %v3016_v20  ;;  %v9551_v54 = vld [vmem:[#allocation117_spill] sm:$0xff]  ;;  %v3036_v30 = vld [vmem:[#allocation3 + $0xd8] sm:$0xff] }
 0x6d8   : > { %9547 = vst [vmem:[#allocation97_spill] sm:$0xff] %v8151_v21  ;;  %v3237_v31 = vpop.f32.mrf.mxu1  ;;  %v3076_v34 = vpop.xlane.xlu2 %3075  ;;  %5388 = vrcp.f32 %v8148_v42  ;;  %v8168_v36 = vmul.f32 %v9551_v54, %v3030_v53  ;;  %v3021_v35 = vld [vmem:[#allocation3 + $0x60] sm:$0xff]  ;;  %v3331_v20 = vld [vmem:[#allocation4 + $0x38] sm:$0xff]  ;;  %v8177_v53 = vmul.f32 %v7875_v55, %v3032_v48  ;;  %v8180_v54 = vmul.f32 %v7893_v41, %v3020_v63 }
 0x6d9   : > { %9548 = vst [vmem:[#allocation96_spill] sm:$0xff] %v8154_v59  ;;  %v3545_v2 = vadd.f32 %v3513_v43, %v3237_v31  ;;  %v9553_v59 = vld [vmem:[#allocation118_spill] sm:$0xff]  ;;  %v9557_v48 = vld [vmem:[#allocation123_spill] sm:$0xff]  ;;  %vm3672_vm4 = vweird.f32 %v8148_v42 }
 0x6da   : > { %9549 = vst [vmem:[#allocation98_spill] sm:$0xff] %v8157_v1  ;;  %v8171_v1 = vmul.f32 %v7846_v58, %v3031_v56  ;;  %v8174_v21 = vmul.f32 %v9553_v59, %v3018_v61  ;;  %v3132_v24 = vpop.xlane.xlu1 %3131  ;;  %v3332_v58 = vld [vmem:[#allocation4 + $0x58] sm:$0xff]  ;;  %v3333_v56 = vld [vmem:[#allocation4 + $0x40] sm:$0xff]  ;;  %v8195_v41 = vmul.f32 %v9557_v48, %v3021_v35  ;;  %v9563_v35 = vld [vmem:[#allocation122_spill] sm:$0xff] }
 0x6db   : > { %3183 = vst.msk [vmem:[#allocation3 + $0x68] sm:$0xff] %vm3169_vm2, %v3150_v10  ;;  %v3138_v10 = vadd.f32 %v3076_v34, %v3042_v25  ;;  %v8186_v25 = vmul.f32 %v7878_v5, %v3033_v28  ;;  %v3323_v61 = vld [vmem:[#allocation4 + $0x80] sm:$0xff]  ;;  %v3166_v43 = vadd.f32 %v3132_v24, %v3070_v44  ;;  %v9558_v63 = vld [vmem:[#allocation119_spill] sm:$0xff]  ;;  %v9560_v28 = vld [vmem:[#allocation121_spill] sm:$0xff] }
 0x6dc   : > { %9552 = vst [vmem:[#allocation99_spill] sm:$0xff] %v8168_v36  ;;  %v8183_v36 = vmul.f32 %v7862_v38, %v3019_v40  ;;  %v9555_v59 = vld [vmem:[#allocation128_spill] sm:$0xff]  ;;  %v8198_v38 = vmul.f32 %v9558_v63, %v3329_v14  ;;  %v3336_v44 = vld [vmem:[#allocation4 + $0x90] sm:$0xff]  ;;  %v9565_v14 = vld [vmem:[#allocation125_spill] sm:$0xff] }
 0x6dd   : > { %9554 = vst [vmem:[#allocation100_spill] sm:$0xff] %v8186_v25  ;;  %v8189_v31 = vmul.f32 %v9555_v59, %v3035_v23  ;;  %v9556_v34 = vld [vmem:[#allocation124_spill] sm:$0xff]  ;;  %v8204_v25 = vmul.f32 %v9560_v28, %v3344_v57  ;;  %v8207_v23 = vld [vmem:[#allocation3 + $0x70] sm:$0xff]  ;;  %v8213_v59 = vmul.f32 %v9563_v35, %v3343_v51  ;;  %v3324_v57 = vld [vmem:[#allocation4 + $0x88] sm:$0xff] }
 0x6de   : > { %3577 = vst [vmem:[#allocation4 + $0x30] sm:$0xff] %v3545_v2  ;;  %v8192_v55 = vmul.f32 %v9556_v34, %v3034_v62  ;;  %v9559_v40 = vld [vmem:[#allocation120_spill] sm:$0xff]  ;;  %v3322_v2 = vld [vmem:[#allocation4 + $0x48] sm:$0xff]  ;;  %v9562_v62 = vld [vmem:[#allocation126_spill] sm:$0xff]  ;;  %v8216_v34 = vmul.f32 %v9565_v14, %v3330_v6  ;;  %5390 = vrcp.f32 %v8207_v23  ;;  %v8223_v28 = vpop.eup %5388  ;;  %v8232_v6 = vmul.f32 %v7966_v3, %v3333_v56 }
 0x6df   : > { %v8201_v5 = vmul.f32 %v9559_v40, %v3328_v18  ;;  %9561 = vst [vmem:[#allocation101_spill] sm:$0xff] %v8204_v25  ;;  %v8210_v24 = vmul.f32 %v9562_v62, %v3036_v30  ;;  %v9566_v18 = vld [vmem:[#allocation127_spill] sm:$0xff]  ;;  %v3338_v63 = vld [vmem:[#allocation4 + $0xc0] sm:$0xff]  ;;  %v3337_v40 = vld [vmem:[#allocation4 + $0x70] sm:$0xff]  ;;  %v3528_v25 = vmul.f32 %v8042_v0, %v3336_v44  ;;  %v8245_v3 = vmul.f32 %v8056_v49, %v3324_v57 }
 0x6e0   : > { %3171 = vst.msk [vmem:[#allocation3 + $0x8] sm:$0xff] %vm3169_vm2, %v3138_v10  ;;  %v8219_v48 = vmul.f32 %v9566_v18, %v3345_v17  ;;  %v3130_v10 = vpop.xlane.xlu0 %3129  ;;  %v9568_v30 = vld [vmem:[#allocation129_spill] sm:$0xff]  ;;  %v9569_v51 = vld [vmem:[#allocation130_spill] sm:$0xff]  ;;  %v3326_v17 = vld [vmem:[#allocation4 + $0xb8] sm:$0xff]  ;;  %v8248_v56 = vmul.f32 %v8059_v39, %v3338_v63  ;;  %v3104_v0 = vpop.xlane.xlu2 %3103  ;;  %vm3673_vm3 = vweird.f32 %v8223_v28  ;;  %vm3882_vm8 = vweird.f32 %v8207_v23 }
 0x6e1   : > { %9564 = vst [vmem:[#allocation103_spill] sm:$0xff] %v8213_v59  ;;  %v8226_v62 = vmul.f32 %v9568_v30, %v3331_v20  ;;  %v8229_v35 = vmul.f32 %v9569_v51, %v3332_v58  ;;  %v3325_v14 = vld [vmem:[#allocation4 + $0xe8] sm:$0xff]  ;;  %v3165_v18 = vadd.f32 %v3130_v10, %v8112_v13  ;;  %v3327_v20 = vld [vmem:[#allocation4 + $0x60] sm:$0xff]  ;;  %v3668_v58 = vmul.f32 %v8223_v28, %v8148_v42  ;;  %vm3674_vm5 = vmor %vm3672_vm4, %vm3673_vm3 }
 0x6e2   : > { %9567 = vst [vmem:[#allocation106_spill] sm:$0xff] %v8219_v48  ;;  %v3514_v48 = vmul.f32 %v8014_v37, %v3322_v2  ;;  %v3339_v59 = vld [vmem:[#allocation4 + $0xa8] sm:$0xff]  ;;  %v3240_v37 = vpop.f32.mrf.mxu1  ;;  %v8256_v13 = vmul.f32 %v8070_v50, %v3326_v17  ;;  %v3340_v2 = vld [vmem:[#allocation4 + $0xd0] sm:$0xff]  ;;  %v3152_v49 = vadd.f32 %v3104_v0, %v8116_v12  ;;  %v8260_v39 = vmul.f32 %v8073_v32, %v3325_v14  ;;  %v3078_v10 = vpop.xlane.xlu1 %3077 }
 0x6e3   : > { %3199 = vst.msk [vmem:[#allocation3 + $0xe8] sm:$0xff] %vm3169_vm2, %v3166_v43  ;;  %v8236_v43 = vmul.f32 %v8007_v45, %v3323_v61  ;;  %v8242_v30 = vld [vmem:[#allocation3 + $0x68] sm:$0xff]  ;;  %v8251_v45 = vmul.f32 %v8064_v47, %v3337_v40  ;;  %v3341_v61 = vld [vmem:[#allocation4 + $0x10] sm:$0xff]  ;;  %v3669_v57 = vsub.f32 1.0, %v3668_v58  ;;  %v8263_v47 = vmul.f32 %v8086_v15, %v3339_v59 }
 0x6e4   : > { %3198 = vst.msk [vmem:[#allocation3 + $0xe0] sm:$0xff] %vm3169_vm2, %v3165_v18  ;;  %5392 = vrcp.f32 %v8242_v30  ;;  %v3546_v44 = vadd.f32 %v3514_v48, %v3240_v37  ;;  %v8266_v63 = vmul.f32 %v8093_v7, %v3327_v20  ;;  %v3342_v40 = vld [vmem:[#allocation4 + $0x28] sm:$0xff]  ;;  %v3678_v50 = vand.u32 2147483648, %v8148_v42  ;;  %v8269_v51 = vpop.eup %5390 }
 0x6e5   : > { %v3139_v48 = vadd.f32 %v3078_v10, %v8119_v9  ;;  %v3670_v12 = vmul.f32 %v8223_v28, %v3669_v57  ;;  %v3676_v32 = vand.u32 2147483647, %v8148_v42  ;;  %v8278_v7 = vmul.f32 %v8105_v27, %v3341_v61  ;;  %3185 = vst.msk [vmem:[#allocation3 + $0x78] sm:$0xff] %vm3169_vm2, %v3152_v49 }
 0x6e6   : > { %3578 = vst [vmem:[#allocation4 + $0x48] sm:$0xff] %v3546_v44  ;;  %v8281_v59 = vmul.f32 %v8095_v16, %v3340_v2  ;;  %v3878_v17 = vmul.f32 %v8269_v51, %v8207_v23  ;;  %v8288_v9 = vmul.f32 %v8099_v60, %v3342_v40  ;;  %v3886_v16 = vand.u32 2147483647, %v8207_v23 }
 0x6e7   : > { %v8275_v15 = vld [vmem:[#allocation3 + $0x8] sm:$0xff]  ;;  %3172 = vst.msk [vmem:[#allocation3 + $0x10] sm:$0xff] %vm3169_vm2, %v3139_v48  ;;  %v3671_v18 = vadd.f32 %v8223_v28, %v3670_v12  ;;  %v3679_v58 = vor.u32 1.1754944e-38, %v3678_v50  ;;  %v3888_v60 = vand.u32 2147483648, %v8207_v23  ;;  %v3282_v0 = vpop.f32.mrf.mxu3  ;;  %vm3677_vm6 = vcmp.eq.f32.partialorder %v3676_v32, 8.507059e+37 }
 0x6e8   : > { %5394 = vrcp.f32 %v8275_v15  ;;  %v3106_v14 = vpop.xlane.xlu0 %3105  ;;  %v3879_v37 = vsub.f32 1.0, %v3878_v17  ;;  %vm3883_vm7 = vweird.f32 %v8269_v51  ;;  %v3134_v44 = vpop.xlane.xlu2 %3133  ;;  %vm8311_vm9 = vcmp.eq.f32.partialorder %v3886_v16, 8.507059e+37 }
 0x6e9   : > { %v3153_v20 = vadd.f32 %v3106_v14, %v8126_v52  ;;  %v3675_v61 = vsel %vm3674_vm5, %v8223_v28, %v3671_v18  ;;  %v3560_v52 = vadd.f32 %v3528_v25, %v3282_v0  ;;  %v3167_v40 = vadd.f32 %v3134_v44, %v8129_v29  ;;  %vm3884_vm10 = vmor %vm3882_vm8, %vm3883_vm7 }
 0x6ea   : > { %v8294_v27 = vpop.eup %5392  ;;  %v3680_v49 = vsel %vm3677_vm6, %v3679_v58, %v3675_v61  ;;  %v3880_v57 = vmul.f32 %v8269_v51, %v3879_v37  ;;  %v3108_v25 = vpop.xlane.xlu1 %3107  ;;  %v3889_v12 = vor.u32 1.1754944e-38, %v3888_v60  ;;  %v3871_v32 = vand.u32 2147483647, %v8242_v30 }
 0x6eb   : > { %v3863_v42 = vmul.f32 %v8294_v27, %v8242_v30  ;;  %v8304_v2 = vld [vmem:[#allocation3 + $0xe0] sm:$0xff]  ;;  %3186 = vst.msk [vmem:[#allocation3 + $0x80] sm:$0xff] %vm3169_vm2, %v3153_v20  ;;  %4181 = vperm.xlu2 %5257, %v3680_v49   ;;  %v3873_v17 = vand.u32 2147483648, %v8242_v30  ;;  %v3154_v29 = vadd.f32 %v3108_v25, %v8132_v33  ;;  %v3243_v23 = vpop.f32.mrf.mxu1  ;;  %vm3868_vm11 = vweird.f32 %v8294_v27 }
 0x6ec   : > { %5396 = vrcp.f32 %v8304_v2  ;;  %3592 = vst [vmem:[#allocation4 + $0x90] sm:$0xff] %v3560_v52  ;;  %v3881_v48 = vadd.f32 %v8269_v51, %v3880_v57  ;;  %v8326_v18 = vld [vmem:[#allocation3 + $0x78] sm:$0xff]  ;;  %v3693_v16 = vand.u32 2147483648, %v8275_v15  ;;  %v3547_v20 = vadd.f32 %v8236_v43, %v3243_v23 }
 0x6ed   : > { %v3864_v10 = vsub.f32 1.0, %v3863_v42  ;;  %3200 = vst.msk [vmem:[#allocation3 + $0xf0] sm:$0xff] %vm3169_vm2, %v3167_v40  ;;  %v4096_v37 = vand.u32 2147483647, %v8304_v2  ;;  %5398 = vrcp.f32 %v8326_v18  ;;  %vm3867_vm12 = vweird.f32 %v8242_v30 }
 0x6ee   : > { %v8315_v50 = vpop.eup %5394  ;;  %v3885_v58 = vsel %vm3884_vm10, %v8269_v51, %v3881_v48  ;;  %v8333_v33 = vld [vmem:[#allocation3 + $0x10] sm:$0xff]  ;;  %3187 = vst.msk [vmem:[#allocation3 + $0x88] sm:$0xff] %vm3169_vm2, %v3154_v29  ;;  %vm3869_vm13 = vmor %vm3867_vm12, %vm3868_vm11  ;;  %v3874_v52 = vor.u32 1.1754944e-38, %v3873_v17  ;;  %v4098_v44 = vand.u32 2147483648, %v8304_v2  ;;  %vm3872_vm14 = vcmp.eq.f32.partialorder %v3871_v32, 8.507059e+37 }
 0x6ef   : > { %v3865_v14 = vmul.f32 %v8294_v27, %v3864_v10  ;;  %v3890_v0 = vsel %vm8311_vm9, %v3889_v12, %v3885_v58  ;;  %v3683_v43 = vmul.f32 %v8315_v50, %v8275_v15  ;;  %3579 = vst [vmem:[#allocation4 + $0x80] sm:$0xff] %v3547_v20  ;;  %5400 = vrcp.f32 %v8333_v33 }
 0x6f0   : > { %v3136_v60 = vpop.xlane.xlu0 %3135  ;;  %4251 = vperm.xlu0 %5259, %v3890_v0   ;;  %v3691_v57 = vand.u32 2147483647, %v8275_v15  ;;  %vm4092_vm15 = vweird.f32 %v8304_v2  ;;  %vm8357_vm0 = vcmp.eq.f32.partialorder %v4096_v37, 8.507059e+37  ;;  %v8361_v25 = vor.u32 1.1754944e-38, %v3693_v16 }
 0x6f1   : > { %v3866_v61 = vadd.f32 %v8294_v27, %v3865_v14  ;;  %v3168_v42 = vadd.f32 %v3136_v60, %v8139_v11  ;;  %v3080_v11 = vpop.xlane.xlu2 %3079  ;;  %v3901_v12 = vand.u32 2147483647, %v8326_v18  ;;  %v3684_v32 = vsub.f32 1.0, %v3683_v43 }
 0x6f2   : > { %v8342_v51 = vpop.eup %5396  ;;  %v8353_v40 = vld [vmem:[#allocation3 + $0x80] sm:$0xff]  ;;  %v3084_v29 = vpop.xlane.xlu1 %3083  ;;  %v4099_v23 = vor.u32 1.1754944e-38, %v4098_v44  ;;  %vm3897_vm1 = vweird.f32 %v8326_v18  ;;  %v3903_v14 = vand.u32 2147483648, %v8326_v18  ;;  %vm3687_vm3 = vweird.f32 %v8275_v15 }
 0x6f3   : > { %v3870_v49 = vsel %vm3869_vm13, %v8294_v27, %v3866_v61  ;;  %v4088_v30 = vmul.f32 %v8342_v51, %v8304_v2  ;;  %3201 = vst.msk [vmem:[#allocation3 + $0xf8] sm:$0xff] %vm3169_vm2, %v3168_v42  ;;  %v3140_v27 = vadd.f32 %v3080_v11, %v8122_v22  ;;  %v8365_v17 = vpop.eup %5398  ;;  %5402 = vrcp.f32 %v8353_v40  ;;  %v3246_v16 = vpop.f32.mrf.mxu1 }
 0x6f4   : > { %v3875_v28 = vsel %vm3872_vm14, %v3874_v52, %v3870_v49  ;;  %v3142_v22 = vadd.f32 %v3084_v29, %v8142_v46  ;;  %vm4093_vm4 = vweird.f32 %v8342_v51  ;;  %v3893_v58 = vmul.f32 %v8365_v17, %v8326_v18 }
 0x6f5   : > { %4246 = vperm.xlu1 %5258, %v3875_v28   ;;  %v4089_v48 = vsub.f32 1.0, %v4088_v30  ;;  %3173 = vst.msk [vmem:[#allocation3 + $0x18] sm:$0xff] %vm3169_vm2, %v3140_v27  ;;  %v8377_v37 = vpop.eup %5400  ;;  %v3548_v60 = vadd.f32 %v8245_v3, %v3246_v16  ;;  %vm3702_vm5 = vweird.f32 %v8333_v33  ;;  %v3706_v0 = vand.u32 2147483647, %v8333_v33  ;;  %v8383_v43 = vld [vmem:[#allocation3 + $0x88] sm:$0xff]  ;;  %vm4094_vm7 = vmor %vm4092_vm15, %vm4093_vm4 }
 0x6f6   : > { %v3685_v61 = vmul.f32 %v8315_v50, %v3684_v32  ;;  %3175 = vst.msk [vmem:[#allocation3 + $0x28] sm:$0xff] %vm3169_vm2, %v3142_v22  ;;  %v3894_v52 = vsub.f32 1.0, %v3893_v58  ;;  %vm8387_vm6 = vcmp.eq.f32.partialorder %v3901_v12, 8.507059e+37  ;;  %v3698_v3 = vmul.f32 %v8377_v37, %v8333_v33  ;;  %v9580_v58 = vld [vmem:[#allocation97_spill] sm:$0xff] }
 0x6f7   : > { %v4090_v20 = vmul.f32 %v8342_v51, %v4089_v48  ;;  %3580 = vst [vmem:[#allocation4 + $0x88] sm:$0xff] %v3548_v60  ;;  %v3904_v30 = vor.u32 1.1754944e-38, %v3903_v14  ;;  %v3708_v11 = vand.u32 2147483648, %v8333_v33  ;;  %vm8399_vm8 = vcmp.eq.f32.partialorder %v3691_v57, 8.507059e+37 }
 0x6f8   : > { %v3082_v46 = vpop.xlane.xlu0 %3081  ;;  %5404 = vrcp.f32 %v8383_v43  ;;  %v3895_v48 = vmul.f32 %v8365_v17, %v3894_v52  ;;  %vm3898_vm9 = vweird.f32 %v8365_v17  ;;  %vm8412_vm10 = vcmp.eq.f32.partialorder %v3706_v0, 8.507059e+37 }
 0x6f9   : > { %v4091_v42 = vadd.f32 %v8342_v51, %v4090_v20  ;;  %v3141_v49 = vadd.f32 %v3082_v46, %v8135_v4  ;;  %v3699_v4 = vsub.f32 1.0, %v3698_v3  ;;  %v8407_v12 = vpop.eup %5402  ;;  %v3110_v2 = vpop.xlane.xlu2 %3109  ;;  %v3686_v29 = vadd.f32 %v8315_v50, %v3685_v61  ;;  %vm3899_vm13 = vmor %vm3897_vm1, %vm3898_vm9 }
 0x6fa   : > { %vm3688_vm11 = vweird.f32 %v8315_v50  ;;  %v3896_v14 = vadd.f32 %v8365_v17, %v3895_v48  ;;  %vm3703_vm12 = vweird.f32 %v8377_v37  ;;  %v3114_v16 = vpop.xlane.xlu1 %3113  ;;  %v3709_v10 = vor.u32 1.1754944e-38, %v3708_v11  ;;  %v9583_v11 = vld [vmem:[#allocation96_spill] sm:$0xff] }
 0x6fb   : > { %v4095_v27 = vsel %vm4094_vm7, %v8342_v51, %v4091_v42  ;;  %3174 = vst.msk [vmem:[#allocation3 + $0x20] sm:$0xff] %vm3169_vm2, %v3141_v49  ;;  %v3155_v51 = vadd.f32 %v3110_v2, %v8145_v19  ;;  %v3700_v22 = vmul.f32 %v8377_v37, %v3699_v4  ;;  %vm3912_vm14 = vweird.f32 %v8353_v40  ;;  %vm8440_vm15 = vmor %vm3687_vm3, %vm3688_vm11 }
 0x6fc   : > { %v4100_v57 = vsel %vm8357_vm0, %v4099_v23, %v4095_v27  ;;  %v3908_v23 = vmul.f32 %v8407_v12, %v8353_v40  ;;  %v3916_v19 = vand.u32 2147483647, %v8353_v40  ;;  %v8430_v20 = vld [vmem:[#allocation3 + $0x18] sm:$0xff]  ;;  %v3157_v60 = vadd.f32 %v3114_v16, %v9580_v58  ;;  %vm3704_vm0 = vmor %vm3702_vm5, %vm3703_vm12  ;;  %v9586_v16 = vld [vmem:[#allocation98_spill] sm:$0xff] }
 0x6fd   : > { %4321 = vperm.xlu1 %5258, %v4100_v57   ;;  %3188 = vst.msk [vmem:[#allocation3 + $0x90] sm:$0xff] %vm3169_vm2, %v3155_v51  ;;  %v3900_v0 = vsel %vm3899_vm13, %v8365_v17, %v3896_v14  ;;  %v3701_v61 = vadd.f32 %v8377_v37, %v3700_v22  ;;  %v3918_v46 = vand.u32 2147483648, %v8353_v40  ;;  %v3690_v15 = vsel %vm8440_vm15, %v8315_v50, %v3686_v29  ;;  %v8457_v3 = vld [vmem:[#allocation3 + $0x28] sm:$0xff] }
 0x6fe   : > { %v8445_v42 = vpop.eup %5404  ;;  %v3905_v52 = vsel %vm8387_vm6, %v3904_v30, %v3900_v0  ;;  %v3909_v17 = vsub.f32 1.0, %v3908_v23  ;;  %5406 = vrcp.f32 %v8430_v20  ;;  %3190 = vst.msk [vmem:[#allocation3 + $0xa0] sm:$0xff] %vm3169_vm2, %v3157_v60  ;;  %vm3927_vm1 = vweird.f32 %v8383_v43  ;;  %v3285_v27 = vpop.f32.mrf.mxu3 }
 0x6ff   : > { %4256 = vperm.xlu2 %5257, %v3905_v52   ;;  %v3705_v44 = vsel %vm3704_vm0, %v8377_v37, %v3701_v61  ;;  %v3923_v30 = vmul.f32 %v8445_v42, %v8383_v43  ;;  %v3931_v33 = vand.u32 2147483647, %v8383_v43  ;;  %v3933_v4 = vand.u32 2147483648, %v8383_v43 }
 0x700   : > { %v3112_v49 = vpop.xlane.xlu0 %3111  ;;  %v3710_v48 = vsel %vm8412_vm10, %v3709_v10, %v3705_v44  ;;  %v3910_v2 = vmul.f32 %v8407_v12, %v3909_v17  ;;  %v3561_v57 = vadd.f32 %v8251_v45, %v3285_v27  ;;  %v3695_v37 = vsel %vm8399_vm8, %v8361_v25, %v3690_v15  ;;  %v3249_v22 = vpop.f32.mrf.mxu1 }
 0x701   : > { %v3156_v50 = vadd.f32 %v3112_v49, %v9583_v11  ;;  %4191 = vperm.xlu0 %5259, %v3710_v48   ;;  %v3924_v29 = vsub.f32 1.0, %v3923_v30  ;;  %vm8474_vm3 = vcmp.eq.f32.partialorder %v3916_v19, 8.507059e+37  ;;  %5408 = vrcp.f32 %v8457_v3  ;;  %v3086_v14 = vpop.xlane.xlu2 %3085 }
 0x702   : > { %v8479_v32 = vld [vmem:[#allocation3 + $0x20] sm:$0xff]  ;;  %v3911_v45 = vadd.f32 %v8407_v12, %v3910_v2  ;;  %vm3913_vm4 = vweird.f32 %v8407_v12  ;;  %v3721_v28 = vand.u32 2147483647, %v8430_v20  ;;  %v3723_v25 = vand.u32 2147483648, %v8430_v20  ;;  %3593 = vst [vmem:[#allocation4 + $0x70] sm:$0xff] %v3561_v57  ;;  %v3090_v60 = vpop.xlane.xlu1 %3089 }
 0x703   : > { %3189 = vst.msk [vmem:[#allocation3 + $0x98] sm:$0xff] %vm3169_vm2, %v3156_v50  ;;  %v3143_v10 = vadd.f32 %v3086_v14, %v9586_v16  ;;  %v3549_v23 = vadd.f32 %v8260_v39, %v3249_v22  ;;  %v3925_v19 = vmul.f32 %v8445_v42, %v3924_v29  ;;  %vm3928_vm5 = vweird.f32 %v8445_v42  ;;  %vm8506_vm7 = vmor %vm3912_vm14, %vm3913_vm4  ;;  %v9595_v22 = vld [vmem:[#allocation99_spill] sm:$0xff] }
 0x704   : > { %v8490_v58 = vpop.eup %5406  ;;  %vm8492_vm6 = vcmp.eq.f32.partialorder %v3931_v33, 8.507059e+37  ;;  %v3934_v61 = vor.u32 1.1754944e-38, %v3933_v4  ;;  %v3919_v18 = vor.u32 1.1754944e-38, %v3918_v46  ;;  %5410 = vrcp.f32 %v8479_v32  ;;  %v8497_v52 = vld [vmem:[#allocation3 + $0x90] sm:$0xff]  ;;  %vm3929_vm8 = vmor %vm3927_vm1, %vm3928_vm5 }
 0x705   : > { %4186 = vperm.xlu1 %5258, %v3695_v37   ;;  %3176 = vst.msk [vmem:[#allocation3 + $0x30] sm:$0xff] %vm3169_vm2, %v3143_v10  ;;  %v3145_v39 = vadd.f32 %v3090_v60, %v8162_v26  ;;  %v3926_v15 = vadd.f32 %v8445_v42, %v3925_v19  ;;  %v3713_v46 = vmul.f32 %v8490_v58, %v8430_v20  ;;  %v3751_v49 = vand.u32 2147483647, %v8457_v3  ;;  %v8531_v27 = vld [vmem:[#allocation3 + $0xa0] sm:$0xff] }
 0x706   : > { %3581 = vst [vmem:[#allocation4 + $0xe8] sm:$0xff] %v3549_v23  ;;  %vm3717_vm9 = vweird.f32 %v8430_v20  ;;  %vm8518_vm10 = vcmp.eq.f32.partialorder %v3721_v28, 8.507059e+37  ;;  %v3724_v40 = vor.u32 1.1754944e-38, %v3723_v25  ;;  %v3753_v44 = vand.u32 2147483648, %v8457_v3 }
 0x707   : > { %v8523_v30 = vpop.eup %5408  ;;  %3178 = vst.msk [vmem:[#allocation3 + $0x40] sm:$0xff] %vm3169_vm2, %v3145_v39  ;;  %v3930_v11 = vsel %vm3929_vm8, %v8445_v42, %v3926_v15  ;;  %v3915_v43 = vsel %vm8506_vm7, %v8407_v12, %v3911_v45  ;;  %v3714_v50 = vsub.f32 1.0, %v3713_v46  ;;  %5412 = vrcp.f32 %v8497_v52 }
 0x708   : > { %v3088_v33 = vpop.xlane.xlu0 %3087  ;;  %v3935_v4 = vsel %vm8492_vm6, %v3934_v61, %v3930_v11  ;;  %v3743_v2 = vmul.f32 %v8523_v30, %v8457_v3  ;;  %vm3747_vm11 = vweird.f32 %v8457_v3  ;;  %vm3718_vm12 = vweird.f32 %v8490_v58 }
 0x709   : > { %v3144_v48 = vadd.f32 %v3088_v33, %v8165_v8  ;;  %4266 = vperm.xlu0 %5259, %v3935_v4   ;;  %v3715_v42 = vmul.f32 %v8490_v58, %v3714_v50  ;;  %vm8541_vm13 = vcmp.eq.f32.partialorder %v3751_v49, 8.507059e+37  ;;  %vm3732_vm14 = vweird.f32 %v8479_v32  ;;  %v3116_v57 = vpop.xlane.xlu2 %3115  ;;  %v3288_v28 = vpop.f32.mrf.mxu3  ;;  %vm3719_vm15 = vmor %vm3717_vm9, %vm3718_vm12 }
 0x70a   : > { %v8546_v8 = vpop.eup %5410  ;;  %v3920_v37 = vsel %vm8474_vm3, %v3919_v18, %v3915_v43  ;;  %v3744_v29 = vsub.f32 1.0, %v3743_v2  ;;  %v3754_v14 = vor.u32 1.1754944e-38, %v3753_v44  ;;  %5414 = vrcp.f32 %v8531_v27  ;;  %v3120_v19 = vpop.xlane.xlu1 %3119  ;;  %v8571_v20 = vld [vmem:[#allocation3 + $0x98] sm:$0xff] }
 0x70b   : > { %3177 = vst.msk [vmem:[#allocation3 + $0x38] sm:$0xff] %vm3169_vm2, %v3144_v48  ;;  %v3158_v45 = vadd.f32 %v3116_v57, %v9595_v22  ;;  %v3716_v25 = vadd.f32 %v8490_v58, %v3715_v42  ;;  %v3728_v16 = vmul.f32 %v8546_v8, %v8479_v32  ;;  %v3736_v10 = vand.u32 2147483647, %v8479_v32  ;;  %v3252_v18 = vpop.f32.mrf.mxu1 }
 0x70c   : > { %v3562_v23 = vadd.f32 %v8248_v56, %v3288_v28  ;;  %v3745_v51 = vmul.f32 %v8523_v30, %v3744_v29  ;;  %vm3748_vm0 = vweird.f32 %v8523_v30  ;;  %v3738_v60 = vand.u32 2147483648, %v8479_v32  ;;  %v8609_v42 = vld [vmem:[#allocation3 + $0x30] sm:$0xff] }
 0x70d   : > { %4261 = vperm.xlu1 %5258, %v3920_v37   ;;  %v8565_v0 = vpop.eup %5412  ;;  %3191 = vst.msk [vmem:[#allocation3 + $0xa8] sm:$0xff] %vm3169_vm2, %v3158_v45  ;;  %v3160_v61 = vadd.f32 %v3120_v19, %v8177_v53  ;;  %v3720_v56 = vsel %vm3719_vm15, %v8490_v58, %v3716_v25  ;;  %v3729_v39 = vsub.f32 1.0, %v3728_v16  ;;  %v3948_v15 = vand.u32 2147483648, %v8497_v52  ;;  %vm3749_vm1 = vmor %vm3747_vm11, %vm3748_vm0 }
 0x70e   : > { %3594 = vst [vmem:[#allocation4 + $0xc0] sm:$0xff] %v3562_v23  ;;  %v3550_v17 = vadd.f32 %v8256_v13, %v3252_v18  ;;  %v3725_v46 = vsel %vm8518_vm10, %v3724_v40, %v3720_v56  ;;  %v3746_v49 = vadd.f32 %v8523_v30, %v3745_v51  ;;  %v3938_v44 = vmul.f32 %v8565_v0, %v8497_v52  ;;  %v8630_v16 = vld [vmem:[#allocation3 + $0x40] sm:$0xff] }
 0x70f   : > { %3193 = vst.msk [vmem:[#allocation3 + $0xb8] sm:$0xff] %vm3169_vm2, %v3160_v61  ;;  %4196 = vperm.xlu2 %5257, %v3725_v46   ;;  %v3730_v58 = vmul.f32 %v8546_v8, %v3729_v39  ;;  %vm3733_vm3 = vweird.f32 %v8546_v8  ;;  %vm8586_vm4 = vcmp.eq.f32.partialorder %v3736_v10, 8.507059e+37  ;;  %vm3942_vm5 = vweird.f32 %v8497_v52 }
 0x710   : > { %v3118_v53 = vpop.xlane.xlu0 %3117  ;;  %v8591_v26 = vpop.eup %5414  ;;  %3582 = vst [vmem:[#allocation4 + $0xb8] sm:$0xff] %v3550_v17  ;;  %v3750_v33 = vsel %vm3749_vm1, %v8523_v30, %v3746_v49  ;;  %v3939_v11 = vsub.f32 1.0, %v3938_v44  ;;  %5416 = vrcp.f32 %v8571_v20  ;;  %v3739_v50 = vor.u32 1.1754944e-38, %v3738_v60  ;;  %vm3734_vm6 = vmor %vm3732_vm14, %vm3733_vm3 }
 0x711   : > { %v3159_v40 = vadd.f32 %v3118_v53, %v8171_v1  ;;  %v3755_v3 = vsel %vm8541_vm13, %v3754_v14, %v3750_v33  ;;  %v3731_v43 = vadd.f32 %v8546_v8, %v3730_v58  ;;  %v3968_v48 = vmul.f32 %v8591_v26, %v8531_v27  ;;  %v3092_v4 = vpop.xlane.xlu2 %3091  ;;  %v3291_v57 = vpop.f32.mrf.mxu3  ;;  %v9598_v53 = vld [vmem:[#allocation100_spill] sm:$0xff] }
 0x712   : > { %4206 = vperm.xlu0 %5259, %v3755_v3   ;;  %v3940_v1 = vmul.f32 %v8565_v0, %v3939_v11  ;;  %vm3943_vm7 = vweird.f32 %v8565_v0  ;;  %v3946_v30 = vand.u32 2147483647, %v8497_v52  ;;  %v3949_v2 = vor.u32 1.1754944e-38, %v3948_v15  ;;  %v3096_v45 = vpop.xlane.xlu1 %3095  ;;  %v8640_v52 = vld [vmem:[#allocation3 + $0xe8] sm:$0xff]  ;;  %v8646_v56 = vld [vmem:[#allocation3 + $0x38] sm:$0xff] }
 0x713   : > { %3192 = vst.msk [vmem:[#allocation3 + $0xb0] sm:$0xff] %vm3169_vm2, %v3159_v40  ;;  %v3146_v12 = vadd.f32 %v3092_v4, %v8174_v21  ;;  %v3735_v37 = vsel %vm3734_vm6, %v8546_v8, %v3731_v43  ;;  %v3969_v29 = vsub.f32 1.0, %v3968_v48  ;;  %v3978_v14 = vand.u32 2147483648, %v8531_v27  ;;  %v3255_v8 = vpop.f32.mrf.mxu1  ;;  %vm3944_vm8 = vmor %vm3942_vm5, %vm3943_vm7 }
 0x714   : > { %v8615_v32 = vadd.f32 %v8263_v47, %v3291_v57  ;;  %v3740_v22 = vsel %vm8586_vm4, %v3739_v50, %v3735_v37  ;;  %v3941_v28 = vadd.f32 %v8565_v0, %v3940_v1  ;;  %v3976_v25 = vand.u32 2147483647, %v8531_v27  ;;  %v8661_v49 = vld [vmem:[#allocation3 + $0xa8] sm:$0xff] }
 0x715   : > { %3179 = vst.msk [vmem:[#allocation3 + $0x48] sm:$0xff] %vm3169_vm2, %v3146_v12  ;;  %4201 = vperm.xlu1 %5258, %v3740_v22   ;;  %v3148_v21 = vadd.f32 %v3096_v45, %v8180_v54  ;;  %v3970_v47 = vmul.f32 %v8591_v26, %v3969_v29  ;;  %vm3973_vm9 = vweird.f32 %v8591_v26  ;;  %5418 = vrcp.f32 %v8609_v42 }
 0x716   : > { %v8632_v10 = vpop.eup %5416  ;;  %3595 = vst [vmem:[#allocation4 + $0xa8] sm:$0xff] %v8615_v32  ;;  %v8636_v54 = vadd.f32 %v8266_v63, %v3255_v8  ;;  %v3945_v23 = vsel %vm3944_vm8, %v8565_v0, %v3941_v28  ;;  %vm3947_vm10 = vcmp.eq.f32.partialorder %v3946_v30, 8.507059e+37  ;;  %vm3972_vm11 = vweird.f32 %v8531_v27 }
 0x717   : > { %3181 = vst.msk [vmem:[#allocation3 + $0x58] sm:$0xff] %vm3169_vm2, %v3148_v21  ;;  %v3950_v19 = vsel %vm3947_vm10, %v3949_v2, %v3945_v23  ;;  %v3971_v60 = vadd.f32 %v8591_v26, %v3970_v47  ;;  %v3979_v61 = vor.u32 1.1754944e-38, %v3978_v14  ;;  %v3953_v18 = vmul.f32 %v8632_v10, %v8571_v20  ;;  %vm3974_vm12 = vmor %vm3972_vm11, %vm3973_vm9  ;;  %v8700_v14 = vld [vmem:[#allocation3 + $0xb8] sm:$0xff] }
 0x718   : > { %v3094_v51 = vpop.xlane.xlu0 %3093  ;;  %3583 = vst [vmem:[#allocation4 + $0x60] sm:$0xff] %v8636_v54  ;;  %4271 = vperm.xlu2 %5257, %v3950_v19   ;;  %v3961_v27 = vand.u32 2147483647, %v8571_v20  ;;  %v3963_v0 = vand.u32 2147483648, %v8571_v20  ;;  %5420 = vrcp.f32 %v8630_v16  ;;  %vm3977_vm13 = vcmp.eq.f32.partialorder %v3976_v25, 8.507059e+37 }
 0x719   : > { %v3147_v63 = vadd.f32 %v3094_v51, %v8183_v36  ;;  %v3975_v39 = vsel %vm3974_vm12, %v8591_v26, %v3971_v60  ;;  %v3954_v15 = vsub.f32 1.0, %v3953_v18  ;;  %5422 = vrcp.f32 %v8640_v52  ;;  %v3122_v46 = vpop.xlane.xlu2 %3121 }
 0x71a   : > { %v3980_v17 = vsel %vm3977_vm13, %v3979_v61, %v3975_v39  ;;  %vm3957_vm14 = vweird.f32 %v8571_v20  ;;  %v3766_v36 = vand.u32 2147483647, %v8609_v42  ;;  %5424 = vrcp.f32 %v8646_v56  ;;  %v3126_v11 = vpop.xlane.xlu1 %3125 }
 0x71b   : > { %3180 = vst.msk [vmem:[#allocation3 + $0x50] sm:$0xff] %vm3169_vm2, %v3147_v63  ;;  %v8663_v44 = vpop.eup %5418  ;;  %4281 = vperm.xlu0 %5259, %v3980_v17   ;;  %v3161_v58 = vadd.f32 %v3122_v46, %v9598_v53  ;;  %v3955_v13 = vmul.f32 %v8632_v10, %v3954_v15  ;;  %vm3958_vm15 = vweird.f32 %v8632_v10  ;;  %v3768_v26 = vand.u32 2147483648, %v8609_v42  ;;  %v3258_v48 = vpop.f32.mrf.mxu1  ;;  %v8729_v63 = vld [vmem:[#allocation3 + $0xb0] sm:$0xff] }
 0x71c   : > { %vm8669_vm0 = vcmp.eq.f32.partialorder %v3961_v27, 8.507059e+37  ;;  %v3964_v33 = vor.u32 1.1754944e-38, %v3963_v0  ;;  %v3758_v3 = vmul.f32 %v8663_v44, %v8609_v42  ;;  %vm3762_vm1 = vweird.f32 %v8609_v42  ;;  %vm3959_vm3 = vmor %vm3957_vm14, %vm3958_vm15  ;;  %v8749_v40 = vld [vmem:[#allocation3 + $0x48] sm:$0xff] }
 0x71d   : > { %3194 = vst.msk [vmem:[#allocation3 + $0xc0] sm:$0xff] %vm3169_vm2, %v3161_v58  ;;  %v3956_v43 = vadd.f32 %v8632_v10, %v3955_v13  ;;  %v3163_v50 = vadd.f32 %v3126_v11, %v8189_v31  ;;  %v3796_v4 = vand.u32 2147483647, %v8630_v16  ;;  %5426 = vrcp.f32 %v8661_v49 }
 0x71e   : > { %v8681_v1 = vpop.eup %5420  ;;  %v8686_v30 = vadd.f32 %v8201_v5, %v3258_v48  ;;  %v3759_v2 = vsub.f32 1.0, %v3758_v3  ;;  %vm8688_vm4 = vcmp.eq.f32.partialorder %v3766_v36, 8.507059e+37  ;;  %vm3792_vm5 = vweird.f32 %v8630_v16  ;;  %v3294_v21 = vpop.f32.mrf.mxu3 }
 0x71f   : > { %v8693_v31 = vpop.eup %5422  ;;  %v3960_v57 = vsel %vm3959_vm3, %v8632_v10, %v3956_v43  ;;  %3196 = vst.msk [vmem:[#allocation3 + $0xd0] sm:$0xff] %vm3169_vm2, %v3163_v50  ;;  %v3769_v37 = vor.u32 1.1754944e-38, %v3768_v26  ;;  %v3788_v20 = vmul.f32 %v8681_v1, %v8630_v16  ;;  %v3798_v5 = vand.u32 2147483648, %v8630_v16 }
 0x720   : > { %v3124_v29 = vpop.xlane.xlu0 %3123  ;;  %v5425_v22 = vpop.eup %5424  ;;  %v3965_v45 = vsel %vm8669_vm0, %v3964_v33, %v3960_v57  ;;  %3584 = vst [vmem:[#allocation4 + $0xf0] sm:$0xff] %v8686_v30  ;;  %v3760_v28 = vmul.f32 %v8663_v44, %v3759_v2  ;;  %vm3763_vm6 = vweird.f32 %v8663_v44  ;;  %vm8708_vm7 = vcmp.eq.f32.partialorder %v3796_v4, 8.507059e+37 }
 0x721   : > { %v3162_v25 = vadd.f32 %v3124_v29, %v8192_v55  ;;  %4276 = vperm.xlu1 %5258, %v3965_v45   ;;  %v3789_v8 = vsub.f32 1.0, %v3788_v20  ;;  %v8713_v10 = vadd.f32 %v8281_v59, %v3294_v21  ;;  %v3773_v23 = vmul.f32 %v5425_v22, %v8646_v56  ;;  %v3098_v51 = vpop.xlane.xlu2 %3097  ;;  %vm3764_vm9 = vmor %vm3762_vm1, %vm3763_vm6 }
 0x722   : > { %v3761_v19 = vadd.f32 %v8663_v44, %v3760_v28  ;;  %vm3777_vm8 = vweird.f32 %v8646_v56  ;;  %v3781_v55 = vand.u32 2147483647, %v8646_v56  ;;  %5428 = vrcp.f32 %v8700_v14 }
 0x723   : > { %3195 = vst.msk [vmem:[#allocation3 + $0xc8] sm:$0xff] %vm3169_vm2, %v3162_v25  ;;  %v5427_v60 = vpop.eup %5426  ;;  %v3790_v59 = vmul.f32 %v8681_v1, %v3789_v8  ;;  %vm3793_vm10 = vweird.f32 %v8681_v1  ;;  %v3149_v61 = vadd.f32 %v3098_v51, %v8195_v41  ;;  %v3774_v18 = vsub.f32 1.0, %v3773_v23  ;;  %v3261_v41 = vpop.f32.mrf.mxu1  ;;  %v8778_v8 = vld [vmem:[#allocation3 + $0x50] sm:$0xff] }
 0x724   : > { %3596 = vst [vmem:[#allocation4 + $0xd0] sm:$0xff] %v8713_v10  ;;  %v3765_v27 = vsel %vm3764_vm9, %v8663_v44, %v3761_v19  ;;  %v3783_v0 = vand.u32 2147483648, %v8646_v56  ;;  %v3983_v39 = vmul.f32 %v5427_v60, %v8661_v49  ;;  %v3991_v42 = vand.u32 2147483647, %v8661_v49  ;;  %vm3794_vm12 = vmor %vm3792_vm5, %vm3793_vm10 }
 0x725   : > { %v3770_v15 = vsel %vm8688_vm4, %v3769_v37, %v3765_v27  ;;  %v3791_v17 = vadd.f32 %v8681_v1, %v3790_v59  ;;  %3182 = vst.msk [vmem:[#allocation3 + $0x60] sm:$0xff] %vm3169_vm2, %v3149_v61  ;;  %v3775_v46 = vmul.f32 %v5425_v22, %v3774_v18  ;;  %vm3778_vm11 = vweird.f32 %v5425_v22  ;;  %v8767_v37 = vld [vmem:[#allocation3 + $0x58] sm:$0xff]  ;;  %v8798_v61 = vld [vmem:[#allocation3 + $0xc0] sm:$0xff] }
 0x726   : > { %4211 = vperm.xlu2 %5257, %v3770_v15   ;;  %v3799_v36 = vor.u32 1.1754944e-38, %v3798_v5  ;;  %v8744_v44 = vadd.f32 %v8198_v38, %v3261_v41  ;;  %v3984_v53 = vsub.f32 1.0, %v3983_v39  ;;  %5430 = vrcp.f32 %v8729_v63  ;;  %vm3779_vm14 = vmor %vm3777_vm8, %vm3778_vm11 }
 0x727   : > { %v3795_v58 = vsel %vm3794_vm12, %v8681_v1, %v3791_v17  ;;  %v3776_v13 = vadd.f32 %v5425_v22, %v3775_v46  ;;  %vm3782_vm13 = vcmp.eq.f32.partialorder %v3781_v55, 8.507059e+37  ;;  %v3993_v26 = vand.u32 2147483648, %v8661_v49 }
 0x728   : > { %v5429_v33 = vpop.eup %5428  ;;  %v3800_v16 = vsel %vm8708_vm7, %v3799_v36, %v3795_v58  ;;  %v3784_v38 = vor.u32 1.1754944e-38, %v3783_v0  ;;  %3585 = vst [vmem:[#allocation4 + $0x8] sm:$0xff] %v8744_v44  ;;  %v3985_v11 = vmul.f32 %v5427_v60, %v3984_v53  ;;  %vm3988_vm15 = vweird.f32 %v5427_v60 }
 0x729   : > { %4221 = vperm.xlu0 %5259, %v3800_v16   ;;  %v3780_v3 = vsel %vm3779_vm14, %v5425_v22, %v3776_v13  ;;  %vm3987_vm0 = vweird.f32 %v8661_v49  ;;  %vm8758_vm1 = vcmp.eq.f32.partialorder %v3991_v42, 8.507059e+37  ;;  %v4013_v50 = vmul.f32 %v5429_v33, %v8700_v14  ;;  %v3128_v56 = vpop.xlane.xlu2 %3127  ;;  %v3297_v57 = vpop.f32.mrf.mxu3 }
 0x72a   : > { %v3785_v48 = vsel %vm3782_vm13, %v3784_v38, %v3780_v3  ;;  %v3986_v4 = vadd.f32 %v5427_v60, %v3985_v11  ;;  %vm4017_vm3 = vweird.f32 %v8700_v14  ;;  %5432 = vrcp.f32 %v8749_v40  ;;  %vm3989_vm4 = vmor %vm3987_vm0, %vm3988_vm15  ;;  %v8816_v3 = vld [vmem:[#allocation3 + $0xd0] sm:$0xff] }
 0x72b   : > { %4216 = vperm.xlu1 %5258, %v3785_v48   ;;  %v3994_v1 = vor.u32 1.1754944e-38, %v3993_v26  ;;  %v4014_v2 = vsub.f32 1.0, %v4013_v50  ;;  %v4021_v12 = vand.u32 2147483647, %v8700_v14  ;;  %v3164_v49 = vadd.f32 %v3128_v56, %v8210_v24  ;;  %v3264_v21 = vpop.f32.mrf.mxu1 }
 0x72c   : > { %v5431_v29 = vpop.eup %5430  ;;  %v3990_v20 = vsel %vm3989_vm4, %v5427_v60, %v3986_v4  ;;  %v4023_v5 = vand.u32 2147483648, %v8700_v14  ;;  %v8771_v22 = vadd.f32 %v8278_v7, %v3297_v57  ;;  %v4006_v45 = vand.u32 2147483647, %v8729_v63  ;;  %v8890_v4 = vld [vmem:[#allocation3 + $0xf8] sm:$0xff] }
 0x72d   : > { %v3995_v28 = vsel %vm8758_vm1, %v3994_v1, %v3990_v20  ;;  %v4015_v25 = vmul.f32 %v5429_v33, %v4014_v2  ;;  %vm4018_vm5 = vweird.f32 %v5429_v33  ;;  %3197 = vst.msk [vmem:[#allocation3 + $0xd8] sm:$0xff] %vm3169_vm2, %v3164_v49  ;;  %v3998_v24 = vmul.f32 %v5431_v29, %v8729_v63 }
 0x72e   : > { %4286 = vperm.xlu2 %5257, %v3995_v28   ;;  %3597 = vst [vmem:[#allocation4 + $0x10] sm:$0xff] %v8771_v22  ;;  %v4008_v7 = vand.u32 2147483648, %v8729_v63  ;;  %v8783_v47 = vadd.f32 %v8216_v34, %v3264_v21  ;;  %v3811_v23 = vand.u32 2147483647, %v8749_v40  ;;  %5434 = vrcp.f32 %v8767_v37  ;;  %vm4019_vm7 = vmor %vm4017_vm3, %vm4018_vm5 }
 0x72f   : > { %v4016_v19 = vadd.f32 %v5429_v33, %v4015_v25  ;;  %vm4022_vm6 = vcmp.eq.f32.partialorder %v4021_v12, 8.507059e+37  ;;  %v3999_v51 = vsub.f32 1.0, %v3998_v24  ;;  %vm4002_vm2 = vweird.f32 %v8729_v63  ;;  %v8841_v12 = vld [vmem:[#allocation3 + $0xc8] sm:$0xff]  ;;  %v8848_v25 = vld [vmem:[#allocation3 + $0x60] sm:$0xff] }
 0x730   : > { %v5433_v55 = vpop.eup %5432  ;;  %v4024_v60 = vor.u32 1.1754944e-38, %v4023_v5  ;;  %vm8791_vm8 = vcmp.eq.f32.partialorder %v4006_v45, 8.507059e+37  ;;  %3586 = vst [vmem:[#allocation4 + $0x78] sm:$0xff] %v8783_v47  ;;  %v3813_v34 = vand.u32 2147483648, %v8749_v40  ;;  %5436 = vrcp.f32 %v8778_v8 }
 0x731   : > { %v4020_v18 = vsel %vm4019_vm7, %v5429_v33, %v4016_v19  ;;  %v4000_v27 = vmul.f32 %v5431_v29, %v3999_v51  ;;  %vm4003_vm9 = vweird.f32 %v5431_v29  ;;  %v3803_v0 = vmul.f32 %v5433_v55, %v8749_v40  ;;  %v3300_v41 = vpop.f32.mrf.mxu3 }
 0x732   : > { %v4025_v14 = vsel %vm4022_vm6, %v4024_v60, %v4020_v18  ;;  %v4009_v39 = vor.u32 1.1754944e-38, %v4008_v7  ;;  %vm3807_vm10 = vweird.f32 %v8749_v40  ;;  %vm8802_vm11 = vcmp.eq.f32.partialorder %v3811_v23, 8.507059e+37  ;;  %vm4004_vm12 = vmor %vm4002_vm2, %vm4003_vm9 }
 0x733   : > { %4296 = vperm.xlu0 %5259, %v4025_v14   ;;  %v4001_v15 = vadd.f32 %v5431_v29, %v4000_v27  ;;  %v3804_v17 = vsub.f32 1.0, %v3803_v0  ;;  %v3841_v46 = vand.u32 2147483647, %v8767_v37  ;;  %5438 = vrcp.f32 %v8798_v61  ;;  %v3267_v11 = vpop.f32.mrf.mxu1 }
 0x734   : > { %v5435_v36 = vpop.eup %5434  ;;  %v3814_v53 = vor.u32 1.1754944e-38, %v3813_v34  ;;  %v3843_v58 = vand.u32 2147483648, %v8767_v37  ;;  %v8812_v13 = vadd.f32 %v8288_v9, %v3300_v41  ;;  %v3826_v26 = vand.u32 2147483647, %v8778_v8 }
 0x735   : > { %v4005_v33 = vsel %vm4004_vm12, %v5431_v29, %v4001_v15  ;;  %v3805_v16 = vmul.f32 %v5433_v55, %v3804_v17  ;;  %vm3808_vm13 = vweird.f32 %v5433_v55  ;;  %v3833_v38 = vmul.f32 %v5435_v36, %v8767_v37 }
 0x736   : > { %v5437_v43 = vpop.eup %5436  ;;  %v4010_v63 = vsel %vm8791_vm8, %v4009_v39, %v4005_v33  ;;  %vm3837_vm14 = vweird.f32 %v8767_v37  ;;  %3598 = vst [vmem:[#allocation4 + $0x28] sm:$0xff] %v8812_v13  ;;  %vm3822_vm15 = vweird.f32 %v8778_v8  ;;  %v8824_v9 = vadd.f32 %v8226_v62, %v3267_v11  ;;  %vm3809_vm1 = vmor %vm3807_vm10, %vm3808_vm13 }
 0x737   : > { %4291 = vperm.xlu1 %5258, %v4010_v63   ;;  %v3806_v50 = vadd.f32 %v5433_v55, %v3805_v16  ;;  %v3834_v48 = vsub.f32 1.0, %v3833_v38  ;;  %vm8826_vm0 = vcmp.eq.f32.partialorder %v3841_v46, 8.507059e+37  ;;  %v3818_v56 = vmul.f32 %v5437_v43, %v8778_v8 }
 0x738   : > { %v3844_v1 = vor.u32 1.1754944e-38, %v3843_v58  ;;  %vm8834_vm3 = vcmp.eq.f32.partialorder %v3826_v26, 8.507059e+37  ;;  %v3828_v62 = vand.u32 2147483648, %v8778_v8  ;;  %3587 = vst [vmem:[#allocation4 + $0x38] sm:$0xff] %v8824_v9  ;;  %5440 = vrcp.f32 %v8816_v3 }
 0x739   : > { %v5439_v49 = vpop.eup %5438  ;;  %v3810_v57 = vsel %vm3809_vm1, %v5433_v55, %v3806_v50  ;;  %v3835_v29 = vmul.f32 %v5435_v36, %v3834_v48  ;;  %vm3838_vm4 = vweird.f32 %v5435_v36  ;;  %v3819_v20 = vsub.f32 1.0, %v3818_v56  ;;  %v3303_v7 = vpop.f32.mrf.mxu3  ;;  %v9615_v55 = vld [vmem:[#allocation103_spill] sm:$0xff] }
 0x73a   : > { %v3815_v40 = vsel %vm8802_vm11, %v3814_v53, %v3810_v57  ;;  %v4028_v5 = vmul.f32 %v5439_v49, %v8798_v61  ;;  %v4036_v45 = vand.u32 2147483647, %v8798_v61  ;;  %v4038_v28 = vand.u32 2147483648, %v8798_v61  ;;  %vm3839_vm6 = vmor %vm3837_vm14, %vm3838_vm4 }
 0x73b   : > { %4226 = vperm.xlu2 %5257, %v3815_v40   ;;  %v3836_v24 = vadd.f32 %v5435_v36, %v3835_v29  ;;  %v3820_v21 = vmul.f32 %v5437_v43, %v3819_v20  ;;  %vm3823_vm5 = vweird.f32 %v5437_v43  ;;  %5442 = vrcp.f32 %v8841_v12  ;;  %v3270_v27 = vpop.f32.mrf.mxu1 }
 0x73c   : > { %v3829_v23 = vor.u32 1.1754944e-38, %v3828_v62  ;;  %v4029_v19 = vsub.f32 1.0, %v4028_v5  ;;  %v4066_v51 = vand.u32 2147483647, %v8816_v3  ;;  %v8855_v60 = vadd.f32 %v9615_v55, %v3303_v7  ;;  %vm3824_vm2 = vmor %vm3822_vm15, %vm3823_vm5  ;;  %v9622_v5 = vld [vmem:[#allocation101_spill] sm:$0xff] }
 0x73d   : > { %v3840_v59 = vsel %vm3839_vm6, %v5435_v36, %v3836_v24  ;;  %v3821_v34 = vadd.f32 %v5437_v43, %v3820_v21  ;;  %v4068_v18 = vand.u32 2147483648, %v8816_v3  ;;  %5444 = vrcp.f32 %v8848_v25  ;;  %v3334_v55 = vld [vmem:[#allocation4 + $0xc8] sm:$0xff] }
 0x73e   : > { %v5441_v0 = vpop.eup %5440  ;;  %v3845_v14 = vsel %vm8826_vm0, %v3844_v1, %v3840_v59  ;;  %v4030_v37 = vmul.f32 %v5439_v49, %v4029_v19  ;;  %vm4033_vm7 = vweird.f32 %v5439_v49  ;;  %3599 = vst [vmem:[#allocation4 + $0xa0] sm:$0xff] %v8855_v60  ;;  %v8866_v39 = vadd.f32 %v8229_v35, %v3270_v27  ;;  %v9627_v1 = vld [vmem:[#allocation131_spill] sm:$0xff] }
 0x73f   : > { %4236 = vperm.xlu0 %5259, %v3845_v14   ;;  %v3825_v42 = vsel %vm3824_vm2, %v5437_v43, %v3821_v34  ;;  %vm4032_vm8 = vweird.f32 %v8798_v61  ;;  %vm8869_vm9 = vcmp.eq.f32.partialorder %v4036_v45, 8.507059e+37  ;;  %v4058_v17 = vmul.f32 %v5441_v0, %v8816_v3 }
 0x740   : > { %v3830_v8 = vsel %vm8834_vm3, %v3829_v23, %v3825_v42  ;;  %v4031_v46 = vadd.f32 %v5439_v49, %v4030_v37  ;;  %v4039_v41 = vor.u32 1.1754944e-38, %v4038_v28  ;;  %v4051_v36 = vand.u32 2147483647, %v8841_v12  ;;  %3588 = vst [vmem:[#allocation4 + $0x58] sm:$0xff] %v8866_v39  ;;  %vm4034_vm10 = vmor %vm4032_vm8, %vm4033_vm7 }
 0x741   : > { %v5443_v35 = vpop.eup %5442  ;;  %4231 = vperm.xlu1 %5258, %v3830_v8   ;;  %v4059_v61 = vsub.f32 1.0, %v4058_v17  ;;  %vm4062_vm11 = vweird.f32 %v8816_v3  ;;  %v4053_v53 = vand.u32 2147483648, %v8841_v12  ;;  %v4103_v58 = vmul.f32 %v8693_v31, %v8640_v52  ;;  %v3306_v48 = vpop.f32.mrf.mxu3  ;;  %v8931_v17 = vld [vmem:[#allocation3 + $0xf0] sm:$0xff] }
 0x742   : > { %v4035_v26 = vsel %vm4034_vm10, %v5439_v49, %v4031_v46  ;;  %vm8883_vm12 = vcmp.eq.f32.partialorder %v4066_v51, 8.507059e+37  ;;  %v4069_v16 = vor.u32 1.1754944e-38, %v4068_v18  ;;  %v4043_v38 = vmul.f32 %v5443_v35, %v8841_v12  ;;  %v8911_v51 = vld [vmem:[#allocation3 + $0xd8] sm:$0xff]  ;;  %v4147_v18 = vld [vmem:[#allocation4 + $0xb0] sm:$0xff]  ;;  %v9623_v46 = vld [vmem:[#allocation133_spill] sm:$0xff] }
 0x743   : > { %v5445_v11 = vpop.eup %5444  ;;  %v4040_v43 = vsel %vm8869_vm9, %v4039_v41, %v4035_v26  ;;  %v4060_v63 = vmul.f32 %v5441_v0, %v4059_v61  ;;  %vm4063_vm13 = vweird.f32 %v5441_v0  ;;  %v4104_v50 = vsub.f32 1.0, %v4103_v58  ;;  %v3273_v29 = vpop.f32.mrf.mxu1  ;;  %v9626_v58 = vld [vmem:[#allocation106_spill] sm:$0xff] }
 0x744   : > { %4301 = vperm.xlu2 %5257, %v4040_v43   ;;  %v4044_v56 = vsub.f32 1.0, %v4043_v38  ;;  %vm4047_vm14 = vweird.f32 %v8841_v12  ;;  %vm8893_vm15 = vcmp.eq.f32.partialorder %v4051_v36, 8.507059e+37  ;;  %v3848_v2 = vmul.f32 %v5445_v11, %v8848_v25  ;;  %vm4064_vm1 = vmor %vm4062_vm11, %vm4063_vm13  ;;  %v3335_v43 = vld [vmem:[#allocation4 + $0xe0] sm:$0xff] }
 0x745   : > { %v4061_v62 = vadd.f32 %v5441_v0, %v4060_v63  ;;  %vm4048_vm0 = vweird.f32 %v5443_v35  ;;  %v4054_v49 = vor.u32 1.1754944e-38, %v4053_v53  ;;  %v4105_v57 = vmul.f32 %v8693_v31, %v4104_v50  ;;  %v4182_v7 = vpop.permute.xlu2 %4181 }
 0x746   : > { %v4045_v20 = vmul.f32 %v5443_v35, %v4044_v56  ;;  %v3849_v40 = vsub.f32 1.0, %v3848_v2  ;;  %v8902_v45 = vadd.f32 %v9622_v5, %v3306_v48  ;;  %5446 = vrcp.f32 %v8890_v4  ;;  %vm4049_vm5 = vmor %vm4047_vm14, %vm4048_vm0 }
 0x747   : > { %v4065_v28 = vsel %vm4064_vm1, %v5441_v0, %v4061_v62  ;;  %vm3852_vm3 = vweird.f32 %v8848_v25  ;;  %v3856_v24 = vand.u32 2147483647, %v8848_v25  ;;  %v3858_v21 = vand.u32 2147483648, %v8848_v25 }
 0x748   : > { %v4070_v23 = vsel %vm8883_vm12, %v4069_v16, %v4065_v28  ;;  %v4046_v3 = vadd.f32 %v5443_v35, %v4045_v20  ;;  %v3850_v19 = vmul.f32 %v5445_v11, %v3849_v40  ;;  %vm3853_vm4 = vweird.f32 %v5445_v11  ;;  %3600 = vst [vmem:[#allocation4 + $0xf8] sm:$0xff] %v8902_v45 }
 0x749   : > { %4311 = vperm.xlu0 %5259, %v4070_v23   ;;  %v4106_v59 = vadd.f32 %v8693_v31, %v4105_v57  ;;  %vm4107_vm6 = vweird.f32 %v8640_v52  ;;  %vm4108_vm2 = vweird.f32 %v8693_v31  ;;  %v8920_v34 = vadd.f32 %v8232_v6, %v3273_v29  ;;  %vm3854_vm7 = vmor %vm3852_vm3, %vm3853_vm4  ;;  %v3309_v6 = vpop.f32.mrf.mxu3 }
 0x74a   : > { %v4050_v27 = vsel %vm4049_vm5, %v5443_v35, %v4046_v3  ;;  %v3851_v0 = vadd.f32 %v5445_v11, %v3850_v19  ;;  %v4113_v14 = vand.u32 2147483648, %v8640_v52  ;;  %v4339_v37 = vmul.f32 %v4182_v7, %v4147_v18  ;;  %vm8938_vm9 = vmor %vm4107_vm6, %vm4108_vm2 }
 0x74b   : > { %v4055_v12 = vsel %vm8893_vm15, %v4054_v49, %v4050_v27  ;;  %v3859_v42 = vor.u32 1.1754944e-38, %v3858_v21  ;;  %v4111_v15 = vand.u32 2147483647, %v8640_v52  ;;  %3589 = vst [vmem:[#allocation4 + $0x40] sm:$0xff] %v8920_v34  ;;  %5448 = vrcp.f32 %v8911_v51  ;;  %v3276_v33 = vpop.f32.mrf.mxu1  ;;  %v3346_v52 = vld [vmem:[#allocation4 + $0x98] sm:$0xff]  ;;  %v9628_v49 = vld [vmem:[#allocation132_spill] sm:$0xff] }
 0x74c   : > { %v5447_v8 = vpop.eup %5446  ;;  %v3526_v41 = vmul.f32 %v9623_v46, %v3334_v55  ;;  %4306 = vperm.xlu1 %5258, %v4055_v12   ;;  %v3855_v36 = vsel %vm3854_vm7, %v5445_v11, %v3851_v0  ;;  %vm3857_vm8 = vcmp.eq.f32.partialorder %v3856_v24, 8.507059e+37  ;;  %4371 = vst [vmem:[%s6242_s4] sm:$0xff] %v4339_v37  ;;  %v4110_v61 = vsel %vm8938_vm9, %v8693_v31, %v4106_v59 }
 0x74d   : > { %v3860_v35 = vsel %vm3857_vm8, %v3859_v42, %v3855_v36  ;;  %v4133_v53 = vmul.f32 %v5447_v8, %v8890_v4  ;;  %v8948_v26 = vadd.f32 %v9626_v58, %v3309_v6  ;;  %v4114_v16 = vor.u32 1.1754944e-38, %v4113_v14 }
 0x74e   : > { %4241 = vperm.xlu2 %5257, %v3860_v35   ;;  %v8950_v38 = vadd.f32 %v3526_v41, %v3276_v33  ;;  %5450 = vrcp.f32 %v8931_v17  ;;  %vm4112_vm10 = vcmp.eq.f32.partialorder %v4111_v15, 8.507059e+37  ;;  %v4141_v31 = vand.u32 2147483647, %v8890_v4 }
 0x74f   : > { %v4134_v11 = vsub.f32 1.0, %v4133_v53  ;;  %3601 = vst [vmem:[#allocation4 + $0x20] sm:$0xff] %v8948_v26  ;;  %v4115_v63 = vsel %vm4112_vm10, %v4114_v16, %v4110_v61  ;;  %v4143_v50 = vand.u32 2147483648, %v8890_v4  ;;  %vm4138_vm11 = vweird.f32 %v5447_v8  ;;  %v4150_v53 = vld [vmem:[#allocation4 + $0x18] sm:$0xff] }
 0x750   : > { %3590 = vst [vmem:[#allocation4 + $0xc8] sm:$0xff] %v8950_v38  ;;  %v3538_v2 = vmul.f32 %v9627_v1, %v3346_v52  ;;  %v3527_v57 = vmul.f32 %v9628_v49, %v3335_v43  ;;  %vm4137_vm12 = vweird.f32 %v8890_v4  ;;  %vm4142_vm14 = vcmp.eq.f32.partialorder %v4141_v31, 8.507059e+37  ;;  %v4152_v49 = vld [vmem:[#allocation4 + $0x68] sm:$0xff] }
 0x751   : > { %v5449_v48 = vpop.eup %5448  ;;  %4326 = vperm.xlu0 %5259, %v4115_v63   ;;  %v4135_v56 = vmul.f32 %v5447_v8, %v4134_v11  ;;  %v3312_v20 = vpop.f32.mrf.mxu3  ;;  %vm4139_vm13 = vmor %vm4137_vm12, %vm4138_vm11  ;;  %v4144_v5 = vor.u32 1.1754944e-38, %v4143_v50  ;;  %v4081_v7 = vand.u32 2147483647, %v8911_v51  ;;  %v4083_v23 = vand.u32 2147483648, %v8911_v51  ;;  %v4149_v11 = vld [vmem:[#allocation4 + $0xd8] sm:$0xff] }
 0x752   : > { %v4073_v62 = vmul.f32 %v5449_v48, %v8911_v51  ;;  %v8961_v24 = vadd.f32 %v3538_v2, %v3312_v20  ;;  %vm4078_vm15 = vweird.f32 %v5449_v48  ;;  %vm4077_vm0 = vweird.f32 %v8911_v51  ;;  %v4151_v20 = vld [vmem:[#allocation4 + $0x50] sm:$0xff] }
 0x753   : > { %v4136_v29 = vadd.f32 %v5447_v8, %v4135_v56  ;;  %v3279_v19 = vpop.f32.mrf.mxu1  ;;  %vm4079_vm1 = vmor %vm4077_vm0, %vm4078_vm15  ;;  %v4084_v0 = vor.u32 1.1754944e-38, %v4083_v23  ;;  %vm4082_vm3 = vcmp.eq.f32.partialorder %v4081_v7, 8.507059e+37  ;;  %vm4122_vm5 = vweird.f32 %v8931_v17 }
 0x754   : > { %v5451_v40 = vpop.eup %5450  ;;  %v4074_v28 = vsub.f32 1.0, %v4073_v62  ;;  %3602 = vst [vmem:[#allocation4 + $0x98] sm:$0xff] %v8961_v24  ;;  %v8967_v4 = vadd.f32 %v3527_v57, %v3279_v19  ;;  %v4126_v51 = vand.u32 2147483647, %v8931_v17  ;;  %v4156_v19 = vld [vmem:[#allocation4 + $0x88] sm:$0xff] }
 0x755   : > { %v4140_v21 = vsel %vm4139_vm13, %v5447_v8, %v4136_v29  ;;  %v4118_v3 = vmul.f32 %v5451_v40, %v8931_v17  ;;  %vm4123_vm4 = vweird.f32 %v5451_v40  ;;  %v4128_v8 = vand.u32 2147483648, %v8931_v17 }
 0x756   : > { %v4145_v55 = vsel %vm4142_vm14, %v4144_v5, %v4140_v21  ;;  %v4075_v59 = vmul.f32 %v5449_v48, %v4074_v28  ;;  %3591 = vst [vmem:[#allocation4 + $0xe0] sm:$0xff] %v8967_v4  ;;  %vm4124_vm6 = vmor %vm4122_vm5, %vm4123_vm4  ;;  %vm4127_vm2 = vcmp.eq.f32.partialorder %v4126_v51, 8.507059e+37 }
 0x757   : > { %4336 = vperm.xlu1 %5258, %v4145_v55   ;;  %v4119_v18 = vsub.f32 1.0, %v4118_v3  ;;  %v4129_v41 = vor.u32 1.1754944e-38, %v4128_v8 }
 0x758   : > { %v4076_v27 = vadd.f32 %v5449_v48, %v4075_v59 }
 0x759   : > { %v4120_v14 = vmul.f32 %v5451_v40, %v4119_v18  ;;  %v4257_v37 = vpop.permute.xlu2 %4256  ;;  %v4155_v18 = vld [vmem:[#allocation4 + $0x80] sm:$0xff] }
 0x75a   : > { %v4080_v12 = vsel %vm4079_vm1, %v5449_v48, %v4076_v27  ;;  %v4354_v42 = vmul.f32 %v4257_v37, %v8783_v47 }
 0x75b   : > { %v4085_v15 = vsel %vm4082_vm3, %v4084_v0, %v4080_v12  ;;  %v4121_v6 = vadd.f32 %v5451_v40, %v4120_v14  ;;  %v4154_v14 = vld [vmem:[#allocation4 + $0x48] sm:$0xff] }
 0x75c   : > { %4316 = vperm.xlu2 %5257, %v4085_v15   ;;  %4386 = vst [vmem:[%s6242_s4 + $0xf0] sm:$0xff] %v4354_v42  ;;  %v4170_v42 = vld [vmem:[#allocation4 + $0xc0] sm:$0xff] }
 0x75d   : > { %v4125_v46 = vsel %vm4124_vm6, %v5451_v40, %v4121_v6 }
 0x75e   : > { %v4130_v36 = vsel %vm4127_vm2, %v4129_v41, %v4125_v46  ;;  %v4169_v46 = vld [vmem:[#allocation4 + $0x70] sm:$0xff] }
 0x762   : > { %v4252_v47 = vpop.permute.xlu0 %4251 }
 0x763   : > { %v4353_v25 = vmul.f32 %v4252_v47, %v8744_v44  ;;  %v4403_v47 = vld [vmem:[%s6217_s29] sm:$0xff] }
 0x764   : > { %4331 = vperm.xlu2 %5257, %v4130_v36   ;;  %v4404_v36 = vld [vmem:[%s6217_s29 + $0x8] sm:$0xff]  ;;  %4419 = vst [vmem:[%s6244_s12] sm:$0xff] %v4403_v47 }
 0x765   : > { %4385 = vst [vmem:[%s6242_s4 + $0xe0] sm:$0xff] %v4353_v25  ;;  %v4405_v25 = vld [vmem:[%s6217_s29 + $0x10] sm:$0xff] }
 0x766   : > { %4420 = vst [vmem:[%s6244_s12 + $0x8] sm:$0xff] %v4404_v36 }
 0x767   : > { %v4247_v35 = vpop.permute.xlu1 %4246  ;;  %4421 = vst [vmem:[%s6244_s12 + $0x10] sm:$0xff] %v4405_v25 }
 0x768   : > { %v4352_v61 = vmul.f32 %v4247_v35, %v8686_v30  ;;  %v4148_v30 = vld [vmem:[#allocation4] sm:$0xff]  ;;  %v4406_v35 = vld [vmem:[%s6217_s29 + $0x18] sm:$0xff] }
 0x769   : > { %v4197_v17 = vpop.permute.xlu2 %4196  ;;  %4422 = vst [vmem:[%s6244_s12 + $0x18] sm:$0xff] %v4406_v35 }
 0x76a   : > { %4384 = vst [vmem:[%s6242_s4 + $0xd0] sm:$0xff] %v4352_v61  ;;  %v4342_v58 = vmul.f32 %v4197_v17, %v4150_v53  ;;  %v4407_v61 = vld [vmem:[%s6217_s29 + $0x20] sm:$0xff]  ;;  %v4409_v53 = vld [vmem:[%s6217_s29 + $0x30] sm:$0xff]  ;;  %v4158_v17 = vld [vmem:[#allocation4 + $0xb8] sm:$0xff] }
 0x76b   : > { %4423 = vst [vmem:[%s6244_s12 + $0x20] sm:$0xff] %v4407_v61 }
 0x76c   : > { %4374 = vst [vmem:[%s6242_s4 + $0x30] sm:$0xff] %v4342_v58 }
 0x76d   : > { %4425 = vst [vmem:[%s6244_s12 + $0x30] sm:$0xff] %v4409_v53 }
 0x76f   : > { %v4322_v33 = vpop.permute.xlu1 %4321 }
 0x770   : > { %v4367_v16 = vmul.f32 %v4322_v33, %v8855_v60 }
 0x772   : > { %4399 = vst [vmem:[%s6242_s4 + $0xc8] sm:$0xff] %v4367_v16  ;;  %v4272_v52 = vpop.permute.xlu2 %4271  ;;  %v4410_v16 = vld [vmem:[%s6217_s29 + $0x38] sm:$0xff] }
 0x773   : > { %v4357_v44 = vmul.f32 %v4272_v52, %v8920_v34  ;;  %v4192_v43 = vpop.permute.xlu0 %4191  ;;  %v4153_v34 = vld [vmem:[#allocation4 + $0x30] sm:$0xff]  ;;  %v4157_v52 = vld [vmem:[#allocation4 + $0xe8] sm:$0xff]  ;;  %4426 = vst [vmem:[%s6244_s12 + $0x38] sm:$0xff] %v4410_v16 }
 0x774   : > { %v4341_v63 = vmul.f32 %v4192_v43, %v4149_v11  ;;  %v4411_v43 = vld [vmem:[%s6217_s29 + $0x40] sm:$0xff] }
 0x775   : > { %4389 = vst [vmem:[%s6242_s4 + $0x28] sm:$0xff] %v4357_v44 }
 0x776   : > { %4373 = vst [vmem:[%s6242_s4 + $0x20] sm:$0xff] %v4341_v63  ;;  %v4412_v63 = vld [vmem:[%s6217_s29 + $0x48] sm:$0xff] }
 0x777   : > { %v4187_v31 = vpop.permute.xlu1 %4186  ;;  %4427 = vst [vmem:[%s6244_s12 + $0x40] sm:$0xff] %v4411_v43 }
 0x778   : > { %v4340_v50 = vmul.f32 %v4187_v31, %v4148_v30  ;;  %4428 = vst [vmem:[%s6244_s12 + $0x48] sm:$0xff] %v4412_v63 }
 0x77a   : > { %4372 = vst [vmem:[%s6242_s4 + $0x10] sm:$0xff] %v4340_v50  ;;  %v4413_v50 = vld [vmem:[%s6217_s29 + $0x50] sm:$0xff] }
 0x77b   : > { %v4267_v48 = vpop.permute.xlu0 %4266  ;;  %4429 = vst [vmem:[%s6244_s12 + $0x50] sm:$0xff] %v4413_v50 }
 0x77c   : > { %v4356_v60 = vmul.f32 %v4267_v48, %v8866_v39  ;;  %v4168_v39 = vld [vmem:[#allocation4 + $0x90] sm:$0xff]  ;;  %v4414_v48 = vld [vmem:[%s6217_s29 + $0x58] sm:$0xff] }
 0x77d   : > { %4430 = vst [vmem:[%s6244_s12 + $0x58] sm:$0xff] %v4414_v48 }
 0x77e   : > { %4388 = vst [vmem:[%s6242_s4 + $0x18] sm:$0xff] %v4356_v60  ;;  %v4415_v60 = vld [vmem:[%s6217_s29 + $0x60] sm:$0xff] }
 0x77f   : > { %v4262_v56 = vpop.permute.xlu1 %4261  ;;  %4431 = vst [vmem:[%s6244_s12 + $0x60] sm:$0xff] %v4415_v60 }
 0x780   : > { %v4355_v1 = vmul.f32 %v4262_v56, %v8824_v9  ;;  %v4212_v2 = vpop.permute.xlu2 %4211  ;;  %v4416_v56 = vld [vmem:[%s6217_s29 + $0x68] sm:$0xff] }
 0x781   : > { %v4345_v62 = vmul.f32 %v4212_v2, %v4153_v34  ;;  %v4418_v2 = vld [vmem:[%s6217_s29 + $0x78] sm:$0xff]  ;;  %4432 = vst [vmem:[%s6244_s12 + $0x68] sm:$0xff] %v4416_v56 }
 0x782   : > { %4387 = vst [vmem:[%s6242_s4 + $0x8] sm:$0xff] %v4355_v1 }
 0x783   : > { %4377 = vst [vmem:[%s6242_s4 + $0x60] sm:$0xff] %v4345_v62 }
 0x784   : > { %v4207_v57 = vpop.permute.xlu0 %4206  ;;  %4434 = vst [vmem:[%s6244_s12 + $0x78] sm:$0xff] %v4418_v2 }
 0x785   : > { %v4344_v29 = vmul.f32 %v4207_v57, %v4152_v49 }
 0x787   : > { %4376 = vst [vmem:[%s6242_s4 + $0x50] sm:$0xff] %v4344_v29  ;;  %v4202_v40 = vpop.permute.xlu1 %4201 }
 0x788   : > { %v4287_v5 = vpop.permute.xlu2 %4286  ;;  %v4343_v28 = vmul.f32 %v4202_v40, %v4151_v20  ;;  %v4436_v20 = vld [vmem:[%s6224_s0 + $0x8] sm:$0xff]  ;;  %v4437_v40 = vld [vmem:[%s6224_s0 + $0x10] sm:$0xff] }
 0x789   : > { %v4360_v9 = vmul.f32 %v4287_v5, %v4168_v39  ;;  %4736 = vst [vmem:[%s6244_s12 + $0x88] sm:$0xff] %v4436_v20  ;;  %v4439_v5 = vld [vmem:[%s6224_s0 + $0x20] sm:$0xff] }
 0x78a   : > { %4375 = vst [vmem:[%s6242_s4 + $0x40] sm:$0xff] %v4343_v28  ;;  %v4440_v28 = vld [vmem:[%s6224_s0 + $0x28] sm:$0xff] }
 0x78b   : > { %4392 = vst [vmem:[%s6242_s4 + $0x58] sm:$0xff] %v4360_v9  ;;  %v4441_v9 = vld [vmem:[%s6224_s0 + $0x30] sm:$0xff] }
 0x78c   : > { %4737 = vst [vmem:[%s6244_s12 + $0x90] sm:$0xff] %v4437_v40 }
 0x78d   : > { %v4282_v21 = vpop.permute.xlu0 %4281  ;;  %4739 = vst [vmem:[%s6244_s12 + $0xa0] sm:$0xff] %v4439_v5 }
 0x78e   : > { %v4359_v7 = vmul.f32 %v4282_v21, %v8967_v4  ;;  %v4442_v21 = vld [vmem:[%s6224_s0 + $0x38] sm:$0xff]  ;;  %4740 = vst [vmem:[%s6244_s12 + $0xa8] sm:$0xff] %v4440_v28 }
 0x78f   : > { %4741 = vst [vmem:[%s6244_s12 + $0xb0] sm:$0xff] %v4441_v9 }
 0x790   : > { %4391 = vst [vmem:[%s6242_s4 + $0x48] sm:$0xff] %v4359_v7 }
 0x791   : > { %4742 = vst [vmem:[%s6244_s12 + $0xb8] sm:$0xff] %v4442_v21 }
 0x793   : > { %v4277_v23 = vpop.permute.xlu1 %4276 }
 0x794   : > { %v4358_v3 = vmul.f32 %v4277_v23, %v8950_v38  ;;  %v4443_v23 = vld [vmem:[%s6224_s0 + $0x40] sm:$0xff] }
 0x795   : > { %v4227_v55 = vpop.permute.xlu2 %4226  ;;  %4743 = vst [vmem:[%s6244_s12 + $0xc0] sm:$0xff] %v4443_v23 }
 0x796   : > { %v4348_v59 = vmul.f32 %v4227_v55, %v4156_v19  ;;  %4390 = vst [vmem:[%s6242_s4 + $0x38] sm:$0xff] %v4358_v3  ;;  %v4444_v3 = vld [vmem:[%s6224_s0 + $0x48] sm:$0xff]  ;;  %v4445_v19 = vld [vmem:[%s6224_s0 + $0x50] sm:$0xff]  ;;  %v4446_v55 = vld [vmem:[%s6224_s0 + $0x58] sm:$0xff] }
 0x797   : > { %4744 = vst [vmem:[%s6244_s12 + $0xc8] sm:$0xff] %v4444_v3 }
 0x798   : > { %4380 = vst [vmem:[%s6242_s4 + $0x90] sm:$0xff] %v4348_v59  ;;  %v4447_v59 = vld [vmem:[%s6224_s0 + $0x60] sm:$0xff] }
 0x799   : > { %4745 = vst [vmem:[%s6244_s12 + $0xd0] sm:$0xff] %v4445_v19 }
 0x79a   : > { %4746 = vst [vmem:[%s6244_s12 + $0xd8] sm:$0xff] %v4446_v55 }
 0x79b   : > { %v4222_v27 = vpop.permute.xlu0 %4221  ;;  %4747 = vst [vmem:[%s6244_s12 + $0xe0] sm:$0xff] %v4447_v59 }
 0x79c   : > { %v4347_v0 = vmul.f32 %v4222_v27, %v4155_v18  ;;  %v4448_v18 = vld [vmem:[%s6224_s0 + $0x68] sm:$0xff]  ;;  %v4449_v27 = vld [vmem:[%s6224_s0 + $0x70] sm:$0xff] }
 0x79d   : > { %v4217_v37 = vpop.permute.xlu1 %4216  ;;  %4748 = vst [vmem:[%s6244_s12 + $0xe8] sm:$0xff] %v4448_v18 }
 0x79e   : > { %v4302_v12 = vpop.permute.xlu2 %4301  ;;  %4379 = vst [vmem:[%s6242_s4 + $0x80] sm:$0xff] %v4347_v0  ;;  %v4346_v4 = vmul.f32 %v4217_v37, %v4154_v14  ;;  %v4450_v0 = vld [vmem:[%s6224_s0 + $0x78] sm:$0xff] }
 0x79f   : > { %v4363_v38 = vmul.f32 %v4302_v12, %v8615_v32  ;;  %4749 = vst [vmem:[%s6244_s12 + $0xf0] sm:$0xff] %v4449_v27 }
 0x7a0   : > { %4378 = vst [vmem:[%s6242_s4 + $0x70] sm:$0xff] %v4346_v4 }
 0x7a1   : > { %4395 = vst [vmem:[%s6242_s4 + $0x88] sm:$0xff] %v4363_v38 }
 0x7a2   : > { %4750 = vst [vmem:[%s6244_s12 + $0xf8] sm:$0xff] %v4450_v0 }
 0x7a5   : > { %v4297_v15 = vpop.permute.xlu0 %4296 }
 0x7a6   : > { %v4362_v6 = vmul.f32 %v4297_v15, %v4170_v42 }
 0x7a8   : > { %v4242_v8 = vpop.permute.xlu2 %4241  ;;  %4394 = vst [vmem:[%s6242_s4 + $0x78] sm:$0xff] %v4362_v6 }
 0x7a9   : > { %v4351_v51 = vmul.f32 %v4242_v8, %v8636_v54  ;;  %v4292_v32 = vpop.permute.xlu1 %4291  ;;  %v4408_v54 = vld [vmem:[%s6217_s29 + $0x28] sm:$0xff] }
 0x7aa   : > { %v4361_v41 = vmul.f32 %v4292_v32, %v4169_v46  ;;  %4424 = vst [vmem:[%s6244_s12 + $0x28] sm:$0xff] %v4408_v54 }
 0x7ab   : > { %4383 = vst [vmem:[%s6242_s4 + $0xc0] sm:$0xff] %v4351_v51 }
 0x7ac   : > { %4393 = vst [vmem:[%s6242_s4 + $0x68] sm:$0xff] %v4361_v41 }
 0x7b1   : > { %v4237_v58 = vpop.permute.xlu0 %4236 }
 0x7b2   : > { %v4350_v33 = vmul.f32 %v4237_v58, %v4158_v17 }
 0x7b3   : > { %v4232_v44 = vpop.permute.xlu1 %4231 }
 0x7b4   : > { %4382 = vst [vmem:[%s6242_s4 + $0xb0] sm:$0xff] %v4350_v33  ;;  %v4349_v11 = vmul.f32 %v4232_v44, %v4157_v52 }
 0x7b6   : > { %v4317_v30 = vpop.permute.xlu2 %4316  ;;  %4381 = vst [vmem:[%s6242_s4 + $0xa0] sm:$0xff] %v4349_v11 }
 0x7b7   : > { %v4366_v31 = vmul.f32 %v4317_v30, %v8812_v13  ;;  %v4417_v13 = vld [vmem:[%s6217_s29 + $0x70] sm:$0xff] }
 0x7b8   : > { %4433 = vst [vmem:[%s6244_s12 + $0x70] sm:$0xff] %v4417_v13 }
 0x7b9   : > { %4398 = vst [vmem:[%s6242_s4 + $0xb8] sm:$0xff] %v4366_v31 }
 0x7bb   : > { %v4312_v1 = vpop.permute.xlu0 %4311 }
 0x7bc   : > { %v4365_v34 = vmul.f32 %v4312_v1, %v8771_v22  ;;  %v4435_v22 = vld [vmem:[%s6224_s0] sm:$0xff] }
 0x7bd   : > { %4735 = vst [vmem:[%s6244_s12 + $0x80] sm:$0xff] %v4435_v22 }
 0x7be   : > { %v4332_v62 = vpop.permute.xlu2 %4331  ;;  %4397 = vst [vmem:[%s6242_s4 + $0xa8] sm:$0xff] %v4365_v34  ;;  %v4307_v49 = vpop.permute.xlu1 %4306 }
 0x7bf   : > { %v4369_v57 = vmul.f32 %v4332_v62, %v8948_v26  ;;  %v4364_v29 = vmul.f32 %v4307_v49, %v8713_v10  ;;  %v4438_v10 = vld [vmem:[%s6224_s0 + $0x18] sm:$0xff] }
 0x7c0   : > { %4738 = vst [vmem:[%s6244_s12 + $0x98] sm:$0xff] %v4438_v10 }
 0x7c1   : > { %4401 = vst [vmem:[%s6242_s4 + $0xe8] sm:$0xff] %v4369_v57 }
 0x7c2   : > { %4396 = vst [vmem:[%s6242_s4 + $0x98] sm:$0xff] %v4364_v29 }
 0x7c3   : > { %v4327_v39 = vpop.permute.xlu0 %4326 }
 0x7c4   : > { %v4368_v26 = vmul.f32 %v4327_v39, %v8902_v45 }
 0x7c6   : > { %4400 = vst [vmem:[%s6242_s4 + $0xd8] sm:$0xff] %v4368_v26 }
 0x7c9   : > { %v4337_v45 = vpop.permute.xlu1 %4336 }
 0x7ca   : > { %v4370_v7 = vmul.f32 %v4337_v45, %v8961_v24 }
 0x7cc   : > { %4402 = vst [vmem:[%s6242_s4 + $0xf8] sm:$0xff] %v4370_v7 }
 0x7cd PF: > { %s9629_s7 = sld [smem:[#allocation49_spill]]  ;;  %s4490_s2 = sshll.u32 %s6242_s4, 4  ;;  %s4491_s2 = int_to_ptr.vmem [resolvable:$true] %s4490_s2 }
 0x7ce   : > { %s9631_s25 = sld [smem:[#allocation43_spill]]  ;;  %s4469_s1 = scalar_lea.sflag [#allocation11], %s357_s19 }
 0x7cf   : > { %s9632_s30 = sld [smem:[#allocation44_spill]] }
 0x7d0   : > { %s9634_s3 = sld [smem:[#allocation137_spill]] }
 0x7d3   : > { %p9630_p4 = scmp.ne.s32.totalorder %s9629_s7, 0 }
 0x7d5   : > { %s4906_s14 = scalar_select %p9630_p4, [#allocation7], [#allocation23] }
 0x7d6   : > { %s4907_s5 = scalar_select %p9630_p4, %s9631_s25, 0 }
 0x7d7   : > { %s4754_s29 = sshll.u32 %s9632_s30, 1 }
 0x7d8   : > { %s4481_s13 = sld [smem:[%s4906_s14 + %s4907_s5]]  ;;  %s5586_s5 = scalar_lea.hbm %s9634_s3, 1024 }
 0x7de   : > { %s4765_s28 = sshll.u32 %s4481_s13, 6 }
 0x7df   : > { %s4487_s8 = sadd.s32 %s4765_s28, %s4754_s29 }
 0x7e0   : > { %s4756_s0 = sshll.u32 %s4487_s8, 3 }
 0x7e1   : > { %s4489_s9 = scalar_lea.hbm %s9634_s3, %s4756_s0 }
 0x7e2   : > { %s4492_s24 = sshll.u32 %s4489_s9, 4  ;;  %s4493_s24 = int_to_ptr.hbm [resolvable:$true] %s4492_s24 }
 0x7e3   : > { %s5580_s26 = sshra.s32 %s4493_s24, 4  ;;  %s5581_s26 = int_to_ptr.hbm [resolvable:$true] %s5580_s26 }
 0x7e4   : > { %s5582_s18 = scalar_lea.hbm %s5581_s26, 256  ;;  %p5587_p1 = scmp.lt.s32.totalorder %s5581_s26, %s9634_s3 }
 0x7e5   : > { %p5583_p2 = scmp.ne.s32.totalorder %s5581_s26, %s5582_s18  ;;  %p5588_p10 = scmp.lt.s32.totalorder %s5586_s5, %s5582_s18 }
 0x7e7   : > { %p5584_p6 = pnand %p5583_p2, %p9630_p4  ;;  %p5589_p8 = por %p5588_p10, %p5587_p1 }
 0x7e9   : > { %p5585_p12 = pneg %p5584_p6 }
 0x7eb   : > { %p5590_p11 = pnand %p5589_p8, %p5585_p12 }
 0x7ed   : > { %5593 = shalt.err (!%p5590_p11)
}
 0x7ee   : > { %s5787_s19 = smov 256   ;;  %s9635_s20 = sld [smem:[#allocation35_spill]] }
 0x7ef   : > { %s5788_s28 = smov 512   ;;  %s5789_s8 = smov 16  }
 0x7f0   : > { %4908 = dma.vmem_to_hbm [thread:$0]  (%p9630_p4), %s4491_s2, 4096, %s4493_s24, %s4469_s1, %s5787_s19, %s5788_s28, %s5789_s8  }
 0x7f4   : > { %s9636_s0 = sand.u32 1, %s9635_s20  }
 0x7f5   : > { %s9110_s23 = scalar_lea.sflag [#allocation17], %s9636_s0 }
 0x7f6   : > { %s9637_s27 = sld [smem:[#allocation52_spill]]  ;;  %s4758_s9 = sshll.u32 %s9632_s30, 5 }
 0x7f7   : > { %s4520_s2 = sshll.u32 %s6244_s12, 4  ;;  %s5790_s24 = smov 2048   ;;  %s4521_s2 = int_to_ptr.vmem [resolvable:$true] %s4520_s2 }
 0x7f8   : > { %s5791_s1 = smov 8192   ;;  %s5792_s26 = smov 16  }
 0x7f9   : > { %s5793_s4 = smov 128   ;;  %s5794_s12 = smov 8  }
 0x7fa   : > { %s9639_s29 = sld [smem:[#allocation138_spill]]  ;;  %s5795_s28 = smov [#allocation18]  }
 0x7fb   : > { %s5796_s8 = smov 0  }
 0x7fc   : > { %p9638_p13 = scmp.ne.s32.totalorder %s9637_s27, 0 }
 0x7fe   : > { %s4909_s18 = scalar_select %p9638_p13, [#allocation7], [#allocation24] }
 0x7ff   : > { %s9687_s25 = smov (!%p9638_p13, %s9631_s25), 0  ;;  %4911 = sst [smem:[#allocation19]] (%p9638_p13), %s5790_s24 }
 0x800   : > { %s4502_s7 = sld [smem:[%s4909_s18 + %s9687_s25]] }
 0x801   : > { %4912 = sst [smem:[#allocation19 + $0x1]] (%p9638_p13), %s5791_s1 }
 0x802   : > { %4913 = sst [smem:[#allocation19 + $0x2]] (%p9638_p13), %s5792_s26 }
 0x803   : > { %4914 = sst [smem:[#allocation19 + $0x3]] (%p9638_p13), %s5793_s4 }
 0x804   : > { %4915 = sst [smem:[#allocation19 + $0x4]] (%p9638_p13), %s5793_s4 }
 0x805   : > { %4916 = sst [smem:[#allocation19 + $0x5]] (%p9638_p13), %s5794_s12 }
 0x806   : > { %s4757_s14 = sshll.u32 %s4502_s7, 4 }
 0x807   : > { %s4507_s25 = sadd.s32 %s4758_s9, %s4757_s14 }
 0x808   : > { %s4759_s30 = sshll.u32 %s4507_s25, 3 }
 0x809   : > { %s4509_s19 = scalar_lea.hbm %s9639_s29, %s4759_s30 }
 0x80a   : > { %s4522_s20 = sshll.u32 %s4509_s19, 4  ;;  %s4523_s20 = int_to_ptr.hbm [resolvable:$true] %s4522_s20 }
 0x80b   : > { %4917 = dma.general (%p9638_p13), %s4521_s2, 4096, %s4523_s20, %s9110_s23, %s5795_s28, [#allocation19], %s5796_s8, 0  }
 0x80c PF: > { %s9640_s0 = sld [smem:[#allocation37_spill]]  ;;  %p4944_p0 = scmp.ge.s32.totalorder %s5774_s22, 2 }
 0x80d   : > { %s9641_s18 = sld [smem:[#allocation50_spill]] }
 0x812   : > { %s4550_s9 = sand.u32 1, %s9640_s0  }
 0x813   : > { %p9642_p9 = scmp.ne.s32.totalorder %s9641_s18, 0  ;;  %s4551_s7 = scalar_lea.sflag [#allocation11], %s4550_s9 }
 0x815   : > { %p4937_p7 = pnand %p4944_p0, %p9642_p9 }
 0x817   : > { %p4938_p5 = pneg %p4937_p7 }
 0x819   : > { %5689 = dma.done.wait (%p4938_p5), %s4551_s7, 4096  }
 0x81a   : > { %5691 = vsyncadd (%p4938_p5), %s4551_s7, 4294963200  ;;  %s9643_s24 = sld [smem:[#allocation34_spill]] }
 0x81b   : > { %s9644_s1 = sld [smem:[#allocation53_spill]] }
 0x820   : > { %s4560_s26 = sand.u32 1, %s9643_s24  }
 0x821   : > { %p9645_p3 = scmp.ne.s32.totalorder %s9644_s1, 0  ;;  %s4561_s27 = scalar_lea.sflag [#allocation17], %s4560_s26 }
 0x823   : > { %p4940_p4 = pnand %p4944_p0, %p9645_p3 }
 0x825   : > { %p4941_p2 = pneg %p4940_p4 }
 0x827   : > { %5693 = dma.done.wait (%p4941_p2), %s4561_s27, 4096  }
 0x828   : > { %5695 = vsyncadd (%p4941_p2), %s4561_s27, 4294963200  ;;  %s42_s22 = sadd.s32 1, %s5774_s22   ;;  %s9647_s0 = sld [smem:[#allocation35_spill]] }
 0x829   : > { %p9145_p6 = scmp.ge.s32.totalorder %s42_s22, 8   ;;  %s9648_s1 = sld [smem:[#allocation36_spill]] }
 0x82a   : > { %s9649_s29 = sld [smem:[#allocation54_spill]]  ;;  %s9660_s9 = smov %s5726_s10 }
 0x82b   : > { %s9650_s30 = sld [smem:[#allocation38_spill]]  ;;  %s9661_s10 = smov %s5730_s11 }
 0x82c   : > { %s9651_s7 = sld [smem:[#allocation39_spill]]  ;;  %s9662_s11 = smov %s6171_s15 }
 0x82d   : > { %s9652_s8 = sld [smem:[#allocation51_spill]]  ;;  %s9663_s15 = smov %s5750_s16 }
 0x82e   : > { %s9653_s12 = sld [smem:[#allocation41_spill]]  ;;  %s9664_s16 = smov %s5754_s17 }
 0x82f   : > { %s9654_s13 = sld [smem:[#allocation42_spill]]  ;;  %s9666_s19 = smov %s5770_s21 }
 0x830   : > { %s9655_s14 = sld [smem:[#allocation48_spill]] }
 0x831   : > { %s9656_s2 = sld [smem:[#allocation57_spill]] }
 0x832   : > { %s9657_s18 = sld [smem:[#allocation45_spill]] }
 0x833   : > { %s9658_s20 = sld [smem:[#allocation46_spill]] }
 0x834   : > { %s9659_s4 = sld [smem:[#allocation47_spill]] }
 0x836   :  { %41 = sbr.rel (!%p9145_p6) target bundleno = 28 (0x1c), region = 136 }
 0x837   : > { %s9665_s17 = smov %s9656_s2 }
 0x83a   : > { %s9667_s21 = smov %s9659_s4 }
 0x83b   :  { %4567 = vsyncpa [#allocation10], 1 }
 0x83c   :  { %4569 = vsyncpa [#allocation10 + $0x1], 1 }
 0x83d   :  { %4570 = vsyncpa [#allocation13], 1 }
 0x83e   :  { %4572 = vsyncpa [#allocation13 + $0x1], 1 }
 0x83f   :  { %4573 = vsyncpa [#allocation11], 1 }
 0x840   :  { %4575 = vsyncpa [#allocation11 + $0x1], 1 }
 0x841   :  { %4576 = vsyncpa [#allocation17], 1 }
 0x842   :  { %4578 = vsyncpa [#allocation17 + $0x1], 1 }

</bundles_post_ra>
